<compile_context>
chip_gen: v6e
topology: v6e:2x2x1
jax: 0.10.0
libtpu: 0.0.40
codegen_flags: <defaults>
</compile_context>

<pallas_src>
import functools

import jax
import jax.numpy as jnp
from jax import lax
from jax.experimental import pallas as pl
from jax.experimental.pallas import tpu as pltpu


def _round_up(x, m):
    return (x + m - 1) // m * m


def bilstm_recurrence_kernel(pre_f_ref, pre_b_ref, len_ref,
                             w_hh_f_ref, w_hh_b_ref,
                             w_fc_f_ref, w_fc_b_ref, b_fc_ref,
                             out_ref,
                             h_f_scr, c_f_scr, h_b_scr, c_b_scr,
                             *, seq_len_padded, t_block, hp, unroll,
                             compute_dtype):
    """Bidirectional LSTM recurrence over one (batch_block, time_block) tile.

    pre_f_ref : (TB, BB, 4*hp) streamed forward gate pre-activations
                (x@W_ih + b, gate layout [i|f|g|o], compute_dtype).
    pre_b_ref : (TB, BB, 4*hp) streamed backward pre-activations; the BlockSpec
                index_map walks the padded time axis in REVERSE, so in-block
                row (TB-1-s) is padded timestep (Tp-1-t).
    len_ref   : (BB, 1) int32 sequence lengths.
    w_hh_*    : (hp, 4*hp) per-direction recurrent weights (compute_dtype).
    w_fc_*    : (hp, Op) per-direction halves of the final projection.
    b_fc_ref  : (1, Op) f32.
    out_ref   : (BB, Op) sigmoid(logits), written on the last time block.
    *_scr     : (BB, hp) f32 state carried across the time grid axis.
    """
    t_blk = pl.program_id(1)
    n_tblk = pl.num_programs(1)

    @pl.when(t_blk == 0)
    def _init():
        h_f_scr[...] = jnp.zeros_like(h_f_scr)
        c_f_scr[...] = jnp.zeros_like(c_f_scr)
        h_b_scr[...] = jnp.zeros_like(h_b_scr)
        c_b_scr[...] = jnp.zeros_like(c_b_scr)

    lengths = len_ref[...]                       # (BB, 1) int32
    w_hh_f = w_hh_f_ref[...]                     # (hp, 4hp)
    w_hh_b = w_hh_b_ref[...]
    t0 = t_blk * t_block

    def lstm_cell(pre, h, c, w_hh):
        # single dense (BB,hp)@(hp,4hp) MXU push per direction, f32 accumulate
        gates = pre.astype(jnp.float32) + jnp.dot(
            h.astype(compute_dtype), w_hh, preferred_element_type=jnp.float32)
        i = jax.nn.sigmoid(gates[:, 0 * hp:1 * hp])
        f = jax.nn.sigmoid(gates[:, 1 * hp:2 * hp])
        g = jnp.tanh(gates[:, 2 * hp:3 * hp])
        o = jax.nn.sigmoid(gates[:, 3 * hp:4 * hp])
        c_new = f * c + i * g
        h_new = o * jnp.tanh(c_new)
        return h_new, c_new

    def step(s, carry):
        h_f, c_f, h_b, c_b = carry
        t = t0 + s                                # forward timestep (padded axis)
        tb = (seq_len_padded - 1) - t             # backward timestep (padded axis)
        # forward direction: update while t < length
        hn, cn = lstm_cell(pre_f_ref[s], h_f, c_f, w_hh_f)
        m = lengths > t
        h_f = jnp.where(m, hn, h_f)
        c_f = jnp.where(m, cn, c_f)
        # backward direction: its streamed block is time-reversed
        hn, cn = lstm_cell(pre_b_ref[t_block - 1 - s], h_b, c_b, w_hh_b)
        m = lengths > tb
        h_b = jnp.where(m, hn, h_b)
        c_b = jnp.where(m, cn, c_b)
        return h_f, c_f, h_b, c_b

    h_f, c_f, h_b, c_b = lax.fori_loop(
        0, t_block, step,
        (h_f_scr[...], c_f_scr[...], h_b_scr[...], c_b_scr[...]),
        unroll=unroll)
    h_f_scr[...] = h_f
    c_f_scr[...] = c_f
    h_b_scr[...] = h_b
    c_b_scr[...] = c_b

    @pl.when(t_blk == n_tblk - 1)
    def _finalize():
        logits = (jnp.dot(h_f.astype(compute_dtype), w_fc_f_ref[...],
                          preferred_element_type=jnp.float32)
                  + jnp.dot(h_b.astype(compute_dtype), w_fc_b_ref[...],
                            preferred_element_type=jnp.float32)
                  + b_fc_ref[...])
        out_ref[...] = jax.nn.sigmoid(logits)


def bilstm_glove_forward(text, lengths, params, *,
                         time_block=16, batch_block=64, unroll=None,
                         compute_dtype=jnp.bfloat16):
    """text: (B, T) int32 token ids, lengths: (B,) int32 valid lengths."""
    LANE, SUBLANE = 128, 8
    emb_tbl = params['embedding']
    w_ih_f, w_hh_f, b_f = params['w_ih_f'], params['w_hh_f'], params['b_f']
    w_ih_b, w_hh_b, b_b = params['w_ih_b'], params['w_hh_b'], params['b_b']
    w_fc, b_fc = params['w_fc'], params['b_fc']

    B, T = text.shape
    E = emb_tbl.shape[1]
    H = w_hh_f.shape[0]
    O = w_fc.shape[1]

    Hp = _round_up(H, LANE)                       # lane-aligned gate blocks
    Op = _round_up(O, LANE)                       # lane-dense output store
    BB = min(_round_up(batch_block, SUBLANE), _round_up(B, SUBLANE))
    Bp = _round_up(B, BB)
    # v7x megacore: if the whole batch fits in one block, split it in two so the
    # "parallel" batch axis can spread across both TensorCores (keep >=32 rows).
    if Bp == BB and BB >= 8 * SUBLANE:
        BB = _round_up(BB // 2, SUBLANE)
        Bp = _round_up(B, BB)
    TB = max(1, min(time_block, T))
    Tp = _round_up(T, TB)
    n_tblk = Tp // TB
    unroll_eff = TB if unroll is None else max(1, min(unroll, TB))
    f32 = jnp.float32

    # ---- one-time weight layout plumbing (small tensors, plain XLA) ---------
    def pad_gates(w):                             # (R, 4H) -> (R, 4Hp)
        r = w.shape[0]
        return jnp.pad(w.reshape(r, 4, H),
                       ((0, 0), (0, 0), (0, Hp - H))).reshape(r, 4 * Hp)

    # input-projection weights for both directions side by side: (E, 8Hp)
    w_ih_cat = jnp.concatenate([pad_gates(w_ih_f), pad_gates(w_ih_b)],
                               axis=1).astype(compute_dtype)
    b_cat = jnp.concatenate([pad_gates(b_f), pad_gates(b_b)], axis=1)   # (1, 8Hp)

    def pad_hh(w):                                # (H, 4H) -> (Hp, 4Hp)
        return jnp.pad(pad_gates(w), ((0, Hp - H), (0, 0)))

    w_hh_f_p = pad_hh(w_hh_f).astype(compute_dtype)
    w_hh_b_p = pad_hh(w_hh_b).astype(compute_dtype)

    # final FC split per direction, lane-padded output
    w_fc_f_p = jnp.zeros((Hp, Op), f32).at[:H, :O].set(w_fc[:H]).astype(compute_dtype)
    w_fc_b_p = jnp.zeros((Hp, Op), f32).at[:H, :O].set(w_fc[H:]).astype(compute_dtype)
    b_fc_p = jnp.zeros((1, Op), f32).at[:, :O].set(b_fc)

    # ---- embedding gather (time-major) + single hoisted input projection ----
    emb = jnp.take(emb_tbl, text.T, axis=0).astype(compute_dtype)       # (T,B,E)
    emb = jnp.pad(emb, ((0, Tp - T), (0, Bp - B), (0, 0)))              # (Tp,Bp,E)
    # biases fused into the matmul epilogue; result stored in compute_dtype
    pre = (jnp.dot(emb.reshape(Tp * Bp, E), w_ih_cat,
                   preferred_element_type=jnp.float32)
           + b_cat).astype(compute_dtype).reshape(Tp, Bp, 8 * Hp)

    len_col = jnp.pad(lengths.astype(jnp.int32).reshape(B, 1),
                      ((0, Bp - B), (0, 0)))

    # ---- generation-aware scoped-VMEM budget ---------------------------------
    itm = jnp.dtype(compute_dtype).itemsize
    vmem_needed = (
        2 * 2 * TB * BB * 4 * Hp * itm            # 2 streamed pre views x 2 buffers
        + 2 * 2 * Hp * 4 * Hp * itm               # W_hh_f / W_hh_b
        + 2 * 2 * Hp * Op * itm                   # W_fc_f / W_fc_b
        + 2 * (Op * 4 + BB * 4)                   # fc bias + lengths
        + 4 * BB * Hp * 4                         # h/c scratch (f32)
        + 2 * BB * Op * 4)                        # output block
    try:
        vmem_cap = int(pltpu.get_tpu_info().vmem_capacity_bytes)
    except Exception:
        vmem_cap = 64 << 20                       # conservative (v7x per-TC)
    vmem_limit = int(min(max(2 * vmem_needed, 16 << 20), (vmem_cap * 3) // 4))

    kernel = functools.partial(
        bilstm_recurrence_kernel,
        seq_len_padded=Tp, t_block=TB, hp=Hp, unroll=unroll_eff,
        compute_dtype=compute_dtype)

    out = pl.pallas_call(
        kernel,
        out_shape=jax.ShapeDtypeStruct((Bp, Op), jnp.float32),
        grid_spec=pltpu.PrefetchScalarGridSpec(
            num_scalar_prefetch=0,
            grid=(Bp // BB, n_tblk),              # (batch-parallel, time-sequential)
            in_specs=[
                # forward pre stream: gate-block 0, time blocks ascending
                pl.BlockSpec((TB, BB, 4 * Hp), lambda b, t: (t, b, 0)),
                # backward pre stream: SAME tensor, gate-block 1, time reversed
                pl.BlockSpec((TB, BB, 4 * Hp),
                             lambda b, t: (n_tblk - 1 - t, b, 1)),
                pl.BlockSpec((BB, 1), lambda b, t: (b, 0)),
                pl.BlockSpec((Hp, 4 * Hp), lambda b, t: (0, 0)),   # resident
                pl.BlockSpec((Hp, 4 * Hp), lambda b, t: (0, 0)),
                pl.BlockSpec((Hp, Op), lambda b, t: (0, 0)),
                pl.BlockSpec((Hp, Op), lambda b, t: (0, 0)),
                pl.BlockSpec((1, Op), lambda b, t: (0, 0)),
            ],
            out_specs=pl.BlockSpec((BB, Op), lambda b, t: (b, 0)),
            scratch_shapes=[pltpu.VMEM((BB, Hp), jnp.float32),
                            pltpu.VMEM((BB, Hp), jnp.float32),
                            pltpu.VMEM((BB, Hp), jnp.float32),
                            pltpu.VMEM((BB, Hp), jnp.float32)]),
        compiler_params=pltpu.CompilerParams(
            dimension_semantics=("parallel", "arbitrary"),
            vmem_limit_bytes=vmem_limit),
    )(pre, pre, len_col, w_hh_f_p, w_hh_b_p, w_fc_f_p, w_fc_b_p, b_fc_p)

    return out[:B, :O]


def init_params(key, vocab_size, embed_dim, hidden_dim, output_dim, pad_idx):
    keys = jax.random.split(key, 9)
    bound = 1.0 / float(hidden_dim) ** 0.5

    def u(k, shape):
        return jax.random.uniform(k, shape, jnp.float32, -bound, bound)

    embedding = 0.1 * jax.random.normal(keys[0], (vocab_size, embed_dim), jnp.float32)
    embedding = embedding.at[pad_idx].set(0.0)   # nn.Embedding padding_idx row
    return dict(
        embedding=embedding,
        # forward-direction LSTM params (pre-transposed; biases pre-summed)
        w_ih_f=u(keys[1], (embed_dim, 4 * hidden_dim)),
        w_hh_f=u(keys[2], (hidden_dim, 4 * hidden_dim)),
        b_f=u(keys[3], (1, 4 * hidden_dim)),
        # backward-direction LSTM params
        w_ih_b=u(keys[4], (embed_dim, 4 * hidden_dim)),
        w_hh_b=u(keys[5], (hidden_dim, 4 * hidden_dim)),
        b_b=u(keys[6], (1, 4 * hidden_dim)),
        # final Linear(2H -> output_dim), pre-transposed
        w_fc=u(keys[7], (2 * hidden_dim, output_dim)),
        b_fc=u(keys[8], (1, output_dim)),
    )


def reference_forward(text, lengths, params):
    """Pure-JAX reference with identical packed-BiLSTM semantics."""
    emb = jnp.take(params['embedding'], text, axis=0)
    B, T, _E = emb.shape
    H = params['w_hh_f'].shape[0]

    def cell(x, h, c, w_ih, w_hh, b):
        g = x @ w_ih + h @ w_hh + b
        i = jax.nn.sigmoid(g[:, :H]); f = jax.nn.sigmoid(g[:, H:2 * H])
        gg = jnp.tanh(g[:, 2 * H:3 * H]); o = jax.nn.sigmoid(g[:, 3 * H:])
        c2 = f * c + i * gg
        return o * jnp.tanh(c2), c2

    hf = cf = hb = cb = jnp.zeros((B, H), jnp.float32)
    lcol = lengths.reshape(B, 1)
    for t in range(T):
        hn, cn = cell(emb[:, t], hf, cf, params['w_ih_f'], params['w_hh_f'], params['b_f'])
        m = lcol > t
        hf = jnp.where(m, hn, hf); cf = jnp.where(m, cn, cf)
        tb = T - 1 - t
        hn, cn = cell(emb[:, tb], hb, cb, params['w_ih_b'], params['w_hh_b'], params['b_b'])
        m = lcol > tb
        hb = jnp.where(m, hn, hb); cb = jnp.where(m, cn, cb)
    hid = jnp.concatenate([hf, hb], axis=1)
    return jax.nn.sigmoid(hid @ params['w_fc'] + params['b_fc'])


if __name__ == "__main__":
    vocab_size, embed_dim, hidden_dim, output_dim, pad_idx = 50, 32, 32, 6, 0
    B, T = 2, 8

    key = jax.random.PRNGKey(0)
    k_params, k_text = jax.random.split(key)
    params = init_params(k_params, vocab_size, embed_dim, hidden_dim, output_dim, pad_idx)

    text = jax.random.randint(k_text, (B, T), 1, vocab_size, dtype=jnp.int32)
    lengths = jnp.array([8, 5], dtype=jnp.int32)
    pos = jnp.arange(T)[None, :]
    text = jnp.where(pos < lengths[:, None], text, pad_idx)   # pad tail with pad_idx

    ref = reference_forward(text, lengths, params)

    # f32 mode: tight-tolerance correctness check
    fwd_f32 = jax.jit(functools.partial(bilstm_glove_forward,
                                        compute_dtype=jnp.float32))
    out_f32 = jax.block_until_ready(fwd_f32(text, lengths, params))
    assert out_f32.shape == (B, output_dim)
    assert jnp.allclose(out_f32, ref, atol=1e-3, rtol=1e-3)

    # default (bf16 weights / streamed pre, f32 state & accumulation)
    out_bf16 = jax.block_until_ready(jax.jit(bilstm_glove_forward)(text, lengths, params))
    assert out_bf16.shape == (B, output_dim)
    assert jnp.allclose(out_bf16, ref, atol=2e-2, rtol=2e-2)

    print("KERNEL_OK")
</pallas_src>

<mosaic_0001>
module attributes {stable_mosaic.version = 11 : i64} {
  func.func @bilstm_recurrence_kernel(%arg0: i32, %arg1: i32, %arg2: memref<8x8x512xf32, #tpu.memory_space<vmem>>, %arg3: memref<8x8x512xf32, #tpu.memory_space<vmem>>, %arg4: memref<8x1xi32, #tpu.memory_space<vmem>>, %arg5: memref<128x512xf32, #tpu.memory_space<vmem>>, %arg6: memref<128x512xf32, #tpu.memory_space<vmem>>, %arg7: memref<128x128xf32, #tpu.memory_space<vmem>>, %arg8: memref<128x128xf32, #tpu.memory_space<vmem>>, %arg9: memref<1x128xf32, #tpu.memory_space<vmem>>, %arg10: memref<8x128xf32, #tpu.memory_space<vmem>>, %arg11: memref<8x128xf32, #tpu.memory_space<vmem>>, %arg12: memref<8x128xf32, #tpu.memory_space<vmem>>, %arg13: memref<8x128xf32, #tpu.memory_space<vmem>>, %arg14: memref<8x128xf32, #tpu.memory_space<vmem>>) attributes {dimension_semantics = [#tpu.dimension_semantics<parallel>, #tpu.dimension_semantics<arbitrary>], iteration_bounds = array<i64: 1, 1>, scalar_prefetch = 0 : i64, scratch_operands = 4 : i64, tpu.core_type = #tpu.core_type<tc>, window_params = [{transform_indices = @transform_0, window_bounds = array<i64: 8, 8, 512>}, {transform_indices = @transform_1, window_bounds = array<i64: 8, 8, 512>}, {transform_indices = @transform_2, window_bounds = array<i64: 8, 1>}, {pipeline_mode = #tpu.pipeline_mode<synchronous>, transform_indices = @transform_3, window_bounds = array<i64: 128, 512>}, {pipeline_mode = #tpu.pipeline_mode<synchronous>, transform_indices = @transform_4, window_bounds = array<i64: 128, 512>}, {pipeline_mode = #tpu.pipeline_mode<synchronous>, transform_indices = @transform_5, window_bounds = array<i64: 128, 128>}, {pipeline_mode = #tpu.pipeline_mode<synchronous>, transform_indices = @transform_6, window_bounds = array<i64: 128, 128>}, {pipeline_mode = #tpu.pipeline_mode<synchronous>, transform_indices = @transform_7, window_bounds = array<i64: 1, 128>}, {transform_indices = @transform_8, window_bounds = array<i64: 8, 128>}]} {
    %c0_i32 = arith.constant 0 : i32
    %0 = arith.cmpi eq, %arg1, %c0_i32 : i32
    %1 = arith.extui %0 : i1 to i32
    %c0_i32_0 = arith.constant 0 : i32
    %2 = arith.cmpi ne, %1, %c0_i32_0 : i32
    scf.if %2 {
      %cst_137 = arith.constant 0.000000e+00 : f32
      %650 = vector.broadcast %cst_137 : f32 to vector<8x128xf32>
      %c0_138 = arith.constant 0 : index
      %c0_139 = arith.constant 0 : index
      %651 = vector.load %arg11[%c0_138, %c0_139] : memref<8x128xf32, #tpu.memory_space<vmem>>, vector<8x128xf32>
      tpu.vector_store %arg11[%c0_138, %c0_139], %650 {strides = array<i32>} : memref<8x128xf32, #tpu.memory_space<vmem>>, vector<8x128xf32>,
      %cst_140 = arith.constant 0.000000e+00 : f32
      %652 = vector.broadcast %cst_140 : f32 to vector<8x128xf32>
      %c0_141 = arith.constant 0 : index
      %c0_142 = arith.constant 0 : index
      %653 = vector.load %arg12[%c0_141, %c0_142] : memref<8x128xf32, #tpu.memory_space<vmem>>, vector<8x128xf32>
      tpu.vector_store %arg12[%c0_141, %c0_142], %652 {strides = array<i32>} : memref<8x128xf32, #tpu.memory_space<vmem>>, vector<8x128xf32>,
      %cst_143 = arith.constant 0.000000e+00 : f32
      %654 = vector.broadcast %cst_143 : f32 to vector<8x128xf32>
      %c0_144 = arith.constant 0 : index
      %c0_145 = arith.constant 0 : index
      %655 = vector.load %arg13[%c0_144, %c0_145] : memref<8x128xf32, #tpu.memory_space<vmem>>, vector<8x128xf32>
      tpu.vector_store %arg13[%c0_144, %c0_145], %654 {strides = array<i32>} : memref<8x128xf32, #tpu.memory_space<vmem>>, vector<8x128xf32>,
      %cst_146 = arith.constant 0.000000e+00 : f32
      %656 = vector.broadcast %cst_146 : f32 to vector<8x128xf32>
      %c0_147 = arith.constant 0 : index
      %c0_148 = arith.constant 0 : index
      %657 = vector.load %arg14[%c0_147, %c0_148] : memref<8x128xf32, #tpu.memory_space<vmem>>, vector<8x128xf32>
      tpu.vector_store %arg14[%c0_147, %c0_148], %656 {strides = array<i32>} : memref<8x128xf32, #tpu.memory_space<vmem>>, vector<8x128xf32>,
    } else {
    }
    %c0 = arith.constant 0 : index
    %c0_1 = arith.constant 0 : index
    %3 = vector.load %arg4[%c0, %c0_1] : memref<8x1xi32, #tpu.memory_space<vmem>>, vector<8x1xi32>
    %c0_2 = arith.constant 0 : index
    %c0_3 = arith.constant 0 : index
    %4 = vector.load %arg5[%c0_2, %c0_3] : memref<128x512xf32, #tpu.memory_space<vmem>>, vector<128x512xf32>
    %c0_4 = arith.constant 0 : index
    %c0_5 = arith.constant 0 : index
    %5 = vector.load %arg6[%c0_4, %c0_5] : memref<128x512xf32, #tpu.memory_space<vmem>>, vector<128x512xf32>
    %c8_i32 = arith.constant 8 : i32
    %6 = arith.muli %arg1, %c8_i32 : i32
    %c0_6 = arith.constant 0 : index
    %c0_7 = arith.constant 0 : index
    %7 = vector.load %arg11[%c0_6, %c0_7] : memref<8x128xf32, #tpu.memory_space<vmem>>, vector<8x128xf32>
    %c0_8 = arith.constant 0 : index
    %c0_9 = arith.constant 0 : index
    %8 = vector.load %arg12[%c0_8, %c0_9] : memref<8x128xf32, #tpu.memory_space<vmem>>, vector<8x128xf32>
    %c0_10 = arith.constant 0 : index
    %c0_11 = arith.constant 0 : index
    %9 = vector.load %arg13[%c0_10, %c0_11] : memref<8x128xf32, #tpu.memory_space<vmem>>, vector<8x128xf32>
    %c0_12 = arith.constant 0 : index
    %c0_13 = arith.constant 0 : index
    %10 = vector.load %arg14[%c0_12, %c0_13] : memref<8x128xf32, #tpu.memory_space<vmem>>, vector<8x128xf32>
    %c0_i32_14 = arith.constant 0 : i32
    %11 = arith.addi %6, %c0_i32_14 : i32
    %c7_i32 = arith.constant 7 : i32
    %12 = arith.subi %c7_i32, %11 : i32
    %13 = arith.index_cast %c0_i32_14 : i32 to index
    %c0_15 = arith.constant 0 : index
    %c0_16 = arith.constant 0 : index
    %14 = vector.load %arg2[%13, %c0_15, %c0_16] : memref<8x8x512xf32, #tpu.memory_space<vmem>>, vector<1x8x512xf32>
    %15 = vector.shape_cast %14 : vector<1x8x512xf32> to vector<8x512xf32>
    %cst = arith.constant dense<0.000000e+00> : vector<8x512xf32>
    %16 = tpu.matmul %7, %4, %cst {dimension_numbers = #tpu.dot_dimension_numbers<[1], [0], [0], [1], [0, 0, 1, 1], [], []>} : vector<8x128xf32>, vector<128x512xf32>, vector<8x512xf32> -> vector<8x512xf32>
    %17 = arith.addf %15, %16 : vector<8x512xf32>
    %18 = vector.extract_strided_slice %17 {offsets = [0, 0], sizes = [8, 128], strides = [1, 1]} : vector<8x512xf32> to vector<8x128xf32>
    %19 = arith.negf %18 : vector<8x128xf32>
    %20 = math.exp %19 : vector<8x128xf32>
    %cst_17 = arith.constant 1.000000e+00 : f32
    %21 = vector.broadcast %cst_17 : f32 to vector<8x128xf32>
    %22 = arith.addf %21, %20 : vector<8x128xf32>
    %23 = arith.divf %21, %22 : vector<8x128xf32>
    %24 = vector.extract_strided_slice %17 {offsets = [0, 128], sizes = [8, 128], strides = [1, 1]} : vector<8x512xf32> to vector<8x128xf32>
    %25 = arith.negf %24 : vector<8x128xf32>
    %26 = math.exp %25 : vector<8x128xf32>
    %cst_18 = arith.constant 1.000000e+00 : f32
    %27 = vector.broadcast %cst_18 : f32 to vector<8x128xf32>
    %28 = arith.addf %27, %26 : vector<8x128xf32>
    %29 = arith.divf %27, %28 : vector<8x128xf32>
    %30 = vector.extract_strided_slice %17 {offsets = [0, 256], sizes = [8, 128], strides = [1, 1]} : vector<8x512xf32> to vector<8x128xf32>
    %31 = math.tanh %30 : vector<8x128xf32>
    %32 = vector.extract_strided_slice %17 {offsets = [0, 384], sizes = [8, 128], strides = [1, 1]} : vector<8x512xf32> to vector<8x128xf32>
    %33 = arith.negf %32 : vector<8x128xf32>
    %34 = math.exp %33 : vector<8x128xf32>
    %cst_19 = arith.constant 1.000000e+00 : f32
    %35 = vector.broadcast %cst_19 : f32 to vector<8x128xf32>
    %36 = arith.addf %35, %34 : vector<8x128xf32>
    %37 = arith.divf %35, %36 : vector<8x128xf32>
    %38 = arith.mulf %29, %8 : vector<8x128xf32>
    %39 = arith.mulf %23, %31 : vector<8x128xf32>
    %40 = arith.addf %38, %39 : vector<8x128xf32>
    %41 = math.tanh %40 : vector<8x128xf32>
    %42 = arith.mulf %37, %41 : vector<8x128xf32>
    %43 = vector.broadcast %11 : i32 to vector<8x1xi32>
    %44 = arith.cmpi sgt, %3, %43 : vector<8x1xi32>
    %45 = vector.shape_cast %44 : vector<8x1xi1> to vector<8x1xi1>
    %46 = vector.broadcast %45 : vector<8x1xi1> to vector<8x128xi1>
    %47 = arith.select %46, %42, %7 : vector<8x128xi1>, vector<8x128xf32>
    %48 = vector.shape_cast %44 : vector<8x1xi1> to vector<8x1xi1>
    %49 = vector.broadcast %48 : vector<8x1xi1> to vector<8x128xi1>
    %50 = arith.select %49, %40, %8 : vector<8x128xi1>, vector<8x128xf32>
    %c7_i32_20 = arith.constant 7 : i32
    %51 = arith.subi %c7_i32_20, %c0_i32_14 : i32
    %52 = arith.index_cast %51 : i32 to index
    %c0_21 = arith.constant 0 : index
    %c0_22 = arith.constant 0 : index
    %53 = vector.load %arg3[%52, %c0_21, %c0_22] : memref<8x8x512xf32, #tpu.memory_space<vmem>>, vector<1x8x512xf32>
    %54 = vector.shape_cast %53 : vector<1x8x512xf32> to vector<8x512xf32>
    %cst_23 = arith.constant dense<0.000000e+00> : vector<8x512xf32>
    %55 = tpu.matmul %9, %5, %cst_23 {dimension_numbers = #tpu.dot_dimension_numbers<[1], [0], [0], [1], [0, 0, 1, 1], [], []>} : vector<8x128xf32>, vector<128x512xf32>, vector<8x512xf32> -> vector<8x512xf32>
    %56 = arith.addf %54, %55 : vector<8x512xf32>
    %57 = vector.extract_strided_slice %56 {offsets = [0, 0], sizes = [8, 128], strides = [1, 1]} : vector<8x512xf32> to vector<8x128xf32>
    %58 = arith.negf %57 : vector<8x128xf32>
    %59 = math.exp %58 : vector<8x128xf32>
    %cst_24 = arith.constant 1.000000e+00 : f32
    %60 = vector.broadcast %cst_24 : f32 to vector<8x128xf32>
    %61 = arith.addf %60, %59 : vector<8x128xf32>
    %62 = arith.divf %60, %61 : vector<8x128xf32>
    %63 = vector.extract_strided_slice %56 {offsets = [0, 128], sizes = [8, 128], strides = [1, 1]} : vector<8x512xf32> to vector<8x128xf32>
    %64 = arith.negf %63 : vector<8x128xf32>
    %65 = math.exp %64 : vector<8x128xf32>
    %cst_25 = arith.constant 1.000000e+00 : f32
    %66 = vector.broadcast %cst_25 : f32 to vector<8x128xf32>
    %67 = arith.addf %66, %65 : vector<8x128xf32>
    %68 = arith.divf %66, %67 : vector<8x128xf32>
    %69 = vector.extract_strided_slice %56 {offsets = [0, 256], sizes = [8, 128], strides = [1, 1]} : vector<8x512xf32> to vector<8x128xf32>
    %70 = math.tanh %69 : vector<8x128xf32>
    %71 = vector.extract_strided_slice %56 {offsets = [0, 384], sizes = [8, 128], strides = [1, 1]} : vector<8x512xf32> to vector<8x128xf32>
    %72 = arith.negf %71 : vector<8x128xf32>
    %73 = math.exp %72 : vector<8x128xf32>
    %cst_26 = arith.constant 1.000000e+00 : f32
    %74 = vector.broadcast %cst_26 : f32 to vector<8x128xf32>
    %75 = arith.addf %74, %73 : vector<8x128xf32>
    %76 = arith.divf %74, %75 : vector<8x128xf32>
    %77 = arith.mulf %68, %10 : vector<8x128xf32>
    %78 = arith.mulf %62, %70 : vector<8x128xf32>
    %79 = arith.addf %77, %78 : vector<8x128xf32>
    %80 = math.tanh %79 : vector<8x128xf32>
    %81 = arith.mulf %76, %80 : vector<8x128xf32>
    %82 = vector.broadcast %12 : i32 to vector<8x1xi32>
    %83 = arith.cmpi sgt, %3, %82 : vector<8x1xi32>
    %84 = vector.shape_cast %83 : vector<8x1xi1> to vector<8x1xi1>
    %85 = vector.broadcast %84 : vector<8x1xi1> to vector<8x128xi1>
    %86 = arith.select %85, %81, %9 : vector<8x128xi1>, vector<8x128xf32>
    %87 = vector.shape_cast %83 : vector<8x1xi1> to vector<8x1xi1>
    %88 = vector.broadcast %87 : vector<8x1xi1> to vector<8x128xi1>
    %89 = arith.select %88, %79, %10 : vector<8x128xi1>, vector<8x128xf32>
    %c1_i32 = arith.constant 1 : i32
    %90 = arith.addi %6, %c1_i32 : i32
    %c7_i32_27 = arith.constant 7 : i32
    %91 = arith.subi %c7_i32_27, %90 : i32
    %92 = arith.index_cast %c1_i32 : i32 to index
    %c0_28 = arith.constant 0 : index
    %c0_29 = arith.constant 0 : index
    %93 = vector.load %arg2[%92, %c0_28, %c0_29] : memref<8x8x512xf32, #tpu.memory_space<vmem>>, vector<1x8x512xf32>
    %94 = vector.shape_cast %93 : vector<1x8x512xf32> to vector<8x512xf32>
    %cst_30 = arith.constant dense<0.000000e+00> : vector<8x512xf32>
    %95 = tpu.matmul %47, %4, %cst_30 {dimension_numbers = #tpu.dot_dimension_numbers<[1], [0], [0], [1], [0, 0, 1, 1], [], []>} : vector<8x128xf32>, vector<128x512xf32>, vector<8x512xf32> -> vector<8x512xf32>
    %96 = arith.addf %94, %95 : vector<8x512xf32>
    %97 = vector.extract_strided_slice %96 {offsets = [0, 0], sizes = [8, 128], strides = [1, 1]} : vector<8x512xf32> to vector<8x128xf32>
    %98 = arith.negf %97 : vector<8x128xf32>
    %99 = math.exp %98 : vector<8x128xf32>
    %cst_31 = arith.constant 1.000000e+00 : f32
    %100 = vector.broadcast %cst_31 : f32 to vector<8x128xf32>
    %101 = arith.addf %100, %99 : vector<8x128xf32>
    %102 = arith.divf %100, %101 : vector<8x128xf32>
    %103 = vector.extract_strided_slice %96 {offsets = [0, 128], sizes = [8, 128], strides = [1, 1]} : vector<8x512xf32> to vector<8x128xf32>
    %104 = arith.negf %103 : vector<8x128xf32>
    %105 = math.exp %104 : vector<8x128xf32>
    %cst_32 = arith.constant 1.000000e+00 : f32
    %106 = vector.broadcast %cst_32 : f32 to vector<8x128xf32>
    %107 = arith.addf %106, %105 : vector<8x128xf32>
    %108 = arith.divf %106, %107 : vector<8x128xf32>
    %109 = vector.extract_strided_slice %96 {offsets = [0, 256], sizes = [8, 128], strides = [1, 1]} : vector<8x512xf32> to vector<8x128xf32>
    %110 = math.tanh %109 : vector<8x128xf32>
    %111 = vector.extract_strided_slice %96 {offsets = [0, 384], sizes = [8, 128], strides = [1, 1]} : vector<8x512xf32> to vector<8x128xf32>
    %112 = arith.negf %111 : vector<8x128xf32>
    %113 = math.exp %112 : vector<8x128xf32>
    %cst_33 = arith.constant 1.000000e+00 : f32
    %114 = vector.broadcast %cst_33 : f32 to vector<8x128xf32>
    %115 = arith.addf %114, %113 : vector<8x128xf32>
    %116 = arith.divf %114, %115 : vector<8x128xf32>
    %117 = arith.mulf %108, %50 : vector<8x128xf32>
    %118 = arith.mulf %102, %110 : vector<8x128xf32>
    %119 = arith.addf %117, %118 : vector<8x128xf32>
    %120 = math.tanh %119 : vector<8x128xf32>
    %121 = arith.mulf %116, %120 : vector<8x128xf32>
    %122 = vector.broadcast %90 : i32 to vector<8x1xi32>
    %123 = arith.cmpi sgt, %3, %122 : vector<8x1xi32>
    %124 = vector.shape_cast %123 : vector<8x1xi1> to vector<8x1xi1>
    %125 = vector.broadcast %124 : vector<8x1xi1> to vector<8x128xi1>
    %126 = arith.select %125, %121, %47 : vector<8x128xi1>, vector<8x128xf32>
    %127 = vector.shape_cast %123 : vector<8x1xi1> to vector<8x1xi1>
    %128 = vector.broadcast %127 : vector<8x1xi1> to vector<8x128xi1>
    %129 = arith.select %128, %119, %50 : vector<8x128xi1>, vector<8x128xf32>
    %c7_i32_34 = arith.constant 7 : i32
    %130 = arith.subi %c7_i32_34, %c1_i32 : i32
    %131 = arith.index_cast %130 : i32 to index
    %c0_35 = arith.constant 0 : index
    %c0_36 = arith.constant 0 : index
    %132 = vector.load %arg3[%131, %c0_35, %c0_36] : memref<8x8x512xf32, #tpu.memory_space<vmem>>, vector<1x8x512xf32>
    %133 = vector.shape_cast %132 : vector<1x8x512xf32> to vector<8x512xf32>
    %cst_37 = arith.constant dense<0.000000e+00> : vector<8x512xf32>
    %134 = tpu.matmul %86, %5, %cst_37 {dimension_numbers = #tpu.dot_dimension_numbers<[1], [0], [0], [1], [0, 0, 1, 1], [], []>} : vector<8x128xf32>, vector<128x512xf32>, vector<8x512xf32> -> vector<8x512xf32>
    %135 = arith.addf %133, %134 : vector<8x512xf32>
    %136 = vector.extract_strided_slice %135 {offsets = [0, 0], sizes = [8, 128], strides = [1, 1]} : vector<8x512xf32> to vector<8x128xf32>
    %137 = arith.negf %136 : vector<8x128xf32>
    %138 = math.exp %137 : vector<8x128xf32>
    %cst_38 = arith.constant 1.000000e+00 : f32
    %139 = vector.broadcast %cst_38 : f32 to vector<8x128xf32>
    %140 = arith.addf %139, %138 : vector<8x128xf32>
    %141 = arith.divf %139, %140 : vector<8x128xf32>
    %142 = vector.extract_strided_slice %135 {offsets = [0, 128], sizes = [8, 128], strides = [1, 1]} : vector<8x512xf32> to vector<8x128xf32>
    %143 = arith.negf %142 : vector<8x128xf32>
    %144 = math.exp %143 : vector<8x128xf32>
    %cst_39 = arith.constant 1.000000e+00 : f32
    %145 = vector.broadcast %cst_39 : f32 to vector<8x128xf32>
    %146 = arith.addf %145, %144 : vector<8x128xf32>
    %147 = arith.divf %145, %146 : vector<8x128xf32>
    %148 = vector.extract_strided_slice %135 {offsets = [0, 256], sizes = [8, 128], strides = [1, 1]} : vector<8x512xf32> to vector<8x128xf32>
    %149 = math.tanh %148 : vector<8x128xf32>
    %150 = vector.extract_strided_slice %135 {offsets = [0, 384], sizes = [8, 128], strides = [1, 1]} : vector<8x512xf32> to vector<8x128xf32>
    %151 = arith.negf %150 : vector<8x128xf32>
    %152 = math.exp %151 : vector<8x128xf32>
    %cst_40 = arith.constant 1.000000e+00 : f32
    %153 = vector.broadcast %cst_40 : f32 to vector<8x128xf32>
    %154 = arith.addf %153, %152 : vector<8x128xf32>
    %155 = arith.divf %153, %154 : vector<8x128xf32>
    %156 = arith.mulf %147, %89 : vector<8x128xf32>
    %157 = arith.mulf %141, %149 : vector<8x128xf32>
    %158 = arith.addf %156, %157 : vector<8x128xf32>
    %159 = math.tanh %158 : vector<8x128xf32>
    %160 = arith.mulf %155, %159 : vector<8x128xf32>
    %161 = vector.broadcast %91 : i32 to vector<8x1xi32>
    %162 = arith.cmpi sgt, %3, %161 : vector<8x1xi32>
    %163 = vector.shape_cast %162 : vector<8x1xi1> to vector<8x1xi1>
    %164 = vector.broadcast %163 : vector<8x1xi1> to vector<8x128xi1>
    %165 = arith.select %164, %160, %86 : vector<8x128xi1>, vector<8x128xf32>
    %166 = vector.shape_cast %162 : vector<8x1xi1> to vector<8x1xi1>
    %167 = vector.broadcast %166 : vector<8x1xi1> to vector<8x128xi1>
    %168 = arith.select %167, %158, %89 : vector<8x128xi1>, vector<8x128xf32>
    %c2_i32 = arith.constant 2 : i32
    %169 = arith.addi %6, %c2_i32 : i32
    %c7_i32_41 = arith.constant 7 : i32
    %170 = arith.subi %c7_i32_41, %169 : i32
    %171 = arith.index_cast %c2_i32 : i32 to index
    %c0_42 = arith.constant 0 : index
    %c0_43 = arith.constant 0 : index
    %172 = vector.load %arg2[%171, %c0_42, %c0_43] : memref<8x8x512xf32, #tpu.memory_space<vmem>>, vector<1x8x512xf32>
    %173 = vector.shape_cast %172 : vector<1x8x512xf32> to vector<8x512xf32>
    %cst_44 = arith.constant dense<0.000000e+00> : vector<8x512xf32>
    %174 = tpu.matmul %126, %4, %cst_44 {dimension_numbers = #tpu.dot_dimension_numbers<[1], [0], [0], [1], [0, 0, 1, 1], [], []>} : vector<8x128xf32>, vector<128x512xf32>, vector<8x512xf32> -> vector<8x512xf32>
    %175 = arith.addf %173, %174 : vector<8x512xf32>
    %176 = vector.extract_strided_slice %175 {offsets = [0, 0], sizes = [8, 128], strides = [1, 1]} : vector<8x512xf32> to vector<8x128xf32>
    %177 = arith.negf %176 : vector<8x128xf32>
    %178 = math.exp %177 : vector<8x128xf32>
    %cst_45 = arith.constant 1.000000e+00 : f32
    %179 = vector.broadcast %cst_45 : f32 to vector<8x128xf32>
    %180 = arith.addf %179, %178 : vector<8x128xf32>
    %181 = arith.divf %179, %180 : vector<8x128xf32>
    %182 = vector.extract_strided_slice %175 {offsets = [0, 128], sizes = [8, 128], strides = [1, 1]} : vector<8x512xf32> to vector<8x128xf32>
    %183 = arith.negf %182 : vector<8x128xf32>
    %184 = math.exp %183 : vector<8x128xf32>
    %cst_46 = arith.constant 1.000000e+00 : f32
    %185 = vector.broadcast %cst_46 : f32 to vector<8x128xf32>
    %186 = arith.addf %185, %184 : vector<8x128xf32>
    %187 = arith.divf %185, %186 : vector<8x128xf32>
    %188 = vector.extract_strided_slice %175 {offsets = [0, 256], sizes = [8, 128], strides = [1, 1]} : vector<8x512xf32> to vector<8x128xf32>
    %189 = math.tanh %188 : vector<8x128xf32>
    %190 = vector.extract_strided_slice %175 {offsets = [0, 384], sizes = [8, 128], strides = [1, 1]} : vector<8x512xf32> to vector<8x128xf32>
    %191 = arith.negf %190 : vector<8x128xf32>
    %192 = math.exp %191 : vector<8x128xf32>
    %cst_47 = arith.constant 1.000000e+00 : f32
    %193 = vector.broadcast %cst_47 : f32 to vector<8x128xf32>
    %194 = arith.addf %193, %192 : vector<8x128xf32>
    %195 = arith.divf %193, %194 : vector<8x128xf32>
    %196 = arith.mulf %187, %129 : vector<8x128xf32>
    %197 = arith.mulf %181, %189 : vector<8x128xf32>
    %198 = arith.addf %196, %197 : vector<8x128xf32>
    %199 = math.tanh %198 : vector<8x128xf32>
    %200 = arith.mulf %195, %199 : vector<8x128xf32>
    %201 = vector.broadcast %169 : i32 to vector<8x1xi32>
    %202 = arith.cmpi sgt, %3, %201 : vector<8x1xi32>
    %203 = vector.shape_cast %202 : vector<8x1xi1> to vector<8x1xi1>
    %204 = vector.broadcast %203 : vector<8x1xi1> to vector<8x128xi1>
    %205 = arith.select %204, %200, %126 : vector<8x128xi1>, vector<8x128xf32>
    %206 = vector.shape_cast %202 : vector<8x1xi1> to vector<8x1xi1>
    %207 = vector.broadcast %206 : vector<8x1xi1> to vector<8x128xi1>
    %208 = arith.select %207, %198, %129 : vector<8x128xi1>, vector<8x128xf32>
    %c7_i32_48 = arith.constant 7 : i32
    %209 = arith.subi %c7_i32_48, %c2_i32 : i32
    %210 = arith.index_cast %209 : i32 to index
    %c0_49 = arith.constant 0 : index
    %c0_50 = arith.constant 0 : index
    %211 = vector.load %arg3[%210, %c0_49, %c0_50] : memref<8x8x512xf32, #tpu.memory_space<vmem>>, vector<1x8x512xf32>
    %212 = vector.shape_cast %211 : vector<1x8x512xf32> to vector<8x512xf32>
    %cst_51 = arith.constant dense<0.000000e+00> : vector<8x512xf32>
    %213 = tpu.matmul %165, %5, %cst_51 {dimension_numbers = #tpu.dot_dimension_numbers<[1], [0], [0], [1], [0, 0, 1, 1], [], []>} : vector<8x128xf32>, vector<128x512xf32>, vector<8x512xf32> -> vector<8x512xf32>
    %214 = arith.addf %212, %213 : vector<8x512xf32>
    %215 = vector.extract_strided_slice %214 {offsets = [0, 0], sizes = [8, 128], strides = [1, 1]} : vector<8x512xf32> to vector<8x128xf32>
    %216 = arith.negf %215 : vector<8x128xf32>
    %217 = math.exp %216 : vector<8x128xf32>
    %cst_52 = arith.constant 1.000000e+00 : f32
    %218 = vector.broadcast %cst_52 : f32 to vector<8x128xf32>
    %219 = arith.addf %218, %217 : vector<8x128xf32>
    %220 = arith.divf %218, %219 : vector<8x128xf32>
    %221 = vector.extract_strided_slice %214 {offsets = [0, 128], sizes = [8, 128], strides = [1, 1]} : vector<8x512xf32> to vector<8x128xf32>
    %222 = arith.negf %221 : vector<8x128xf32>
    %223 = math.exp %222 : vector<8x128xf32>
    %cst_53 = arith.constant 1.000000e+00 : f32
    %224 = vector.broadcast %cst_53 : f32 to vector<8x128xf32>
    %225 = arith.addf %224, %223 : vector<8x128xf32>
    %226 = arith.divf %224, %225 : vector<8x128xf32>
    %227 = vector.extract_strided_slice %214 {offsets = [0, 256], sizes = [8, 128], strides = [1, 1]} : vector<8x512xf32> to vector<8x128xf32>
    %228 = math.tanh %227 : vector<8x128xf32>
    %229 = vector.extract_strided_slice %214 {offsets = [0, 384], sizes = [8, 128], strides = [1, 1]} : vector<8x512xf32> to vector<8x128xf32>
    %230 = arith.negf %229 : vector<8x128xf32>
    %231 = math.exp %230 : vector<8x128xf32>
    %cst_54 = arith.constant 1.000000e+00 : f32
    %232 = vector.broadcast %cst_54 : f32 to vector<8x128xf32>
    %233 = arith.addf %232, %231 : vector<8x128xf32>
    %234 = arith.divf %232, %233 : vector<8x128xf32>
    %235 = arith.mulf %226, %168 : vector<8x128xf32>
    %236 = arith.mulf %220, %228 : vector<8x128xf32>
    %237 = arith.addf %235, %236 : vector<8x128xf32>
    %238 = math.tanh %237 : vector<8x128xf32>
    %239 = arith.mulf %234, %238 : vector<8x128xf32>
    %240 = vector.broadcast %170 : i32 to vector<8x1xi32>
    %241 = arith.cmpi sgt, %3, %240 : vector<8x1xi32>
    %242 = vector.shape_cast %241 : vector<8x1xi1> to vector<8x1xi1>
    %243 = vector.broadcast %242 : vector<8x1xi1> to vector<8x128xi1>
    %244 = arith.select %243, %239, %165 : vector<8x128xi1>, vector<8x128xf32>
    %245 = vector.shape_cast %241 : vector<8x1xi1> to vector<8x1xi1>
    %246 = vector.broadcast %245 : vector<8x1xi1> to vector<8x128xi1>
    %247 = arith.select %246, %237, %168 : vector<8x128xi1>, vector<8x128xf32>
    %c3_i32 = arith.constant 3 : i32
    %248 = arith.addi %6, %c3_i32 : i32
    %c7_i32_55 = arith.constant 7 : i32
    %249 = arith.subi %c7_i32_55, %248 : i32
    %250 = arith.index_cast %c3_i32 : i32 to index
    %c0_56 = arith.constant 0 : index
    %c0_57 = arith.constant 0 : index
    %251 = vector.load %arg2[%250, %c0_56, %c0_57] : memref<8x8x512xf32, #tpu.memory_space<vmem>>, vector<1x8x512xf32>
    %252 = vector.shape_cast %251 : vector<1x8x512xf32> to vector<8x512xf32>
    %cst_58 = arith.constant dense<0.000000e+00> : vector<8x512xf32>
    %253 = tpu.matmul %205, %4, %cst_58 {dimension_numbers = #tpu.dot_dimension_numbers<[1], [0], [0], [1], [0, 0, 1, 1], [], []>} : vector<8x128xf32>, vector<128x512xf32>, vector<8x512xf32> -> vector<8x512xf32>
    %254 = arith.addf %252, %253 : vector<8x512xf32>
    %255 = vector.extract_strided_slice %254 {offsets = [0, 0], sizes = [8, 128], strides = [1, 1]} : vector<8x512xf32> to vector<8x128xf32>
    %256 = arith.negf %255 : vector<8x128xf32>
    %257 = math.exp %256 : vector<8x128xf32>
    %cst_59 = arith.constant 1.000000e+00 : f32
    %258 = vector.broadcast %cst_59 : f32 to vector<8x128xf32>
    %259 = arith.addf %258, %257 : vector<8x128xf32>
    %260 = arith.divf %258, %259 : vector<8x128xf32>
    %261 = vector.extract_strided_slice %254 {offsets = [0, 128], sizes = [8, 128], strides = [1, 1]} : vector<8x512xf32> to vector<8x128xf32>
    %262 = arith.negf %261 : vector<8x128xf32>
    %263 = math.exp %262 : vector<8x128xf32>
    %cst_60 = arith.constant 1.000000e+00 : f32
    %264 = vector.broadcast %cst_60 : f32 to vector<8x128xf32>
    %265 = arith.addf %264, %263 : vector<8x128xf32>
    %266 = arith.divf %264, %265 : vector<8x128xf32>
    %267 = vector.extract_strided_slice %254 {offsets = [0, 256], sizes = [8, 128], strides = [1, 1]} : vector<8x512xf32> to vector<8x128xf32>
    %268 = math.tanh %267 : vector<8x128xf32>
    %269 = vector.extract_strided_slice %254 {offsets = [0, 384], sizes = [8, 128], strides = [1, 1]} : vector<8x512xf32> to vector<8x128xf32>
    %270 = arith.negf %269 : vector<8x128xf32>
    %271 = math.exp %270 : vector<8x128xf32>
    %cst_61 = arith.constant 1.000000e+00 : f32
    %272 = vector.broadcast %cst_61 : f32 to vector<8x128xf32>
    %273 = arith.addf %272, %271 : vector<8x128xf32>
    %274 = arith.divf %272, %273 : vector<8x128xf32>
    %275 = arith.mulf %266, %208 : vector<8x128xf32>
    %276 = arith.mulf %260, %268 : vector<8x128xf32>
    %277 = arith.addf %275, %276 : vector<8x128xf32>
    %278 = math.tanh %277 : vector<8x128xf32>
    %279 = arith.mulf %274, %278 : vector<8x128xf32>
    %280 = vector.broadcast %248 : i32 to vector<8x1xi32>
    %281 = arith.cmpi sgt, %3, %280 : vector<8x1xi32>
    %282 = vector.shape_cast %281 : vector<8x1xi1> to vector<8x1xi1>
    %283 = vector.broadcast %282 : vector<8x1xi1> to vector<8x128xi1>
    %284 = arith.select %283, %279, %205 : vector<8x128xi1>, vector<8x128xf32>
    %285 = vector.shape_cast %281 : vector<8x1xi1> to vector<8x1xi1>
    %286 = vector.broadcast %285 : vector<8x1xi1> to vector<8x128xi1>
    %287 = arith.select %286, %277, %208 : vector<8x128xi1>, vector<8x128xf32>
    %c7_i32_62 = arith.constant 7 : i32
    %288 = arith.subi %c7_i32_62, %c3_i32 : i32
    %289 = arith.index_cast %288 : i32 to index
    %c0_63 = arith.constant 0 : index
    %c0_64 = arith.constant 0 : index
    %290 = vector.load %arg3[%289, %c0_63, %c0_64] : memref<8x8x512xf32, #tpu.memory_space<vmem>>, vector<1x8x512xf32>
    %291 = vector.shape_cast %290 : vector<1x8x512xf32> to vector<8x512xf32>
    %cst_65 = arith.constant dense<0.000000e+00> : vector<8x512xf32>
    %292 = tpu.matmul %244, %5, %cst_65 {dimension_numbers = #tpu.dot_dimension_numbers<[1], [0], [0], [1], [0, 0, 1, 1], [], []>} : vector<8x128xf32>, vector<128x512xf32>, vector<8x512xf32> -> vector<8x512xf32>
    %293 = arith.addf %291, %292 : vector<8x512xf32>
    %294 = vector.extract_strided_slice %293 {offsets = [0, 0], sizes = [8, 128], strides = [1, 1]} : vector<8x512xf32> to vector<8x128xf32>
    %295 = arith.negf %294 : vector<8x128xf32>
    %296 = math.exp %295 : vector<8x128xf32>
    %cst_66 = arith.constant 1.000000e+00 : f32
    %297 = vector.broadcast %cst_66 : f32 to vector<8x128xf32>
    %298 = arith.addf %297, %296 : vector<8x128xf32>
    %299 = arith.divf %297, %298 : vector<8x128xf32>
    %300 = vector.extract_strided_slice %293 {offsets = [0, 128], sizes = [8, 128], strides = [1, 1]} : vector<8x512xf32> to vector<8x128xf32>
    %301 = arith.negf %300 : vector<8x128xf32>
    %302 = math.exp %301 : vector<8x128xf32>
    %cst_67 = arith.constant 1.000000e+00 : f32
    %303 = vector.broadcast %cst_67 : f32 to vector<8x128xf32>
    %304 = arith.addf %303, %302 : vector<8x128xf32>
    %305 = arith.divf %303, %304 : vector<8x128xf32>
    %306 = vector.extract_strided_slice %293 {offsets = [0, 256], sizes = [8, 128], strides = [1, 1]} : vector<8x512xf32> to vector<8x128xf32>
    %307 = math.tanh %306 : vector<8x128xf32>
    %308 = vector.extract_strided_slice %293 {offsets = [0, 384], sizes = [8, 128], strides = [1, 1]} : vector<8x512xf32> to vector<8x128xf32>
    %309 = arith.negf %308 : vector<8x128xf32>
    %310 = math.exp %309 : vector<8x128xf32>
    %cst_68 = arith.constant 1.000000e+00 : f32
    %311 = vector.broadcast %cst_68 : f32 to vector<8x128xf32>
    %312 = arith.addf %311, %310 : vector<8x128xf32>
    %313 = arith.divf %311, %312 : vector<8x128xf32>
    %314 = arith.mulf %305, %247 : vector<8x128xf32>
    %315 = arith.mulf %299, %307 : vector<8x128xf32>
    %316 = arith.addf %314, %315 : vector<8x128xf32>
    %317 = math.tanh %316 : vector<8x128xf32>
    %318 = arith.mulf %313, %317 : vector<8x128xf32>
    %319 = vector.broadcast %249 : i32 to vector<8x1xi32>
    %320 = arith.cmpi sgt, %3, %319 : vector<8x1xi32>
    %321 = vector.shape_cast %320 : vector<8x1xi1> to vector<8x1xi1>
    %322 = vector.broadcast %321 : vector<8x1xi1> to vector<8x128xi1>
    %323 = arith.select %322, %318, %244 : vector<8x128xi1>, vector<8x128xf32>
    %324 = vector.shape_cast %320 : vector<8x1xi1> to vector<8x1xi1>
    %325 = vector.broadcast %324 : vector<8x1xi1> to vector<8x128xi1>
    %326 = arith.select %325, %316, %247 : vector<8x128xi1>, vector<8x128xf32>
    %c4_i32 = arith.constant 4 : i32
    %327 = arith.addi %6, %c4_i32 : i32
    %c7_i32_69 = arith.constant 7 : i32
    %328 = arith.subi %c7_i32_69, %327 : i32
    %329 = arith.index_cast %c4_i32 : i32 to index
    %c0_70 = arith.constant 0 : index
    %c0_71 = arith.constant 0 : index
    %330 = vector.load %arg2[%329, %c0_70, %c0_71] : memref<8x8x512xf32, #tpu.memory_space<vmem>>, vector<1x8x512xf32>
    %331 = vector.shape_cast %330 : vector<1x8x512xf32> to vector<8x512xf32>
    %cst_72 = arith.constant dense<0.000000e+00> : vector<8x512xf32>
    %332 = tpu.matmul %284, %4, %cst_72 {dimension_numbers = #tpu.dot_dimension_numbers<[1], [0], [0], [1], [0, 0, 1, 1], [], []>} : vector<8x128xf32>, vector<128x512xf32>, vector<8x512xf32> -> vector<8x512xf32>
    %333 = arith.addf %331, %332 : vector<8x512xf32>
    %334 = vector.extract_strided_slice %333 {offsets = [0, 0], sizes = [8, 128], strides = [1, 1]} : vector<8x512xf32> to vector<8x128xf32>
    %335 = arith.negf %334 : vector<8x128xf32>
    %336 = math.exp %335 : vector<8x128xf32>
    %cst_73 = arith.constant 1.000000e+00 : f32
    %337 = vector.broadcast %cst_73 : f32 to vector<8x128xf32>
    %338 = arith.addf %337, %336 : vector<8x128xf32>
    %339 = arith.divf %337, %338 : vector<8x128xf32>
    %340 = vector.extract_strided_slice %333 {offsets = [0, 128], sizes = [8, 128], strides = [1, 1]} : vector<8x512xf32> to vector<8x128xf32>
    %341 = arith.negf %340 : vector<8x128xf32>
    %342 = math.exp %341 : vector<8x128xf32>
    %cst_74 = arith.constant 1.000000e+00 : f32
    %343 = vector.broadcast %cst_74 : f32 to vector<8x128xf32>
    %344 = arith.addf %343, %342 : vector<8x128xf32>
    %345 = arith.divf %343, %344 : vector<8x128xf32>
    %346 = vector.extract_strided_slice %333 {offsets = [0, 256], sizes = [8, 128], strides = [1, 1]} : vector<8x512xf32> to vector<8x128xf32>
    %347 = math.tanh %346 : vector<8x128xf32>
    %348 = vector.extract_strided_slice %333 {offsets = [0, 384], sizes = [8, 128], strides = [1, 1]} : vector<8x512xf32> to vector<8x128xf32>
    %349 = arith.negf %348 : vector<8x128xf32>
    %350 = math.exp %349 : vector<8x128xf32>
    %cst_75 = arith.constant 1.000000e+00 : f32
    %351 = vector.broadcast %cst_75 : f32 to vector<8x128xf32>
    %352 = arith.addf %351, %350 : vector<8x128xf32>
    %353 = arith.divf %351, %352 : vector<8x128xf32>
    %354 = arith.mulf %345, %287 : vector<8x128xf32>
    %355 = arith.mulf %339, %347 : vector<8x128xf32>
    %356 = arith.addf %354, %355 : vector<8x128xf32>
    %357 = math.tanh %356 : vector<8x128xf32>
    %358 = arith.mulf %353, %357 : vector<8x128xf32>
    %359 = vector.broadcast %327 : i32 to vector<8x1xi32>
    %360 = arith.cmpi sgt, %3, %359 : vector<8x1xi32>
    %361 = vector.shape_cast %360 : vector<8x1xi1> to vector<8x1xi1>
    %362 = vector.broadcast %361 : vector<8x1xi1> to vector<8x128xi1>
    %363 = arith.select %362, %358, %284 : vector<8x128xi1>, vector<8x128xf32>
    %364 = vector.shape_cast %360 : vector<8x1xi1> to vector<8x1xi1>
    %365 = vector.broadcast %364 : vector<8x1xi1> to vector<8x128xi1>
    %366 = arith.select %365, %356, %287 : vector<8x128xi1>, vector<8x128xf32>
    %c7_i32_76 = arith.constant 7 : i32
    %367 = arith.subi %c7_i32_76, %c4_i32 : i32
    %368 = arith.index_cast %367 : i32 to index
    %c0_77 = arith.constant 0 : index
    %c0_78 = arith.constant 0 : index
    %369 = vector.load %arg3[%368, %c0_77, %c0_78] : memref<8x8x512xf32, #tpu.memory_space<vmem>>, vector<1x8x512xf32>
    %370 = vector.shape_cast %369 : vector<1x8x512xf32> to vector<8x512xf32>
    %cst_79 = arith.constant dense<0.000000e+00> : vector<8x512xf32>
    %371 = tpu.matmul %323, %5, %cst_79 {dimension_numbers = #tpu.dot_dimension_numbers<[1], [0], [0], [1], [0, 0, 1, 1], [], []>} : vector<8x128xf32>, vector<128x512xf32>, vector<8x512xf32> -> vector<8x512xf32>
    %372 = arith.addf %370, %371 : vector<8x512xf32>
    %373 = vector.extract_strided_slice %372 {offsets = [0, 0], sizes = [8, 128], strides = [1, 1]} : vector<8x512xf32> to vector<8x128xf32>
    %374 = arith.negf %373 : vector<8x128xf32>
    %375 = math.exp %374 : vector<8x128xf32>
    %cst_80 = arith.constant 1.000000e+00 : f32
    %376 = vector.broadcast %cst_80 : f32 to vector<8x128xf32>
    %377 = arith.addf %376, %375 : vector<8x128xf32>
    %378 = arith.divf %376, %377 : vector<8x128xf32>
    %379 = vector.extract_strided_slice %372 {offsets = [0, 128], sizes = [8, 128], strides = [1, 1]} : vector<8x512xf32> to vector<8x128xf32>
    %380 = arith.negf %379 : vector<8x128xf32>
    %381 = math.exp %380 : vector<8x128xf32>
    %cst_81 = arith.constant 1.000000e+00 : f32
    %382 = vector.broadcast %cst_81 : f32 to vector<8x128xf32>
    %383 = arith.addf %382, %381 : vector<8x128xf32>
    %384 = arith.divf %382, %383 : vector<8x128xf32>
    %385 = vector.extract_strided_slice %372 {offsets = [0, 256], sizes = [8, 128], strides = [1, 1]} : vector<8x512xf32> to vector<8x128xf32>
    %386 = math.tanh %385 : vector<8x128xf32>
    %387 = vector.extract_strided_slice %372 {offsets = [0, 384], sizes = [8, 128], strides = [1, 1]} : vector<8x512xf32> to vector<8x128xf32>
    %388 = arith.negf %387 : vector<8x128xf32>
    %389 = math.exp %388 : vector<8x128xf32>
    %cst_82 = arith.constant 1.000000e+00 : f32
    %390 = vector.broadcast %cst_82 : f32 to vector<8x128xf32>
    %391 = arith.addf %390, %389 : vector<8x128xf32>
    %392 = arith.divf %390, %391 : vector<8x128xf32>
    %393 = arith.mulf %384, %326 : vector<8x128xf32>
    %394 = arith.mulf %378, %386 : vector<8x128xf32>
    %395 = arith.addf %393, %394 : vector<8x128xf32>
    %396 = math.tanh %395 : vector<8x128xf32>
    %397 = arith.mulf %392, %396 : vector<8x128xf32>
    %398 = vector.broadcast %328 : i32 to vector<8x1xi32>
    %399 = arith.cmpi sgt, %3, %398 : vector<8x1xi32>
    %400 = vector.shape_cast %399 : vector<8x1xi1> to vector<8x1xi1>
    %401 = vector.broadcast %400 : vector<8x1xi1> to vector<8x128xi1>
    %402 = arith.select %401, %397, %323 : vector<8x128xi1>, vector<8x128xf32>
    %403 = vector.shape_cast %399 : vector<8x1xi1> to vector<8x1xi1>
    %404 = vector.broadcast %403 : vector<8x1xi1> to vector<8x128xi1>
    %405 = arith.select %404, %395, %326 : vector<8x128xi1>, vector<8x128xf32>
    %c5_i32 = arith.constant 5 : i32
    %406 = arith.addi %6, %c5_i32 : i32
    %c7_i32_83 = arith.constant 7 : i32
    %407 = arith.subi %c7_i32_83, %406 : i32
    %408 = arith.index_cast %c5_i32 : i32 to index
    %c0_84 = arith.constant 0 : index
    %c0_85 = arith.constant 0 : index
    %409 = vector.load %arg2[%408, %c0_84, %c0_85] : memref<8x8x512xf32, #tpu.memory_space<vmem>>, vector<1x8x512xf32>
    %410 = vector.shape_cast %409 : vector<1x8x512xf32> to vector<8x512xf32>
    %cst_86 = arith.constant dense<0.000000e+00> : vector<8x512xf32>
    %411 = tpu.matmul %363, %4, %cst_86 {dimension_numbers = #tpu.dot_dimension_numbers<[1], [0], [0], [1], [0, 0, 1, 1], [], []>} : vector<8x128xf32>, vector<128x512xf32>, vector<8x512xf32> -> vector<8x512xf32>
    %412 = arith.addf %410, %411 : vector<8x512xf32>
    %413 = vector.extract_strided_slice %412 {offsets = [0, 0], sizes = [8, 128], strides = [1, 1]} : vector<8x512xf32> to vector<8x128xf32>
    %414 = arith.negf %413 : vector<8x128xf32>
    %415 = math.exp %414 : vector<8x128xf32>
    %cst_87 = arith.constant 1.000000e+00 : f32
    %416 = vector.broadcast %cst_87 : f32 to vector<8x128xf32>
    %417 = arith.addf %416, %415 : vector<8x128xf32>
    %418 = arith.divf %416, %417 : vector<8x128xf32>
    %419 = vector.extract_strided_slice %412 {offsets = [0, 128], sizes = [8, 128], strides = [1, 1]} : vector<8x512xf32> to vector<8x128xf32>
    %420 = arith.negf %419 : vector<8x128xf32>
    %421 = math.exp %420 : vector<8x128xf32>
    %cst_88 = arith.constant 1.000000e+00 : f32
    %422 = vector.broadcast %cst_88 : f32 to vector<8x128xf32>
    %423 = arith.addf %422, %421 : vector<8x128xf32>
    %424 = arith.divf %422, %423 : vector<8x128xf32>
    %425 = vector.extract_strided_slice %412 {offsets = [0, 256], sizes = [8, 128], strides = [1, 1]} : vector<8x512xf32> to vector<8x128xf32>
    %426 = math.tanh %425 : vector<8x128xf32>
    %427 = vector.extract_strided_slice %412 {offsets = [0, 384], sizes = [8, 128], strides = [1, 1]} : vector<8x512xf32> to vector<8x128xf32>
    %428 = arith.negf %427 : vector<8x128xf32>
    %429 = math.exp %428 : vector<8x128xf32>
    %cst_89 = arith.constant 1.000000e+00 : f32
    %430 = vector.broadcast %cst_89 : f32 to vector<8x128xf32>
    %431 = arith.addf %430, %429 : vector<8x128xf32>
    %432 = arith.divf %430, %431 : vector<8x128xf32>
    %433 = arith.mulf %424, %366 : vector<8x128xf32>
    %434 = arith.mulf %418, %426 : vector<8x128xf32>
    %435 = arith.addf %433, %434 : vector<8x128xf32>
    %436 = math.tanh %435 : vector<8x128xf32>
    %437 = arith.mulf %432, %436 : vector<8x128xf32>
    %438 = vector.broadcast %406 : i32 to vector<8x1xi32>
    %439 = arith.cmpi sgt, %3, %438 : vector<8x1xi32>
    %440 = vector.shape_cast %439 : vector<8x1xi1> to vector<8x1xi1>
    %441 = vector.broadcast %440 : vector<8x1xi1> to vector<8x128xi1>
    %442 = arith.select %441, %437, %363 : vector<8x128xi1>, vector<8x128xf32>
    %443 = vector.shape_cast %439 : vector<8x1xi1> to vector<8x1xi1>
    %444 = vector.broadcast %443 : vector<8x1xi1> to vector<8x128xi1>
    %445 = arith.select %444, %435, %366 : vector<8x128xi1>, vector<8x128xf32>
    %c7_i32_90 = arith.constant 7 : i32
    %446 = arith.subi %c7_i32_90, %c5_i32 : i32
    %447 = arith.index_cast %446 : i32 to index
    %c0_91 = arith.constant 0 : index
    %c0_92 = arith.constant 0 : index
    %448 = vector.load %arg3[%447, %c0_91, %c0_92] : memref<8x8x512xf32, #tpu.memory_space<vmem>>, vector<1x8x512xf32>
    %449 = vector.shape_cast %448 : vector<1x8x512xf32> to vector<8x512xf32>
    %cst_93 = arith.constant dense<0.000000e+00> : vector<8x512xf32>
    %450 = tpu.matmul %402, %5, %cst_93 {dimension_numbers = #tpu.dot_dimension_numbers<[1], [0], [0], [1], [0, 0, 1, 1], [], []>} : vector<8x128xf32>, vector<128x512xf32>, vector<8x512xf32> -> vector<8x512xf32>
    %451 = arith.addf %449, %450 : vector<8x512xf32>
    %452 = vector.extract_strided_slice %451 {offsets = [0, 0], sizes = [8, 128], strides = [1, 1]} : vector<8x512xf32> to vector<8x128xf32>
    %453 = arith.negf %452 : vector<8x128xf32>
    %454 = math.exp %453 : vector<8x128xf32>
    %cst_94 = arith.constant 1.000000e+00 : f32
    %455 = vector.broadcast %cst_94 : f32 to vector<8x128xf32>
    %456 = arith.addf %455, %454 : vector<8x128xf32>
    %457 = arith.divf %455, %456 : vector<8x128xf32>
    %458 = vector.extract_strided_slice %451 {offsets = [0, 128], sizes = [8, 128], strides = [1, 1]} : vector<8x512xf32> to vector<8x128xf32>
    %459 = arith.negf %458 : vector<8x128xf32>
    %460 = math.exp %459 : vector<8x128xf32>
    %cst_95 = arith.constant 1.000000e+00 : f32
    %461 = vector.broadcast %cst_95 : f32 to vector<8x128xf32>
    %462 = arith.addf %461, %460 : vector<8x128xf32>
    %463 = arith.divf %461, %462 : vector<8x128xf32>
    %464 = vector.extract_strided_slice %451 {offsets = [0, 256], sizes = [8, 128], strides = [1, 1]} : vector<8x512xf32> to vector<8x128xf32>
    %465 = math.tanh %464 : vector<8x128xf32>
    %466 = vector.extract_strided_slice %451 {offsets = [0, 384], sizes = [8, 128], strides = [1, 1]} : vector<8x512xf32> to vector<8x128xf32>
    %467 = arith.negf %466 : vector<8x128xf32>
    %468 = math.exp %467 : vector<8x128xf32>
    %cst_96 = arith.constant 1.000000e+00 : f32
    %469 = vector.broadcast %cst_96 : f32 to vector<8x128xf32>
    %470 = arith.addf %469, %468 : vector<8x128xf32>
    %471 = arith.divf %469, %470 : vector<8x128xf32>
    %472 = arith.mulf %463, %405 : vector<8x128xf32>
    %473 = arith.mulf %457, %465 : vector<8x128xf32>
    %474 = arith.addf %472, %473 : vector<8x128xf32>
    %475 = math.tanh %474 : vector<8x128xf32>
    %476 = arith.mulf %471, %475 : vector<8x128xf32>
    %477 = vector.broadcast %407 : i32 to vector<8x1xi32>
    %478 = arith.cmpi sgt, %3, %477 : vector<8x1xi32>
    %479 = vector.shape_cast %478 : vector<8x1xi1> to vector<8x1xi1>
    %480 = vector.broadcast %479 : vector<8x1xi1> to vector<8x128xi1>
    %481 = arith.select %480, %476, %402 : vector<8x128xi1>, vector<8x128xf32>
    %482 = vector.shape_cast %478 : vector<8x1xi1> to vector<8x1xi1>
    %483 = vector.broadcast %482 : vector<8x1xi1> to vector<8x128xi1>
    %484 = arith.select %483, %474, %405 : vector<8x128xi1>, vector<8x128xf32>
    %c6_i32 = arith.constant 6 : i32
    %485 = arith.addi %6, %c6_i32 : i32
    %c7_i32_97 = arith.constant 7 : i32
    %486 = arith.subi %c7_i32_97, %485 : i32
    %487 = arith.index_cast %c6_i32 : i32 to index
    %c0_98 = arith.constant 0 : index
    %c0_99 = arith.constant 0 : index
    %488 = vector.load %arg2[%487, %c0_98, %c0_99] : memref<8x8x512xf32, #tpu.memory_space<vmem>>, vector<1x8x512xf32>
    %489 = vector.shape_cast %488 : vector<1x8x512xf32> to vector<8x512xf32>
    %cst_100 = arith.constant dense<0.000000e+00> : vector<8x512xf32>
    %490 = tpu.matmul %442, %4, %cst_100 {dimension_numbers = #tpu.dot_dimension_numbers<[1], [0], [0], [1], [0, 0, 1, 1], [], []>} : vector<8x128xf32>, vector<128x512xf32>, vector<8x512xf32> -> vector<8x512xf32>
    %491 = arith.addf %489, %490 : vector<8x512xf32>
    %492 = vector.extract_strided_slice %491 {offsets = [0, 0], sizes = [8, 128], strides = [1, 1]} : vector<8x512xf32> to vector<8x128xf32>
    %493 = arith.negf %492 : vector<8x128xf32>
    %494 = math.exp %493 : vector<8x128xf32>
    %cst_101 = arith.constant 1.000000e+00 : f32
    %495 = vector.broadcast %cst_101 : f32 to vector<8x128xf32>
    %496 = arith.addf %495, %494 : vector<8x128xf32>
    %497 = arith.divf %495, %496 : vector<8x128xf32>
    %498 = vector.extract_strided_slice %491 {offsets = [0, 128], sizes = [8, 128], strides = [1, 1]} : vector<8x512xf32> to vector<8x128xf32>
    %499 = arith.negf %498 : vector<8x128xf32>
    %500 = math.exp %499 : vector<8x128xf32>
    %cst_102 = arith.constant 1.000000e+00 : f32
    %501 = vector.broadcast %cst_102 : f32 to vector<8x128xf32>
    %502 = arith.addf %501, %500 : vector<8x128xf32>
    %503 = arith.divf %501, %502 : vector<8x128xf32>
    %504 = vector.extract_strided_slice %491 {offsets = [0, 256], sizes = [8, 128], strides = [1, 1]} : vector<8x512xf32> to vector<8x128xf32>
    %505 = math.tanh %504 : vector<8x128xf32>
    %506 = vector.extract_strided_slice %491 {offsets = [0, 384], sizes = [8, 128], strides = [1, 1]} : vector<8x512xf32> to vector<8x128xf32>
    %507 = arith.negf %506 : vector<8x128xf32>
    %508 = math.exp %507 : vector<8x128xf32>
    %cst_103 = arith.constant 1.000000e+00 : f32
    %509 = vector.broadcast %cst_103 : f32 to vector<8x128xf32>
    %510 = arith.addf %509, %508 : vector<8x128xf32>
    %511 = arith.divf %509, %510 : vector<8x128xf32>
    %512 = arith.mulf %503, %445 : vector<8x128xf32>
    %513 = arith.mulf %497, %505 : vector<8x128xf32>
    %514 = arith.addf %512, %513 : vector<8x128xf32>
    %515 = math.tanh %514 : vector<8x128xf32>
    %516 = arith.mulf %511, %515 : vector<8x128xf32>
    %517 = vector.broadcast %485 : i32 to vector<8x1xi32>
    %518 = arith.cmpi sgt, %3, %517 : vector<8x1xi32>
    %519 = vector.shape_cast %518 : vector<8x1xi1> to vector<8x1xi1>
    %520 = vector.broadcast %519 : vector<8x1xi1> to vector<8x128xi1>
    %521 = arith.select %520, %516, %442 : vector<8x128xi1>, vector<8x128xf32>
    %522 = vector.shape_cast %518 : vector<8x1xi1> to vector<8x1xi1>
    %523 = vector.broadcast %522 : vector<8x1xi1> to vector<8x128xi1>
    %524 = arith.select %523, %514, %445 : vector<8x128xi1>, vector<8x128xf32>
    %c7_i32_104 = arith.constant 7 : i32
    %525 = arith.subi %c7_i32_104, %c6_i32 : i32
    %526 = arith.index_cast %525 : i32 to index
    %c0_105 = arith.constant 0 : index
    %c0_106 = arith.constant 0 : index
    %527 = vector.load %arg3[%526, %c0_105, %c0_106] : memref<8x8x512xf32, #tpu.memory_space<vmem>>, vector<1x8x512xf32>
    %528 = vector.shape_cast %527 : vector<1x8x512xf32> to vector<8x512xf32>
    %cst_107 = arith.constant dense<0.000000e+00> : vector<8x512xf32>
    %529 = tpu.matmul %481, %5, %cst_107 {dimension_numbers = #tpu.dot_dimension_numbers<[1], [0], [0], [1], [0, 0, 1, 1], [], []>} : vector<8x128xf32>, vector<128x512xf32>, vector<8x512xf32> -> vector<8x512xf32>
    %530 = arith.addf %528, %529 : vector<8x512xf32>
    %531 = vector.extract_strided_slice %530 {offsets = [0, 0], sizes = [8, 128], strides = [1, 1]} : vector<8x512xf32> to vector<8x128xf32>
    %532 = arith.negf %531 : vector<8x128xf32>
    %533 = math.exp %532 : vector<8x128xf32>
    %cst_108 = arith.constant 1.000000e+00 : f32
    %534 = vector.broadcast %cst_108 : f32 to vector<8x128xf32>
    %535 = arith.addf %534, %533 : vector<8x128xf32>
    %536 = arith.divf %534, %535 : vector<8x128xf32>
    %537 = vector.extract_strided_slice %530 {offsets = [0, 128], sizes = [8, 128], strides = [1, 1]} : vector<8x512xf32> to vector<8x128xf32>
    %538 = arith.negf %537 : vector<8x128xf32>
    %539 = math.exp %538 : vector<8x128xf32>
    %cst_109 = arith.constant 1.000000e+00 : f32
    %540 = vector.broadcast %cst_109 : f32 to vector<8x128xf32>
    %541 = arith.addf %540, %539 : vector<8x128xf32>
    %542 = arith.divf %540, %541 : vector<8x128xf32>
    %543 = vector.extract_strided_slice %530 {offsets = [0, 256], sizes = [8, 128], strides = [1, 1]} : vector<8x512xf32> to vector<8x128xf32>
    %544 = math.tanh %543 : vector<8x128xf32>
    %545 = vector.extract_strided_slice %530 {offsets = [0, 384], sizes = [8, 128], strides = [1, 1]} : vector<8x512xf32> to vector<8x128xf32>
    %546 = arith.negf %545 : vector<8x128xf32>
    %547 = math.exp %546 : vector<8x128xf32>
    %cst_110 = arith.constant 1.000000e+00 : f32
    %548 = vector.broadcast %cst_110 : f32 to vector<8x128xf32>
    %549 = arith.addf %548, %547 : vector<8x128xf32>
    %550 = arith.divf %548, %549 : vector<8x128xf32>
    %551 = arith.mulf %542, %484 : vector<8x128xf32>
    %552 = arith.mulf %536, %544 : vector<8x128xf32>
    %553 = arith.addf %551, %552 : vector<8x128xf32>
    %554 = math.tanh %553 : vector<8x128xf32>
    %555 = arith.mulf %550, %554 : vector<8x128xf32>
    %556 = vector.broadcast %486 : i32 to vector<8x1xi32>
    %557 = arith.cmpi sgt, %3, %556 : vector<8x1xi32>
    %558 = vector.shape_cast %557 : vector<8x1xi1> to vector<8x1xi1>
    %559 = vector.broadcast %558 : vector<8x1xi1> to vector<8x128xi1>
    %560 = arith.select %559, %555, %481 : vector<8x128xi1>, vector<8x128xf32>
    %561 = vector.shape_cast %557 : vector<8x1xi1> to vector<8x1xi1>
    %562 = vector.broadcast %561 : vector<8x1xi1> to vector<8x128xi1>
    %563 = arith.select %562, %553, %484 : vector<8x128xi1>, vector<8x128xf32>
    %c7_i32_111 = arith.constant 7 : i32
    %564 = arith.addi %6, %c7_i32_111 : i32
    %c7_i32_112 = arith.constant 7 : i32
    %565 = arith.subi %c7_i32_112, %564 : i32
    %566 = arith.index_cast %c7_i32_111 : i32 to index
    %c0_113 = arith.constant 0 : index
    %c0_114 = arith.constant 0 : index
    %567 = vector.load %arg2[%566, %c0_113, %c0_114] : memref<8x8x512xf32, #tpu.memory_space<vmem>>, vector<1x8x512xf32>
    %568 = vector.shape_cast %567 : vector<1x8x512xf32> to vector<8x512xf32>
    %cst_115 = arith.constant dense<0.000000e+00> : vector<8x512xf32>
    %569 = tpu.matmul %521, %4, %cst_115 {dimension_numbers = #tpu.dot_dimension_numbers<[1], [0], [0], [1], [0, 0, 1, 1], [], []>} : vector<8x128xf32>, vector<128x512xf32>, vector<8x512xf32> -> vector<8x512xf32>
    %570 = arith.addf %568, %569 : vector<8x512xf32>
    %571 = vector.extract_strided_slice %570 {offsets = [0, 0], sizes = [8, 128], strides = [1, 1]} : vector<8x512xf32> to vector<8x128xf32>
    %572 = arith.negf %571 : vector<8x128xf32>
    %573 = math.exp %572 : vector<8x128xf32>
    %cst_116 = arith.constant 1.000000e+00 : f32
    %574 = vector.broadcast %cst_116 : f32 to vector<8x128xf32>
    %575 = arith.addf %574, %573 : vector<8x128xf32>
    %576 = arith.divf %574, %575 : vector<8x128xf32>
    %577 = vector.extract_strided_slice %570 {offsets = [0, 128], sizes = [8, 128], strides = [1, 1]} : vector<8x512xf32> to vector<8x128xf32>
    %578 = arith.negf %577 : vector<8x128xf32>
    %579 = math.exp %578 : vector<8x128xf32>
    %cst_117 = arith.constant 1.000000e+00 : f32
    %580 = vector.broadcast %cst_117 : f32 to vector<8x128xf32>
    %581 = arith.addf %580, %579 : vector<8x128xf32>
    %582 = arith.divf %580, %581 : vector<8x128xf32>
    %583 = vector.extract_strided_slice %570 {offsets = [0, 256], sizes = [8, 128], strides = [1, 1]} : vector<8x512xf32> to vector<8x128xf32>
    %584 = math.tanh %583 : vector<8x128xf32>
    %585 = vector.extract_strided_slice %570 {offsets = [0, 384], sizes = [8, 128], strides = [1, 1]} : vector<8x512xf32> to vector<8x128xf32>
    %586 = arith.negf %585 : vector<8x128xf32>
    %587 = math.exp %586 : vector<8x128xf32>
    %cst_118 = arith.constant 1.000000e+00 : f32
    %588 = vector.broadcast %cst_118 : f32 to vector<8x128xf32>
    %589 = arith.addf %588, %587 : vector<8x128xf32>
    %590 = arith.divf %588, %589 : vector<8x128xf32>
    %591 = arith.mulf %582, %524 : vector<8x128xf32>
    %592 = arith.mulf %576, %584 : vector<8x128xf32>
    %593 = arith.addf %591, %592 : vector<8x128xf32>
    %594 = math.tanh %593 : vector<8x128xf32>
    %595 = arith.mulf %590, %594 : vector<8x128xf32>
    %596 = vector.broadcast %564 : i32 to vector<8x1xi32>
    %597 = arith.cmpi sgt, %3, %596 : vector<8x1xi32>
    %598 = vector.shape_cast %597 : vector<8x1xi1> to vector<8x1xi1>
    %599 = vector.broadcast %598 : vector<8x1xi1> to vector<8x128xi1>
    %600 = arith.select %599, %595, %521 : vector<8x128xi1>, vector<8x128xf32>
    %601 = vector.shape_cast %597 : vector<8x1xi1> to vector<8x1xi1>
    %602 = vector.broadcast %601 : vector<8x1xi1> to vector<8x128xi1>
    %603 = arith.select %602, %593, %524 : vector<8x128xi1>, vector<8x128xf32>
    %c7_i32_119 = arith.constant 7 : i32
    %604 = arith.subi %c7_i32_119, %c7_i32_111 : i32
    %605 = arith.index_cast %604 : i32 to index
    %c0_120 = arith.constant 0 : index
    %c0_121 = arith.constant 0 : index
    %606 = vector.load %arg3[%605, %c0_120, %c0_121] : memref<8x8x512xf32, #tpu.memory_space<vmem>>, vector<1x8x512xf32>
    %607 = vector.shape_cast %606 : vector<1x8x512xf32> to vector<8x512xf32>
    %cst_122 = arith.constant dense<0.000000e+00> : vector<8x512xf32>
    %608 = tpu.matmul %560, %5, %cst_122 {dimension_numbers = #tpu.dot_dimension_numbers<[1], [0], [0], [1], [0, 0, 1, 1], [], []>} : vector<8x128xf32>, vector<128x512xf32>, vector<8x512xf32> -> vector<8x512xf32>
    %609 = arith.addf %607, %608 : vector<8x512xf32>
    %610 = vector.extract_strided_slice %609 {offsets = [0, 0], sizes = [8, 128], strides = [1, 1]} : vector<8x512xf32> to vector<8x128xf32>
    %611 = arith.negf %610 : vector<8x128xf32>
    %612 = math.exp %611 : vector<8x128xf32>
    %cst_123 = arith.constant 1.000000e+00 : f32
    %613 = vector.broadcast %cst_123 : f32 to vector<8x128xf32>
    %614 = arith.addf %613, %612 : vector<8x128xf32>
    %615 = arith.divf %613, %614 : vector<8x128xf32>
    %616 = vector.extract_strided_slice %609 {offsets = [0, 128], sizes = [8, 128], strides = [1, 1]} : vector<8x512xf32> to vector<8x128xf32>
    %617 = arith.negf %616 : vector<8x128xf32>
    %618 = math.exp %617 : vector<8x128xf32>
    %cst_124 = arith.constant 1.000000e+00 : f32
    %619 = vector.broadcast %cst_124 : f32 to vector<8x128xf32>
    %620 = arith.addf %619, %618 : vector<8x128xf32>
    %621 = arith.divf %619, %620 : vector<8x128xf32>
    %622 = vector.extract_strided_slice %609 {offsets = [0, 256], sizes = [8, 128], strides = [1, 1]} : vector<8x512xf32> to vector<8x128xf32>
    %623 = math.tanh %622 : vector<8x128xf32>
    %624 = vector.extract_strided_slice %609 {offsets = [0, 384], sizes = [8, 128], strides = [1, 1]} : vector<8x512xf32> to vector<8x128xf32>
    %625 = arith.negf %624 : vector<8x128xf32>
    %626 = math.exp %625 : vector<8x128xf32>
    %cst_125 = arith.constant 1.000000e+00 : f32
    %627 = vector.broadcast %cst_125 : f32 to vector<8x128xf32>
    %628 = arith.addf %627, %626 : vector<8x128xf32>
    %629 = arith.divf %627, %628 : vector<8x128xf32>
    %630 = arith.mulf %621, %563 : vector<8x128xf32>
    %631 = arith.mulf %615, %623 : vector<8x128xf32>
    %632 = arith.addf %630, %631 : vector<8x128xf32>
    %633 = math.tanh %632 : vector<8x128xf32>
    %634 = arith.mulf %629, %633 : vector<8x128xf32>
    %635 = vector.broadcast %565 : i32 to vector<8x1xi32>
    %636 = arith.cmpi sgt, %3, %635 : vector<8x1xi32>
    %637 = vector.shape_cast %636 : vector<8x1xi1> to vector<8x1xi1>
    %638 = vector.broadcast %637 : vector<8x1xi1> to vector<8x128xi1>
    %639 = arith.select %638, %634, %560 : vector<8x128xi1>, vector<8x128xf32>
    %640 = vector.shape_cast %636 : vector<8x1xi1> to vector<8x1xi1>
    %641 = vector.broadcast %640 : vector<8x1xi1> to vector<8x128xi1>
    %642 = arith.select %641, %632, %563 : vector<8x128xi1>, vector<8x128xf32>
    %c8_i32_126 = arith.constant 8 : i32
    %c0_127 = arith.constant 0 : index
    %c0_128 = arith.constant 0 : index
    %643 = vector.load %arg11[%c0_127, %c0_128] : memref<8x128xf32, #tpu.memory_space<vmem>>, vector<8x128xf32>
    tpu.vector_store %arg11[%c0_127, %c0_128], %600 {strides = array<i32>} : memref<8x128xf32, #tpu.memory_space<vmem>>, vector<8x128xf32>,
    %c0_129 = arith.constant 0 : index
    %c0_130 = arith.constant 0 : index
    %644 = vector.load %arg12[%c0_129, %c0_130] : memref<8x128xf32, #tpu.memory_space<vmem>>, vector<8x128xf32>
    tpu.vector_store %arg12[%c0_129, %c0_130], %603 {strides = array<i32>} : memref<8x128xf32, #tpu.memory_space<vmem>>, vector<8x128xf32>,
    %c0_131 = arith.constant 0 : index
    %c0_132 = arith.constant 0 : index
    %645 = vector.load %arg13[%c0_131, %c0_132] : memref<8x128xf32, #tpu.memory_space<vmem>>, vector<8x128xf32>
    tpu.vector_store %arg13[%c0_131, %c0_132], %639 {strides = array<i32>} : memref<8x128xf32, #tpu.memory_space<vmem>>, vector<8x128xf32>,
    %c0_133 = arith.constant 0 : index
    %c0_134 = arith.constant 0 : index
    %646 = vector.load %arg14[%c0_133, %c0_134] : memref<8x128xf32, #tpu.memory_space<vmem>>, vector<8x128xf32>
    tpu.vector_store %arg14[%c0_133, %c0_134], %642 {strides = array<i32>} : memref<8x128xf32, #tpu.memory_space<vmem>>, vector<8x128xf32>,
    %c0_i32_135 = arith.constant 0 : i32
    %647 = arith.cmpi eq, %arg1, %c0_i32_135 : i32
    %648 = arith.extui %647 : i1 to i32
    %c0_i32_136 = arith.constant 0 : i32
    %649 = arith.cmpi ne, %648, %c0_i32_136 : i32
    scf.if %649 {
      %c0_137 = arith.constant 0 : index
      %c0_138 = arith.constant 0 : index
      %650 = vector.load %arg7[%c0_137, %c0_138] : memref<128x128xf32, #tpu.memory_space<vmem>>, vector<128x128xf32>
      %cst_139 = arith.constant dense<0.000000e+00> : vector<8x128xf32>
      %651 = tpu.matmul %600, %650, %cst_139 {dimension_numbers = #tpu.dot_dimension_numbers<[1], [0], [0], [1], [0, 0, 1, 1], [], []>} : vector<8x128xf32>, vector<128x128xf32>, vector<8x128xf32> -> vector<8x128xf32>
      %c0_140 = arith.constant 0 : index
      %c0_141 = arith.constant 0 : index
      %652 = vector.load %arg8[%c0_140, %c0_141] : memref<128x128xf32, #tpu.memory_space<vmem>>, vector<128x128xf32>
      %cst_142 = arith.constant dense<0.000000e+00> : vector<8x128xf32>
      %653 = tpu.matmul %639, %652, %cst_142 {dimension_numbers = #tpu.dot_dimension_numbers<[1], [0], [0], [1], [0, 0, 1, 1], [], []>} : vector<8x128xf32>, vector<128x128xf32>, vector<8x128xf32> -> vector<8x128xf32>
      %654 = arith.addf %651, %653 : vector<8x128xf32>
      %c0_143 = arith.constant 0 : index
      %c0_144 = arith.constant 0 : index
      %655 = vector.load %arg9[%c0_143, %c0_144] : memref<1x128xf32, #tpu.memory_space<vmem>>, vector<1x128xf32>
      %656 = vector.broadcast %655 : vector<1x128xf32> to vector<8x128xf32>
      %657 = arith.addf %654, %656 : vector<8x128xf32>
      %658 = arith.negf %657 : vector<8x128xf32>
      %659 = math.exp %658 : vector<8x128xf32>
      %cst_145 = arith.constant 1.000000e+00 : f32
      %660 = vector.broadcast %cst_145 : f32 to vector<8x128xf32>
      %661 = arith.addf %660, %659 : vector<8x128xf32>
      %662 = arith.divf %660, %661 : vector<8x128xf32>
      %c0_146 = arith.constant 0 : index
      %c0_147 = arith.constant 0 : index
      %663 = vector.load %arg10[%c0_146, %c0_147] : memref<8x128xf32, #tpu.memory_space<vmem>>, vector<8x128xf32>
      tpu.vector_store %arg10[%c0_146, %c0_147], %662 {strides = array<i32>} : memref<8x128xf32, #tpu.memory_space<vmem>>, vector<8x128xf32>,
    } else {
    }
    return
  }
  func.func @transform_0(%arg0: i32, %arg1: i32) -> (i32, i32, i32) {
    %c0_i32 = arith.constant 0 : i32
    %c0_i32_0 = arith.constant 0 : i32
    return %arg1, %arg0, %c0_i32 : i32, i32, i32
  }
  func.func @transform_1(%arg0: i32, %arg1: i32) -> (i32, i32, i32) {
    %c0_i32 = arith.constant 0 : i32
    %0 = arith.subi %c0_i32, %arg1 : i32
    %c1_i32 = arith.constant 1 : i32
    %c0_i32_0 = arith.constant 0 : i32
    return %0, %arg0, %c1_i32 : i32, i32, i32
  }
  func.func @transform_2(%arg0: i32, %arg1: i32) -> (i32, i32) {
    %c0_i32 = arith.constant 0 : i32
    %c0_i32_0 = arith.constant 0 : i32
    return %arg0, %c0_i32 : i32, i32
  }
  func.func @transform_3(%arg0: i32, %arg1: i32) -> (i32, i32) {
    %c0_i32 = arith.constant 0 : i32
    %c0_i32_0 = arith.constant 0 : i32
    %c0_i32_1 = arith.constant 0 : i32
    return %c0_i32, %c0_i32_0 : i32, i32
  }
  func.func @transform_4(%arg0: i32, %arg1: i32) -> (i32, i32) {
    %c0_i32 = arith.constant 0 : i32
    %c0_i32_0 = arith.constant 0 : i32
    %c0_i32_1 = arith.constant 0 : i32
    return %c0_i32, %c0_i32_0 : i32, i32
  }
  func.func @transform_5(%arg0: i32, %arg1: i32) -> (i32, i32) {
    %c0_i32 = arith.constant 0 : i32
    %c0_i32_0 = arith.constant 0 : i32
    %c0_i32_1 = arith.constant 0 : i32
    return %c0_i32, %c0_i32_0 : i32, i32
  }
  func.func @transform_6(%arg0: i32, %arg1: i32) -> (i32, i32) {
    %c0_i32 = arith.constant 0 : i32
    %c0_i32_0 = arith.constant 0 : i32
    %c0_i32_1 = arith.constant 0 : i32
    return %c0_i32, %c0_i32_0 : i32, i32
  }
  func.func @transform_7(%arg0: i32, %arg1: i32) -> (i32, i32) {
    %c0_i32 = arith.constant 0 : i32
    %c0_i32_0 = arith.constant 0 : i32
    %c0_i32_1 = arith.constant 0 : i32
    return %c0_i32, %c0_i32_0 : i32, i32
  }
  func.func @transform_8(%arg0: i32, %arg1: i32) -> (i32, i32) {
    %c0_i32 = arith.constant 0 : i32
    %c0_i32_0 = arith.constant 0 : i32
    return %arg0, %c0_i32 : i32, i32
  }
}

</mosaic_0001>

<bundles_post_ra>
// kernel: bilstm_glove_forward.1
= control target key start
LH: loop header
LB: loop body
LE: loop exit
PB: predicated region body
PF: predicated region fallthrough
CT: control target
= control target key end

     0   :  { %v7791_v4 = vmov 0.0   ;;  %v7789_v7 = vmov 0   ;;  %s7780_s0 = inlined_call_operand.vmem [shape: f32[8,8,1024], index: 0, kind: input, shape index: {}, may-alias: {0,1}]   ;;  %s7781_s1 = inlined_call_operand.vmem [shape: f32[8,8,1024], index: 1, kind: input, shape index: {}, may-alias: {0,1}]   ;;  %s7782_s2 = inlined_call_operand.vmem [shape: s32[8,1], index: 2, kind: input, shape index: {}]   ;;  %s7783_s3 = inlined_call_operand.vmem [shape: f32[128,512], index: 3, kind: input, shape index: {}]   ;;  %s7784_s4 = inlined_call_operand.vmem [shape: f32[128,512], index: 4, kind: input, shape index: {}]   ;;  %s7785_s5 = inlined_call_operand.vmem [shape: f32[128,128], index: 5, kind: input, shape index: {}]   ;;  %s7786_s6 = inlined_call_operand.vmem [shape: f32[128,128], index: 6, kind: input, shape index: {}]   ;;  %s7787_s7 = inlined_call_operand.vmem [shape: f32[1,128], index: 7, kind: input, shape index: {}]   ;;  %s7788_s8 = inlined_call_operand.vmem [shape: f32[8,128], index: 8, kind: output, shape index: {}]  }
   0x1   :  { %v4270_v0 = vld [vmem:[%s7783_s3 + $0x1e8] sm:$0xff]  ;;  %v4275_v1 = vld [vmem:[%s7783_s3 + $0x1e0] sm:$0xff]  ;;  %410 = vmatprep.mubr.f32.mxu0 %v7791_v4  ;;  %481 = vmatprep.mubr.f32.mxu1 %v7791_v4  ;;  %v4319_v10 = vld [vmem:[%s7783_s3 + $0x1f8] sm:$0xff] }
   0x2   :  { %v4280_v2 = vld [vmem:[%s7783_s3 + $0x1c8] sm:$0xff]  ;;  %346 = vmatprep.subr.mxu0 %v4270_v0  ;;  %v4286_v3 = vld [vmem:[%s7783_s3 + $0x1c0] sm:$0xff]  ;;  %3701 = vset.pattern.permute.xlu0 %v7789_v7  ;;  %v4331_v12 = vld [vmem:[%s7783_s3 + $0x1f0] sm:$0xff] }
   0x3   :  { %347 = vmatpush1.msra.mxu0 %v4275_v1  ;;  %v4293_v5 = vld [vmem:[%s7783_s3 + $0x1a8] sm:$0xff]  ;;  %v4300_v6 = vld [vmem:[%s7783_s3 + $0x1a0] sm:$0xff]  ;;  %3702 = vset.pattern.permute.xlu1 %v7789_v7  ;;  %v4343_v14 = vld [vmem:[%s7783_s3 + $0x1d8] sm:$0xff] }
   0x4   :  { %348 = vmatprep.subr.mxu0 %v4280_v2  ;;  %v4307_v8 = vld [vmem:[%s7783_s3 + $0x188] sm:$0xff]  ;;  %v4314_v9 = vld [vmem:[%s7783_s3 + $0x180] sm:$0xff]  ;;  %417 = vmatprep.subr.mxu1 %v4319_v10  ;;  %v4348_v15 = vld [vmem:[%s7783_s3 + $0x1d0] sm:$0xff] }
   0x5   :  { %349 = vmatpush1.msra.mxu0 %v4286_v3  ;;  %v4325_v11 = vld [vmem:[%s7783_s3 + $0x168] sm:$0xff]  ;;  %v4337_v13 = vld [vmem:[%s7783_s3 + $0x160] sm:$0xff]  ;;  %418 = vmatpush1.msra.mxu1 %v4331_v12  ;;  %v4360_v17 = vld [vmem:[%s7783_s3 + $0x1b8] sm:$0xff] }
   0x6   :  { %350 = vmatprep.subr.mxu0 %v4293_v5  ;;  %v4354_v16 = vld [vmem:[%s7783_s3 + $0x148] sm:$0xff]  ;;  %419 = vmatprep.subr.mxu1 %v4343_v14  ;;  %v4366_v18 = vld [vmem:[%s7783_s3 + $0x140] sm:$0xff]  ;;  %v4372_v19 = vld [vmem:[%s7783_s3 + $0x1b0] sm:$0xff] }
   0x7   :  { %351 = vmatpush1.msra.mxu0 %v4300_v6  ;;  %420 = vmatpush1.msra.mxu1 %v4348_v15  ;;  %v4377_v20 = vld [vmem:[%s7783_s3 + $0x198] sm:$0xff]  ;;  %v4383_v21 = vld [vmem:[%s7783_s3 + $0x128] sm:$0xff]  ;;  %v4389_v22 = vld [vmem:[%s7783_s3 + $0x190] sm:$0xff] }
   0x8   :  { %352 = vmatprep.subr.mxu0 %v4307_v8  ;;  %421 = vmatprep.subr.mxu1 %v4360_v17  ;;  %v4395_v23 = vld [vmem:[%s7783_s3 + $0x120] sm:$0xff]  ;;  %v4401_v24 = vld [vmem:[%s7783_s3 + $0x178] sm:$0xff]  ;;  %v4407_v25 = vld [vmem:[%s7783_s3 + $0x108] sm:$0xff] }
   0x9   :  { %353 = vmatpush1.msra.mxu0 %v4314_v9  ;;  %422 = vmatpush1.msra.mxu1 %v4372_v19  ;;  %v4413_v26 = vld [vmem:[%s7783_s3 + $0x170] sm:$0xff]  ;;  %v4419_v27 = vld [vmem:[%s7783_s3 + $0x100] sm:$0xff]  ;;  %v4425_v28 = vld [vmem:[%s7783_s3 + $0x158] sm:$0xff] }
   0xa   :  { %354 = vmatprep.subr.mxu0 %v4325_v11  ;;  %423 = vmatprep.subr.mxu1 %v4377_v20  ;;  %v4431_v29 = vld [vmem:[%s7783_s3 + $0xe8] sm:$0xff]  ;;  %v4437_v30 = vld [vmem:[%s7783_s3 + $0x150] sm:$0xff]  ;;  %v4443_v31 = vld [vmem:[%s7783_s3 + $0xe0] sm:$0xff] }
   0xb   :  { %355 = vmatpush1.msra.mxu0 %v4337_v13  ;;  %424 = vmatpush1.msra.mxu1 %v4389_v22  ;;  %v4449_v32 = vld [vmem:[%s7783_s3 + $0x138] sm:$0xff]  ;;  %v4455_v33 = vld [vmem:[%s7783_s3 + $0xc8] sm:$0xff]  ;;  %v4461_v34 = vld [vmem:[%s7783_s3 + $0x130] sm:$0xff] }
   0xc   :  { %356 = vmatprep.subr.mxu0 %v4354_v16  ;;  %425 = vmatprep.subr.mxu1 %v4401_v24  ;;  %v4467_v35 = vld [vmem:[%s7783_s3 + $0xc0] sm:$0xff]  ;;  %v4473_v36 = vld [vmem:[%s7783_s3 + $0x118] sm:$0xff]  ;;  %v4479_v37 = vld [vmem:[%s7783_s3 + $0xa8] sm:$0xff] }
   0xd   :  { %357 = vmatpush1.msra.mxu0 %v4366_v18  ;;  %426 = vmatpush1.msra.mxu1 %v4413_v26  ;;  %v4485_v38 = vld [vmem:[%s7783_s3 + $0x110] sm:$0xff]  ;;  %v4491_v39 = vld [vmem:[%s7783_s3 + $0xa0] sm:$0xff]  ;;  %v4497_v40 = vld [vmem:[%s7783_s3 + $0xf8] sm:$0xff] }
   0xe   :  { %358 = vmatprep.subr.mxu0 %v4383_v21  ;;  %427 = vmatprep.subr.mxu1 %v4425_v28  ;;  %v4503_v41 = vld [vmem:[%s7783_s3 + $0x88] sm:$0xff]  ;;  %v4509_v42 = vld [vmem:[%s7783_s3 + $0xf0] sm:$0xff]  ;;  %v4515_v43 = vld [vmem:[%s7783_s3 + $0x80] sm:$0xff] }
   0xf   :  { %359 = vmatpush1.msra.mxu0 %v4395_v23  ;;  %428 = vmatpush1.msra.mxu1 %v4437_v30  ;;  %v4521_v44 = vld [vmem:[%s7783_s3 + $0xd8] sm:$0xff]  ;;  %v4527_v45 = vld [vmem:[%s7783_s3 + $0x68] sm:$0xff]  ;;  %v4533_v46 = vld [vmem:[%s7783_s3 + $0xd0] sm:$0xff] }
  0x10   :  { %360 = vmatprep.subr.mxu0 %v4407_v25  ;;  %429 = vmatprep.subr.mxu1 %v4449_v32  ;;  %8157 = vst [vmem:[#allocation8_spill] sm:$0xff] %v4527_v45  ;;  %v4539_v47 = vld [vmem:[%s7783_s3 + $0x60] sm:$0xff]  ;;  %v4545_v48 = vld [vmem:[%s7783_s3 + $0xb8] sm:$0xff]  ;;  %v4551_v49 = vld [vmem:[%s7783_s3 + $0x48] sm:$0xff] }
  0x11   :  { %361 = vmatpush1.msra.mxu0 %v4419_v27  ;;  %430 = vmatpush1.msra.mxu1 %v4461_v34  ;;  %8158 = vst [vmem:[#allocation9_spill] sm:$0xff] %v4539_v47  ;;  %8159 = vst [vmem:[#allocation10_spill] sm:$0xff] %v4551_v49  ;;  %v4557_v50 = vld [vmem:[%s7783_s3 + $0xb0] sm:$0xff]  ;;  %v4563_v51 = vld [vmem:[%s7783_s3 + $0x40] sm:$0xff] }
  0x12   :  { %362 = vmatprep.subr.mxu0 %v4431_v29  ;;  %431 = vmatprep.subr.mxu1 %v4473_v36  ;;  %8160 = vst [vmem:[#allocation11_spill] sm:$0xff] %v4563_v51  ;;  %v4569_v52 = vld [vmem:[%s7783_s3 + $0x98] sm:$0xff]  ;;  %v4575_v53 = vld [vmem:[%s7783_s3 + $0x28] sm:$0xff]  ;;  %v4581_v54 = vld [vmem:[%s7783_s3 + $0x90] sm:$0xff] }
  0x13   :  { %363 = vmatpush1.msra.mxu0 %v4443_v31  ;;  %432 = vmatpush1.msra.mxu1 %v4485_v38  ;;  %8161 = vst [vmem:[#allocation12_spill] sm:$0xff] %v4575_v53  ;;  %v4587_v55 = vld [vmem:[%s7783_s3 + $0x20] sm:$0xff]  ;;  %v4593_v56 = vld [vmem:[%s7783_s3 + $0x78] sm:$0xff]  ;;  %v4599_v57 = vld [vmem:[%s7783_s3 + $0x8] sm:$0xff] }
  0x14   :  { %364 = vmatprep.subr.mxu0 %v4455_v33  ;;  %433 = vmatprep.subr.mxu1 %v4497_v40  ;;  %8162 = vst [vmem:[#allocation13_spill] sm:$0xff] %v4587_v55  ;;  %8163 = vst [vmem:[#allocation14_spill] sm:$0xff] %v4593_v56  ;;  %v4605_v58 = vld [vmem:[%s7783_s3 + $0x70] sm:$0xff]  ;;  %v4611_v59 = vld [vmem:[%s7783_s3] sm:$0xff] }
  0x15   :  { %365 = vmatpush1.msra.mxu0 %v4467_v35  ;;  %434 = vmatpush1.msra.mxu1 %v4509_v42  ;;  %8164 = vst [vmem:[#allocation15_spill] sm:$0xff] %v4599_v57  ;;  %8165 = vst [vmem:[#allocation16_spill] sm:$0xff] %v4605_v58  ;;  %v4617_v60 = vld [vmem:[%s7783_s3 + $0x58] sm:$0xff]  ;;  %v4623_v61 = vld [vmem:[%s7784_s4 + $0x1e8] sm:$0xff] }
  0x16   :  { %366 = vmatprep.subr.mxu0 %v4479_v37  ;;  %435 = vmatprep.subr.mxu1 %v4521_v44  ;;  %8166 = vst [vmem:[#allocation17_spill] sm:$0xff] %v4611_v59  ;;  %8167 = vst [vmem:[#allocation18_spill] sm:$0xff] %v4617_v60  ;;  %v4630_v62 = vld [vmem:[%s7784_s4 + $0x1e0] sm:$0xff]  ;;  %v4636_v63 = vld [vmem:[%s7783_s3 + $0x50] sm:$0xff] }
  0x17   :  { %367 = vmatpush1.msra.mxu0 %v4491_v39  ;;  %436 = vmatpush1.msra.mxu1 %v4533_v46  ;;  %8168 = vst [vmem:[#allocation19_spill] sm:$0xff] %v4623_v61  ;;  %8169 = vst [vmem:[#allocation20_spill] sm:$0xff] %v4630_v62  ;;  %v4642_v7 = vld [vmem:[%s7784_s4 + $0x1c8] sm:$0xff]  ;;  %v4648_v4 = vld [vmem:[%s7783_s3 + $0x38] sm:$0xff] }
  0x18   :  { %368 = vmatprep.subr.mxu0 %v4503_v41  ;;  %437 = vmatprep.subr.mxu1 %v4545_v48  ;;  %8170 = vst [vmem:[#allocation21_spill] sm:$0xff] %v4636_v63  ;;  %8171 = vst [vmem:[#allocation22_spill] sm:$0xff] %v4642_v7 }
  0x19   :  { %369 = vmatpush1.msra.mxu0 %v4515_v43  ;;  %438 = vmatpush1.msra.mxu1 %v4557_v50  ;;  %8172 = vst [vmem:[#allocation23_spill] sm:$0xff] %v4648_v4 }
  0x1a   :  { %370 = vmatprep.subr.mxu0 %v4527_v45  ;;  %439 = vmatprep.subr.mxu1 %v4569_v52 }
  0x1b   :  { %371 = vmatpush1.msra.mxu0 %v4539_v47  ;;  %440 = vmatpush1.msra.mxu1 %v4581_v54 }
  0x1c   :  { %372 = vmatprep.subr.mxu0 %v4551_v49  ;;  %441 = vmatprep.subr.mxu1 %v4593_v56 }
  0x1d   :  { %373 = vmatpush1.msra.mxu0 %v4563_v51  ;;  %442 = vmatpush1.msra.mxu1 %v4605_v58  ;;  %v4678_v51 = vld [vmem:[%s7784_s4 + $0x1a0] sm:$0xff] }
  0x1e   :  { %374 = vmatprep.subr.mxu0 %v4575_v53  ;;  %443 = vmatprep.subr.mxu1 %v4617_v60  ;;  %v4666_v53 = vld [vmem:[%s7784_s4 + $0x1a8] sm:$0xff]  ;;  %8178 = vst [vmem:[#allocation28_spill] sm:$0xff] %v4678_v51 }
  0x1f   :  { %375 = vmatpush1.msra.mxu0 %v4587_v55  ;;  %v4660_v55 = vld [vmem:[%s7783_s3 + $0x30] sm:$0xff]  ;;  %8176 = vst [vmem:[#allocation26_spill] sm:$0xff] %v4666_v53  ;;  %444 = vmatpush1.msra.mxu1 %v4636_v63  ;;  %v4690_v63 = vld [vmem:[%s7784_s4 + $0x188] sm:$0xff] }
  0x20   :  { %376 = vmatprep.subr.mxu0 %v4599_v57  ;;  %v8173_v57 = vmov 0.0   ;;  %8175 = vst [vmem:[#allocation25_spill] sm:$0xff] %v4660_v55  ;;  %445 = vmatprep.subr.mxu1 %v4648_v4  ;;  %8180 = vst [vmem:[#allocation30_spill] sm:$0xff] %v4690_v63  ;;  %v4702_v4 = vld [vmem:[%s7784_s4 + $0x180] sm:$0xff]  ;;  %v4973_v60 = vld [vmem:[%s7784_s4 + $0x8] sm:$0xff] }
  0x21   :  { %377 = vmatpush1.msra.mxu0 %v4611_v59  ;;  %v4655_v59 = vld [vmem:[%s7784_s4 + $0x1c0] sm:$0xff]  ;;  %446 = vmatpush1.msra.mxu1 %v4660_v55  ;;  %8182 = vst [vmem:[#allocation32_spill] sm:$0xff] %v4702_v4  ;;  %v4757_v55 = vld [vmem:[%s7784_s4 + $0x128] sm:$0xff]  ;;  %8226 = vst [vmem:[#allocation76_spill] sm:$0xff] %v4973_v60 }
  0x22   :  { %411 = vmatmul.mubr.f32.vlgmr.msra.gmra.mxu0 %v8173_v57  ;;  %530 = vmatprep.subr.mxu0 %v4623_v61  ;;  %8174 = vst [vmem:[#allocation24_spill] sm:$0xff] %v4655_v59  ;;  %v4672_v61 = vld [vmem:[%s7783_s3 + $0x18] sm:$0xff]  ;;  %8191 = vst [vmem:[#allocation41_spill] sm:$0xff] %v4757_v55 }
  0x23   :  { %531 = vmatpush1.msra.mxu0 %v4630_v62  ;;  %8177 = vst [vmem:[#allocation27_spill] sm:$0xff] %v4672_v61  ;;  %v4684_v62 = vld [vmem:[%s7783_s3 + $0x10] sm:$0xff]  ;;  %447 = vmatprep.subr.mxu1 %v4672_v61  ;;  %v4721_v61 = vld [vmem:[%s7784_s4 + $0x160] sm:$0xff] }
  0x24   :  { %532 = vmatprep.subr.mxu0 %v4642_v7  ;;  %8179 = vst [vmem:[#allocation29_spill] sm:$0xff] %v4684_v62  ;;  %v4696_v7 = vld [vmem:[%s7784_s4 + $0x1f8] sm:$0xff]  ;;  %448 = vmatpush1.msra.mxu1 %v4684_v62  ;;  %8185 = vst [vmem:[#allocation35_spill] sm:$0xff] %v4721_v61  ;;  %v4733_v62 = vld [vmem:[%s7784_s4 + $0x148] sm:$0xff] }
  0x25   :  { %533 = vmatpush1.msra.mxu0 %v4655_v59  ;;  %8181 = vst [vmem:[#allocation31_spill] sm:$0xff] %v4696_v7  ;;  %v4709_v59 = vld [vmem:[%s7784_s4 + $0x168] sm:$0xff]  ;;  %601 = vmatprep.subr.mxu1 %v4696_v7  ;;  %8187 = vst [vmem:[#allocation37_spill] sm:$0xff] %v4733_v62  ;;  %v4745_v7 = vld [vmem:[%s7784_s4 + $0x140] sm:$0xff] }
  0x26   :  { %534 = vmatprep.subr.mxu0 %v4666_v53  ;;  %8183 = vst [vmem:[#allocation33_spill] sm:$0xff] %v4709_v59  ;;  %v4715_v53 = vld [vmem:[%s7784_s4 + $0x1f0] sm:$0xff]  ;;  %482 = vmatmul.mubr.f32.vlgmr.msra.gmra.mxu1 %v8173_v57  ;;  %8189 = vst [vmem:[#allocation39_spill] sm:$0xff] %v4745_v7 }
  0x27   :  { %535 = vmatpush1.msra.mxu0 %v4678_v51  ;;  %8184 = vst [vmem:[#allocation34_spill] sm:$0xff] %v4715_v53  ;;  %v4727_v51 = vld [vmem:[%s7784_s4 + $0x1d8] sm:$0xff]  ;;  %602 = vmatpush1.msra.mxu1 %v4715_v53  ;;  %v4769_v53 = vld [vmem:[%s7784_s4 + $0x120] sm:$0xff] }
  0x28   :  { %536 = vmatprep.subr.mxu0 %v4690_v63  ;;  %8186 = vst [vmem:[#allocation36_spill] sm:$0xff] %v4727_v51  ;;  %v4739_v63 = vld [vmem:[%s7784_s4 + $0x1d0] sm:$0xff]  ;;  %603 = vmatprep.subr.mxu1 %v4727_v51  ;;  %8193 = vst [vmem:[#allocation43_spill] sm:$0xff] %v4769_v53  ;;  %v4781_v51 = vld [vmem:[%s7784_s4 + $0x108] sm:$0xff] }
  0x29   :  { %537 = vmatpush1.msra.mxu0 %v4702_v4  ;;  %8188 = vst [vmem:[#allocation38_spill] sm:$0xff] %v4739_v63  ;;  %v4751_v4 = vld [vmem:[%s7784_s4 + $0x1b8] sm:$0xff]  ;;  %604 = vmatpush1.msra.mxu1 %v4739_v63  ;;  %8195 = vst [vmem:[#allocation45_spill] sm:$0xff] %v4781_v51  ;;  %v4793_v63 = vld [vmem:[%s7784_s4 + $0x100] sm:$0xff] }
  0x2a   :  { %538 = vmatprep.subr.mxu0 %v4709_v59  ;;  %8190 = vst [vmem:[#allocation40_spill] sm:$0xff] %v4751_v4  ;;  %v4763_v59 = vld [vmem:[%s7784_s4 + $0x1b0] sm:$0xff]  ;;  %605 = vmatprep.subr.mxu1 %v4751_v4  ;;  %8197 = vst [vmem:[#allocation47_spill] sm:$0xff] %v4793_v63  ;;  %v4805_v4 = vld [vmem:[%s7784_s4 + $0xe8] sm:$0xff] }
  0x2b   :  { %539 = vmatpush1.msra.mxu0 %v4721_v61  ;;  %8192 = vst [vmem:[#allocation42_spill] sm:$0xff] %v4763_v59  ;;  %v4775_v61 = vld [vmem:[%s7784_s4 + $0x198] sm:$0xff]  ;;  %606 = vmatpush1.msra.mxu1 %v4763_v59  ;;  %8199 = vst [vmem:[#allocation49_spill] sm:$0xff] %v4805_v4  ;;  %v4817_v59 = vld [vmem:[%s7784_s4 + $0xe0] sm:$0xff] }
  0x2c   :  { %540 = vmatprep.subr.mxu0 %v4733_v62  ;;  %8194 = vst [vmem:[#allocation44_spill] sm:$0xff] %v4775_v61  ;;  %v4787_v62 = vld [vmem:[%s7784_s4 + $0x190] sm:$0xff]  ;;  %607 = vmatprep.subr.mxu1 %v4775_v61  ;;  %8201 = vst [vmem:[#allocation51_spill] sm:$0xff] %v4817_v59  ;;  %v4829_v61 = vld [vmem:[%s7784_s4 + $0xc8] sm:$0xff] }
  0x2d   :  { %541 = vmatpush1.msra.mxu0 %v4745_v7  ;;  %8196 = vst [vmem:[#allocation46_spill] sm:$0xff] %v4787_v62  ;;  %v4799_v7 = vld [vmem:[%s7784_s4 + $0x178] sm:$0xff]  ;;  %608 = vmatpush1.msra.mxu1 %v4787_v62  ;;  %8203 = vst [vmem:[#allocation53_spill] sm:$0xff] %v4829_v61  ;;  %v4841_v62 = vld [vmem:[%s7784_s4 + $0xc0] sm:$0xff] }
  0x2e   :  { %542 = vmatprep.subr.mxu0 %v4757_v55  ;;  %8198 = vst [vmem:[#allocation48_spill] sm:$0xff] %v4799_v7  ;;  %v4811_v55 = vld [vmem:[%s7784_s4 + $0x170] sm:$0xff]  ;;  %609 = vmatprep.subr.mxu1 %v4799_v7  ;;  %8205 = vst [vmem:[#allocation55_spill] sm:$0xff] %v4841_v62  ;;  %v4853_v7 = vld [vmem:[%s7784_s4 + $0xa8] sm:$0xff] }
  0x2f   :  { %543 = vmatpush1.msra.mxu0 %v4769_v53  ;;  %8200 = vst [vmem:[#allocation50_spill] sm:$0xff] %v4811_v55  ;;  %v4823_v53 = vld [vmem:[%s7784_s4 + $0x158] sm:$0xff]  ;;  %610 = vmatpush1.msra.mxu1 %v4811_v55  ;;  %8207 = vst [vmem:[#allocation57_spill] sm:$0xff] %v4853_v7  ;;  %v4865_v55 = vld [vmem:[%s7784_s4 + $0xa0] sm:$0xff] }
  0x30   :  { %544 = vmatprep.subr.mxu0 %v4781_v51  ;;  %8202 = vst [vmem:[#allocation52_spill] sm:$0xff] %v4823_v53  ;;  %v4835_v51 = vld [vmem:[%s7784_s4 + $0x150] sm:$0xff]  ;;  %611 = vmatprep.subr.mxu1 %v4823_v53  ;;  %8209 = vst [vmem:[#allocation59_spill] sm:$0xff] %v4865_v55  ;;  %v4877_v53 = vld [vmem:[%s7784_s4 + $0x88] sm:$0xff] }
  0x31   :  { %545 = vmatpush1.msra.mxu0 %v4793_v63  ;;  %8204 = vst [vmem:[#allocation54_spill] sm:$0xff] %v4835_v51  ;;  %v4847_v63 = vld [vmem:[%s7784_s4 + $0x138] sm:$0xff]  ;;  %612 = vmatpush1.msra.mxu1 %v4835_v51  ;;  %8211 = vst [vmem:[#allocation61_spill] sm:$0xff] %v4877_v53  ;;  %v4932_v51 = vld [vmem:[%s7784_s4 + $0x40] sm:$0xff] }
  0x32   :  { %546 = vmatprep.subr.mxu0 %v4805_v4  ;;  %8206 = vst [vmem:[#allocation56_spill] sm:$0xff] %v4847_v63  ;;  %v4859_v4 = vld [vmem:[%s7784_s4 + $0x130] sm:$0xff]  ;;  %613 = vmatprep.subr.mxu1 %v4847_v63  ;;  %v4896_v63 = vld [vmem:[%s7784_s4 + $0x68] sm:$0xff]  ;;  %8220 = vst [vmem:[#allocation70_spill] sm:$0xff] %v4932_v51 }
  0x33   :  { %547 = vmatpush1.msra.mxu0 %v4817_v59  ;;  %8208 = vst [vmem:[#allocation58_spill] sm:$0xff] %v4859_v4  ;;  %v4871_v59 = vld [vmem:[%s7784_s4 + $0x118] sm:$0xff]  ;;  %614 = vmatpush1.msra.mxu1 %v4859_v4  ;;  %8214 = vst [vmem:[#allocation64_spill] sm:$0xff] %v4896_v63  ;;  %v4908_v4 = vld [vmem:[%s7784_s4 + $0x60] sm:$0xff] }
  0x34   :  { %548 = vmatprep.subr.mxu0 %v4829_v61  ;;  %8210 = vst [vmem:[#allocation60_spill] sm:$0xff] %v4871_v59  ;;  %v4884_v61 = vld [vmem:[%s7784_s4 + $0x80] sm:$0xff]  ;;  %615 = vmatprep.subr.mxu1 %v4871_v59  ;;  %8216 = vst [vmem:[#allocation66_spill] sm:$0xff] %v4908_v4  ;;  %v4920_v59 = vld [vmem:[%s7784_s4 + $0x48] sm:$0xff] }
  0x35   :  { %549 = vmatpush1.msra.mxu0 %v4841_v62  ;;  %8212 = vst [vmem:[#allocation62_spill] sm:$0xff] %v4884_v61  ;;  %v4890_v62 = vld [vmem:[%s7784_s4 + $0x110] sm:$0xff]  ;;  %594 = vmatprep.mubr.f32.mxu0 %v8173_v57  ;;  %8218 = vst [vmem:[#allocation68_spill] sm:$0xff] %v4920_v59 }
  0x36   :  { %550 = vmatprep.subr.mxu0 %v4853_v7  ;;  %8213 = vst [vmem:[#allocation63_spill] sm:$0xff] %v4890_v62  ;;  %v4902_v7 = vld [vmem:[%s7784_s4 + $0xf8] sm:$0xff]  ;;  %616 = vmatpush1.msra.mxu1 %v4890_v62  ;;  %v4944_v62 = vld [vmem:[%s7784_s4 + $0x28] sm:$0xff] }
  0x37   :  { %551 = vmatpush1.msra.mxu0 %v4865_v55  ;;  %8215 = vst [vmem:[#allocation65_spill] sm:$0xff] %v4902_v7  ;;  %v4914_v55 = vld [vmem:[%s7784_s4 + $0xf0] sm:$0xff]  ;;  %617 = vmatprep.subr.mxu1 %v4902_v7  ;;  %8222 = vst [vmem:[#allocation72_spill] sm:$0xff] %v4944_v62  ;;  %v4955_v7 = vld [vmem:[%s7782_s2] sm:$0xff] }
  0x38   :  { %552 = vmatprep.subr.mxu0 %v4877_v53  ;;  %8217 = vst [vmem:[#allocation67_spill] sm:$0xff] %v4914_v55  ;;  %v4926_v53 = vld [vmem:[%s7784_s4 + $0xd8] sm:$0xff]  ;;  %618 = vmatpush1.msra.mxu1 %v4914_v55  ;;  %v4967_v55 = vld [vmem:[%s7784_s4 + $0xb0] sm:$0xff]  ;;  %vm517_vm0 = vcmp.gt.s32.totalorder %v4955_v7, 0  ;;  %vm701_vm1 = vcmp.gt.s32.totalorder %v4955_v7, 7  ;;  %vm1257_vm2 = vcmp.gt.s32.totalorder %v4955_v7, 2 }
  0x39   :  { %553 = vmatpush1.msra.mxu0 %v4884_v61  ;;  %8219 = vst [vmem:[#allocation69_spill] sm:$0xff] %v4926_v53  ;;  %v4938_v61 = vld [vmem:[%s7784_s4 + $0xd0] sm:$0xff]  ;;  %619 = vmatprep.subr.mxu1 %v4926_v53  ;;  %8225 = vst [vmem:[#allocation75_spill] sm:$0xff] %v4967_v55  ;;  %v4985_v53 = vld [vmem:[%s7784_s4] sm:$0xff]  ;;  %vm1627_vm3 = vcmp.gt.s32.totalorder %v4955_v7, 3  ;;  %vm1811_vm4 = vcmp.gt.s32.totalorder %v4955_v7, 4 }
  0x3a   :  { %554 = vmatprep.subr.mxu0 %v4896_v63  ;;  %8221 = vst [vmem:[#allocation71_spill] sm:$0xff] %v4938_v61  ;;  %v4950_v63 = vld [vmem:[%s7784_s4 + $0xb8] sm:$0xff]  ;;  %620 = vmatpush1.msra.mxu1 %v4938_v61  ;;  %8228 = vst [vmem:[#allocation78_spill] sm:$0xff] %v4985_v53  ;;  %vm1441_vm5 = vcmp.gt.s32.totalorder %v4955_v7, 5  ;;  %vm1071_vm6 = vcmp.gt.s32.totalorder %v4955_v7, 6  ;;  %vm887_vm7 = vcmp.gt.s32.totalorder %v4955_v7, 1 }
  0x3b   :  { %555 = vmatpush1.msra.mxu0 %v4908_v4  ;;  %8223 = vst [vmem:[#allocation73_spill] sm:$0xff] %v4950_v63  ;;  %v4961_v4 = vld [vmem:[%s7784_s4 + $0x20] sm:$0xff]  ;;  %621 = vmatprep.subr.mxu1 %v4950_v63  ;;  %v5006_v63 = vld [vmem:[%s7784_s4 + $0x70] sm:$0xff]  ;;  %v29_v7 = vld [vmem:[%s7780_s0 + $0x8] sm:$0xff] }
  0x3c   :  { %556 = vmatprep.subr.mxu0 %v4920_v59  ;;  %8224 = vst [vmem:[#allocation74_spill] sm:$0xff] %v4961_v4  ;;  %v4979_v59 = vld [vmem:[%s7784_s4 + $0x98] sm:$0xff]  ;;  %622 = vmatpush1.msra.mxu1 %v4967_v55  ;;  %8231 = vst [vmem:[#allocation81_spill] sm:$0xff] %v5006_v63  ;;  %v8233_v55 = vmov 0  }
  0x3d   :  { %557 = vmatpush1.msra.mxu0 %v4932_v51  ;;  %8227 = vst [vmem:[#allocation77_spill] sm:$0xff] %v4979_v59  ;;  %v4991_v51 = vld [vmem:[%s7784_s4 + $0x90] sm:$0xff]  ;;  %623 = vmatprep.subr.mxu1 %v4979_v59  ;;  %v5016_v61 = vsel %vm517_vm0, 1, %v8233_v55 }
  0x3e   :  { %558 = vmatprep.subr.mxu0 %v4944_v62  ;;  %8229 = vst [vmem:[#allocation79_spill] sm:$0xff] %v4991_v51  ;;  %v4999_v62 = vld [vmem:[%s7784_s4 + $0x78] sm:$0xff]  ;;  %624 = vmatpush1.msra.mxu1 %v4991_v51  ;;  %v5047_v51 = vsel %vm701_vm1, 1, %v8233_v55 }
  0x3f   :  { %559 = vmatpush1.msra.mxu0 %v4961_v4  ;;  %8230 = vst [vmem:[#allocation80_spill] sm:$0xff] %v4999_v62  ;;  %v5013_v4 = vld [vmem:[%s7784_s4 + $0x58] sm:$0xff]  ;;  %625 = vmatprep.subr.mxu1 %v4999_v62  ;;  %v5037_v62 = vld [vmem:[%s7784_s4 + $0x30] sm:$0xff] }
  0x40   :  { %560 = vmatprep.subr.mxu0 %v4973_v60  ;;  %8232 = vst [vmem:[#allocation82_spill] sm:$0xff] %v5013_v4  ;;  %v5023_v60 = vld [vmem:[%s7784_s4 + $0x50] sm:$0xff]  ;;  %626 = vmatpush1.msra.mxu1 %v5006_v63  ;;  %v5044_v63 = vld [vmem:[%s7784_s4 + $0x18] sm:$0xff] }
  0x41   :  { %561 = vmatpush1.msra.mxu0 %v4985_v53  ;;  %v5030_v53 = vld [vmem:[%s7784_s4 + $0x38] sm:$0xff]  ;;  %665 = vmatprep.mubr.f32.mxu1 %v8173_v57  ;;  %8235 = vst [vmem:[#allocation84_spill] sm:$0xff] %v5044_v63 }
  0x42   :  { %595 = vmatmul.mubr.f32.vlgmr.msra.gmra.mxu0 %v8173_v57  ;;  %8234 = vst [vmem:[#allocation83_spill] sm:$0xff] %v5030_v53  ;;  %627 = vmatprep.subr.mxu1 %v5013_v4  ;;  %v5054_v4 = vld [vmem:[%s7784_s4 + $0x10] sm:$0xff] }
  0x43   :  { %520 = vperm.xlu0 %3701, %v5016_v61   ;;  %628 = vmatpush1.msra.mxu1 %v5023_v60 }
  0x44   :  { %716 = vmatprep.subr.mxu0 %v4270_v0  ;;  %629 = vmatprep.subr.mxu1 %v5030_v53  ;;  %v5064_v0 = vsel %vm1257_vm2, 1, %v8233_v55 }
  0x45   :  { %717 = vmatpush1.msra.mxu0 %v4275_v1  ;;  %630 = vmatpush1.msra.mxu1 %v5037_v62  ;;  %v5075_v1 = vsel %vm1627_vm3, 1, %v8233_v55 }
  0x46   :  { %718 = vmatprep.subr.mxu0 %v4280_v2  ;;  %631 = vmatprep.subr.mxu1 %v5044_v63  ;;  %v5087_v2 = vsel %vm1811_vm4, 1, %v8233_v55 }
  0x47   :  { %704 = vperm.xlu0 %3701, %v5047_v51   ;;  %632 = vmatpush1.msra.mxu1 %v5054_v4 }
  0x48   :  { %719 = vmatpush1.msra.mxu0 %v4286_v3  ;;  %666 = vmatmul.mubr.f32.vlgmr.msra.gmra.mxu1 %v8173_v57  ;;  %v1442_v3 = vsel %vm1441_vm5, 1, %v8233_v55 }
  0x49   :  { %787 = vmatprep.subr.mxu1 %v4319_v10  ;;  %720 = vmatprep.subr.mxu0 %v4293_v5  ;;  %v1072_v5 = vsel %vm1071_vm6, 1, %v8233_v55  ;;  %vm4221_vm6 = vmmov 0  }
  0x4a   :  { %788 = vmatpush1.msra.mxu1 %v4331_v12  ;;  %721 = vmatpush1.msra.mxu0 %v4300_v6  ;;  %v8236_v6 = vld [vmem:[#allocation18_spill] sm:$0xff] }
  0x4b   :  { %1260 = vperm.xlu0 %3701, %v5064_v0   ;;  %789 = vmatprep.subr.mxu1 %v4343_v14 }
  0x4c   :  { %790 = vmatpush1.msra.mxu1 %v4348_v15  ;;  %722 = vmatprep.subr.mxu0 %v4307_v8  ;;  %v8237_v8 = vld [vmem:[#allocation11_spill] sm:$0xff] }
  0x4d   :  { %791 = vmatprep.subr.mxu1 %v4360_v17  ;;  %723 = vmatpush1.msra.mxu0 %v4314_v9  ;;  %v8238_v9 = vld [vmem:[#allocation21_spill] sm:$0xff] }
  0x4e   :  { %792 = vmatpush1.msra.mxu1 %v4372_v19  ;;  %724 = vmatprep.subr.mxu0 %v4325_v11  ;;  %v8239_v11 = vld [vmem:[#allocation12_spill] sm:$0xff] }
  0x4f   :  { %1630 = vperm.xlu0 %3701, %v5075_v1   ;;  %793 = vmatprep.subr.mxu1 %v4377_v20 }
  0x50   :  { %794 = vmatpush1.msra.mxu1 %v4389_v22  ;;  %725 = vmatpush1.msra.mxu0 %v4337_v13  ;;  %v8240_v13 = vld [vmem:[#allocation23_spill] sm:$0xff] }
  0x51   :  { %795 = vmatprep.subr.mxu1 %v4401_v24  ;;  %726 = vmatprep.subr.mxu0 %v4354_v16 }
  0x52   :  { %796 = vmatpush1.msra.mxu1 %v4413_v26  ;;  %727 = vmatpush1.msra.mxu0 %v4366_v18 }
  0x53   :  { %2000 = vperm.xlu0 %3701, %v5087_v2   ;;  %797 = vmatprep.subr.mxu1 %v4425_v28 }
  0x54   :  { %798 = vmatpush1.msra.mxu1 %v4437_v30  ;;  %728 = vmatprep.subr.mxu0 %v4383_v21 }
  0x55   :  { %799 = vmatprep.subr.mxu1 %v4449_v32  ;;  %729 = vmatpush1.msra.mxu0 %v4395_v23 }
  0x56   :  { %800 = vmatpush1.msra.mxu1 %v4461_v34  ;;  %730 = vmatprep.subr.mxu0 %v4407_v25 }
  0x57   :  { %2370 = vperm.xlu0 %3701, %v1442_v3   ;;  %801 = vmatprep.subr.mxu1 %v4473_v36 }
  0x58   :  { %731 = vmatpush1.msra.mxu0 %v4419_v27  ;;  %802 = vmatpush1.msra.mxu1 %v4485_v38 }
  0x59   :  { %732 = vmatprep.subr.mxu0 %v4431_v29  ;;  %803 = vmatprep.subr.mxu1 %v4497_v40 }
  0x5a   :  { %733 = vmatpush1.msra.mxu0 %v4443_v31  ;;  %804 = vmatpush1.msra.mxu1 %v4509_v42 }
  0x5b   :  { %2740 = vperm.xlu0 %3701, %v1072_v5   ;;  %734 = vmatprep.subr.mxu0 %v4455_v33 }
  0x5c   :  { %805 = vmatprep.subr.mxu1 %v4521_v44  ;;  %735 = vmatpush1.msra.mxu0 %v4467_v35 }
  0x5d   :  { %806 = vmatpush1.msra.mxu1 %v4533_v46  ;;  %736 = vmatprep.subr.mxu0 %v4479_v37 }
  0x5e   :  { %807 = vmatprep.subr.mxu1 %v4545_v48  ;;  %737 = vmatpush1.msra.mxu0 %v4491_v39 }
  0x5f   :  { %3110 = vperm.xlu0 %3701, %v5047_v51   ;;  %808 = vmatpush1.msra.mxu1 %v4557_v50  ;;  %v8241_v51 = vld [vmem:[#allocation13_spill] sm:$0xff] }
  0x60   :  { %738 = vmatprep.subr.mxu0 %v4503_v41  ;;  %809 = vmatprep.subr.mxu1 %v4569_v52 }
  0x61   :  { %739 = vmatpush1.msra.mxu0 %v4515_v43  ;;  %810 = vmatpush1.msra.mxu1 %v4581_v54 }
  0x62   :  { %740 = vmatprep.subr.mxu0 %v4527_v45  ;;  %811 = vmatprep.subr.mxu1 %v4593_v56  ;;  %v8242_v45 = vld [vmem:[#allocation25_spill] sm:$0xff]  ;;  %v8243_v56 = vld [vmem:[#allocation15_spill] sm:$0xff] }
  0x63   :  { %741 = vmatpush1.msra.mxu0 %v4539_v47  ;;  %812 = vmatpush1.msra.mxu1 %v4605_v58  ;;  %v8244_v47 = vld [vmem:[#allocation27_spill] sm:$0xff]  ;;  %v8245_v58 = vld [vmem:[#allocation17_spill] sm:$0xff] }
  0x64   :  { %742 = vmatprep.subr.mxu0 %v4551_v49  ;;  %813 = vmatprep.subr.mxu1 %v8236_v6  ;;  %v8246_v6 = vld [vmem:[#allocation29_spill] sm:$0xff] }
  0x65   :  { %743 = vmatpush1.msra.mxu0 %v8237_v8  ;;  %814 = vmatpush1.msra.mxu1 %v8238_v9  ;;  %v8247_v9 = vld [vmem:[#allocation19_spill] sm:$0xff] }
  0x66   :  { %744 = vmatprep.subr.mxu0 %v8239_v11  ;;  %815 = vmatprep.subr.mxu1 %v8240_v13  ;;  %v8248_v11 = vld [vmem:[#allocation31_spill] sm:$0xff] }
  0x67   :  { %745 = vmatpush1.msra.mxu0 %v8241_v51  ;;  %816 = vmatpush1.msra.mxu1 %v8242_v45  ;;  %v888_v45 = vsel %vm887_vm7, 1, %v8233_v55 }
  0x68   :  { %746 = vmatprep.subr.mxu0 %v8243_v56  ;;  %817 = vmatprep.subr.mxu1 %v8244_v47 }
  0x69   :  { %747 = vmatpush1.msra.mxu0 %v8245_v58  ;;  %780 = vmatprep.mubr.f32.mxu0 %v8173_v57  ;;  %v31_v58 = vld [vmem:[%s7780_s0 + $0x10] sm:$0xff] }
  0x6a   :  { %818 = vmatpush1.msra.mxu1 %v8246_v6  ;;  %851 = vmatprep.mubr.f32.mxu1 %v8173_v57 }
  0x6b   :  { %900 = vmatprep.subr.mxu0 %v8247_v9  ;;  %971 = vmatprep.subr.mxu1 %v8248_v11  ;;  %v27_v11 = vld [vmem:[%s7780_s0] sm:$0xff] }
  0x6c   :  { %890 = vperm.xlu1 %3702, %v888_v45  }
  0x70   :  { %1074 = vperm.xlu1 %3702, %v1072_v5  }
  0x74   :  { %1444 = vperm.xlu1 %3702, %v1442_v3  }
  0x78   :  { %1814 = vperm.xlu1 %3702, %v5087_v2  }
  0x7c   :  { %2184 = vperm.xlu1 %3702, %v5075_v1  }
  0x80   :  { %2554 = vperm.xlu1 %3702, %v5064_v0  }
  0x84   :  { %2924 = vperm.xlu1 %3702, %v888_v45   ;;  %v33_v45 = vld [vmem:[%s7780_s0 + $0x18] sm:$0xff] }
  0x88   :  { %3293 = vperm.xlu1 %3702, %v5016_v61  }
  0xe2   :  { %v412_v9 = vpop.f32.mrf.mxu0 }
  0xe3   :  { %v488_v55 = vadd.f32 %v412_v9, %v27_v11 }
  0xe4   :  { %v414_v3 = vpop.f32.mrf.mxu0 }
  0xe5   :  { %v3540_v5 = vmul.f32 -1.442695, %v488_v55  ;;  %v489_v2 = vadd.f32 %v414_v3, %v29_v7  ;;  %v3536_v3 = vld [vmem:[%s7781_s1 + $0x1e0] sm:$0xff] }
  0xe6   :  { %v483_v0 = vpop.f32.mrf.mxu1 }
  0xe7   :  { %3703 = vpow2.f32 %v3540_v5  ;;  %v3541_v1 = vmul.f32 -1.442695, %v489_v2  ;;  %v490_v56 = vadd.f32 %v483_v0, %v31_v58 }
  0xe8   :  { %v485_v61 = vpop.f32.mrf.mxu1 }
  0xe9   :  { %3705 = vpow2.f32 %v3541_v1  ;;  %v491_v6 = vadd.f32 %v485_v61, %v33_v45 }
  0xeb   :  { %v3542_v47 = vmul.f32 -1.442695, %v491_v6  ;;  %v3537_v6 = vld [vmem:[%s7781_s1 + $0x1e8] sm:$0xff] }
  0xed   :  { %3707 = vpow2.f32 %v3542_v47 }
  0xee   :  { %3709 = vtanh.f32 %v490_v56 }
  0xf4   :  { %v3704_v9 = vpop.eup %3703 }
  0xf5   :  { %v495_v11 = vadd.f32 1.0, %v3704_v9 }
  0xf6   :  { %v3706_v7 = vpop.eup %3705 }
  0xf7   :  { %3711 = vrcp.f32 %v495_v11  ;;  %v501_v55 = vadd.f32 1.0, %v3706_v7  ;;  %v521_v7 = vpop.permute.xlu0 %520 }
  0xf8   :  { %vm522_vm8 = vcmp.eq.s32.totalorder %v521_v7, 1  ;;  %v8258_v7 = vld [vmem:[#allocation42_spill] sm:$0xff] }
  0xf9   :  { %3713 = vrcp.f32 %v501_v55 }
  0xfa   :  { %v3708_v5 = vpop.eup %3707 }
  0xfb   :  { %v3710_v2 = vpop.eup %3709  ;;  %v508_v47 = vadd.f32 1.0, %v3708_v5 }
 0x102   :  { %v596_v1 = vpop.f32.mrf.mxu0 }
 0x103   :  { %v672_v58 = vadd.f32 %v3536_v3, %v596_v1  ;;  %v3539_v3 = vld [vmem:[%s7781_s1 + $0x1f8] sm:$0xff] }
 0x104   :  { %v3712_v0 = vpop.eup %3711  ;;  %v598_v45 = vpop.f32.mrf.mxu0 }
 0x105   :  { %v512_v56 = vmul.f32 %v3712_v0, %v3710_v2  ;;  %v3543_v61 = vmul.f32 -1.442695, %v672_v58  ;;  %v673_v9 = vadd.f32 %v3537_v6, %v598_v45  ;;  %v3538_v2 = vld [vmem:[%s7781_s1 + $0x1f0] sm:$0xff] }
 0x106   :  { %v3714_v11 = vpop.eup %3713 }
 0x107   :  { %v511_v55 = vmul.f32 0.0, %v3714_v11  ;;  %3715 = vpow2.f32 %v3543_v61  ;;  %v3544_v51 = vmul.f32 -1.442695, %v673_v9  ;;  %v8250_v11 = vld [vmem:[#allocation34_spill] sm:$0xff] }
 0x108   :  { %3717 = vrcp.f32 %v508_v47  ;;  %v667_v8 = vpop.f32.mrf.mxu1 }
 0x109   :  { %v513_v13 = vadd.f32 %v512_v56, %v511_v55  ;;  %3719 = vpow2.f32 %v3544_v51  ;;  %v674_v6 = vadd.f32 %v3538_v2, %v667_v8  ;;  %v8249_v8 = vld [vmem:[#allocation20_spill] sm:$0xff]  ;;  %v8251_v55 = vld [vmem:[#allocation22_spill] sm:$0xff] }
 0x10a   :  { %v669_v5 = vpop.f32.mrf.mxu1  ;;  %v8254_v2 = vld [vmem:[#allocation38_spill] sm:$0xff] }
 0x10b   :  { %3721 = vtanh.f32 %v513_v13  ;;  %v5173_v49 = vsel %vm522_vm8, %v513_v13, 0.0  ;;  %v675_v1 = vadd.f32 %v3539_v3, %v669_v5  ;;  %v8252_v3 = vld [vmem:[#allocation36_spill] sm:$0xff] }
 0x10c   :  { %3723 = vtanh.f32 %v674_v6  ;;  %v8253_v5 = vld [vmem:[#allocation24_spill] sm:$0xff] }
 0x10d   :  { %v3545_v58 = vmul.f32 -1.442695, %v675_v1  ;;  %v8255_v1 = vld [vmem:[#allocation26_spill] sm:$0xff]  ;;  %v8256_v6 = vld [vmem:[#allocation40_spill] sm:$0xff] }
 0x10f   :  { %3725 = vpow2.f32 %v3545_v58  ;;  %v8257_v58 = vld [vmem:[#allocation28_spill] sm:$0xff] }
 0x114   :  { %v3716_v0 = vpop.eup %3715 }
 0x115   :  { %v3718_v47 = vpop.eup %3717  ;;  %v679_v51 = vadd.f32 1.0, %v3716_v0  ;;  %v8259_v0 = vld [vmem:[#allocation30_spill] sm:$0xff] }
 0x116   :  { %v3720_v45 = vpop.eup %3719 }
 0x117   :  { %3727 = vrcp.f32 %v679_v51  ;;  %v685_v13 = vadd.f32 1.0, %v3720_v45  ;;  %v8261_v45 = vld [vmem:[#allocation32_spill] sm:$0xff] }
 0x118   :  { %v3722_v56 = vpop.eup %3721 }
 0x119   :  { %v515_v61 = vmul.f32 %v3722_v56, %v3718_v47  ;;  %3729 = vrcp.f32 %v685_v13  ;;  %v8260_v47 = vld [vmem:[#allocation44_spill] sm:$0xff]  ;;  %v3724_v51 = vpop.eup %3723  ;;  %v8262_v13 = vld [vmem:[#allocation46_spill] sm:$0xff] }
 0x11b   :  { %v5182_v9 = vsel %vm522_vm8, %v515_v61, 0.0  ;;  %3590 = vmatmul.mubr.msk.f32.vlgmr.msra.gmra.mxu0 %vm522_vm8, %v515_v61  ;;  %3591 = vmatmul.mubr.msk.f32.vlgmr.msra.gmra.mxu1 %vm522_vm8, %v515_v61  ;;  %v8263_v61 = vld [vmem:[#allocation33_spill] sm:$0xff] }
 0x11c   :  { %901 = vmatpush1.msra.mxu0 %v8249_v8  ;;  %972 = vmatpush1.msra.mxu1 %v8250_v11  ;;  %v3726_v56 = vpop.eup %3725  ;;  %v8264_v8 = vld [vmem:[#allocation48_spill] sm:$0xff]  ;;  %v8275_v11 = vld [vmem:[#allocation45_spill] sm:$0xff] }
 0x11d   :  { %902 = vmatprep.subr.mxu0 %v8251_v55  ;;  %973 = vmatprep.subr.mxu1 %v8252_v3  ;;  %v8273_v3 = vld [vmem:[#allocation43_spill] sm:$0xff] }
 0x11e   :  { %903 = vmatpush1.msra.mxu0 %v8253_v5  ;;  %974 = vmatpush1.msra.mxu1 %v8254_v2  ;;  %v8265_v5 = vld [vmem:[#allocation35_spill] sm:$0xff] }
 0x11f   :  { %904 = vmatprep.subr.mxu0 %v8255_v1  ;;  %975 = vmatprep.subr.mxu1 %v8256_v6  ;;  %v8266_v1 = vld [vmem:[#allocation50_spill] sm:$0xff]  ;;  %v8269_v6 = vld [vmem:[#allocation39_spill] sm:$0xff] }
 0x120   :  { %905 = vmatpush1.msra.mxu0 %v8257_v58  ;;  %976 = vmatpush1.msra.mxu1 %v8258_v7  ;;  %v8267_v58 = vld [vmem:[#allocation37_spill] sm:$0xff]  ;;  %v692_v7 = vadd.f32 1.0, %v3726_v56 }
 0x121   :  { %906 = vmatprep.subr.mxu0 %v8259_v0  ;;  %977 = vmatprep.subr.mxu1 %v8260_v47  ;;  %v8268_v0 = vld [vmem:[#allocation52_spill] sm:$0xff]  ;;  %v8279_v56 = vld [vmem:[#allocation49_spill] sm:$0xff] }
 0x122   :  { %907 = vmatpush1.msra.mxu0 %v8261_v45  ;;  %978 = vmatpush1.msra.mxu1 %v8262_v13  ;;  %v8270_v45 = vld [vmem:[#allocation54_spill] sm:$0xff]  ;;  %3731 = vrcp.f32 %v692_v7  ;;  %v8285_v7 = vld [vmem:[#allocation55_spill] sm:$0xff] }
 0x123   :  { %908 = vmatprep.subr.mxu0 %v8263_v61  ;;  %979 = vmatprep.subr.mxu1 %v8264_v8  ;;  %v8271_v61 = vld [vmem:[#allocation41_spill] sm:$0xff]  ;;  %v8272_v8 = vld [vmem:[#allocation56_spill] sm:$0xff] }
 0x124   :  { %v3728_v55 = vpop.eup %3727  ;;  %909 = vmatpush1.msra.mxu0 %v8265_v5  ;;  %980 = vmatpush1.msra.mxu1 %v8266_v1  ;;  %v8274_v5 = vld [vmem:[#allocation58_spill] sm:$0xff]  ;;  %v705_v1 = vpop.permute.xlu0 %704 }
 0x125   :  { %910 = vmatprep.subr.mxu0 %v8267_v58  ;;  %981 = vmatprep.subr.mxu1 %v8268_v0  ;;  %v696_v2 = vmul.f32 %v3728_v55, %v3724_v51  ;;  %v8276_v0 = vld [vmem:[#allocation60_spill] sm:$0xff]  ;;  %vm706_vm9 = vcmp.eq.s32.totalorder %v705_v1, 1  ;;  %v8281_v55 = vld [vmem:[#allocation51_spill] sm:$0xff]  ;;  %v5275_v1 = vld [vmem:[%s7783_s3 + $0x1c8] sm:$0xff] }
 0x126   :  { %v3730_v47 = vpop.eup %3729  ;;  %911 = vmatpush1.msra.mxu0 %v8269_v6  ;;  %982 = vmatpush1.msra.mxu1 %v8270_v45  ;;  %v8277_v6 = vld [vmem:[#allocation47_spill] sm:$0xff] }
 0x127   :  { %v695_v13 = vmul.f32 0.0, %v3730_v47  ;;  %912 = vmatprep.subr.mxu0 %v8271_v61  ;;  %983 = vmatprep.subr.mxu1 %v8272_v8  ;;  %v8278_v47 = vld [vmem:[#allocation63_spill] sm:$0xff] }
 0x128   :  { %913 = vmatpush1.msra.mxu0 %v8273_v3  ;;  %984 = vmatpush1.msra.mxu1 %v8274_v5  ;;  %v8280_v3 = vld [vmem:[#allocation65_spill] sm:$0xff]  ;;  %v8286_v61 = vld [vmem:[#allocation71_spill] sm:$0xff] }
 0x129   :  { %v697_v58 = vadd.f32 %v696_v2, %v695_v13  ;;  %914 = vmatprep.subr.mxu0 %v8275_v11  ;;  %985 = vmatprep.subr.mxu1 %v8276_v0  ;;  %v8282_v2 = vld [vmem:[#allocation67_spill] sm:$0xff]  ;;  %v8283_v11 = vld [vmem:[#allocation53_spill] sm:$0xff] }
 0x12a   :  { %915 = vmatpush1.msra.mxu0 %v8277_v6  ;;  %986 = vmatpush1.msra.mxu1 %v8278_v47  ;;  %v8284_v13 = vld [vmem:[#allocation69_spill] sm:$0xff]  ;;  %v8289_v47 = vld [vmem:[#allocation59_spill] sm:$0xff] }
 0x12b   :  { %3733 = vtanh.f32 %v697_v58  ;;  %v5217_v51 = vsel %vm706_vm9, %v697_v58, 0.0  ;;  %916 = vmatprep.subr.mxu0 %v8279_v56  ;;  %987 = vmatprep.subr.mxu1 %v8280_v3  ;;  %v8287_v6 = vld [vmem:[#allocation57_spill] sm:$0xff]  ;;  %v8290_v56 = vld [vmem:[#allocation75_spill] sm:$0xff] }
 0x12c   :  { %917 = vmatpush1.msra.mxu0 %v8281_v55  ;;  %988 = vmatpush1.msra.mxu1 %v8282_v2  ;;  %v8288_v58 = vld [vmem:[#allocation73_spill] sm:$0xff]  ;;  %v8292_v55 = vld [vmem:[#allocation62_spill] sm:$0xff] }
 0x12d   :  { %918 = vmatprep.subr.mxu0 %v8283_v11  ;;  %989 = vmatprep.subr.mxu1 %v8284_v13  ;;  %v8291_v3 = vld [vmem:[#allocation61_spill] sm:$0xff]  ;;  %v8293_v11 = vld [vmem:[#allocation79_spill] sm:$0xff]  ;;  %v8294_v13 = vld [vmem:[#allocation64_spill] sm:$0xff] }
 0x12e   :  { %919 = vmatpush1.msra.mxu0 %v8285_v7  ;;  %990 = vmatpush1.msra.mxu1 %v8286_v61  ;;  %v8295_v7 = vld [vmem:[#allocation80_spill] sm:$0xff]  ;;  %v8296_v61 = vld [vmem:[#allocation66_spill] sm:$0xff] }
 0x12f   :  { %920 = vmatprep.subr.mxu0 %v8287_v6  ;;  %991 = vmatprep.subr.mxu1 %v8288_v58  ;;  %v8297_v6 = vld [vmem:[#allocation81_spill] sm:$0xff]  ;;  %v8298_v58 = vld [vmem:[#allocation68_spill] sm:$0xff] }
 0x130   :  { %921 = vmatpush1.msra.mxu0 %v8289_v47  ;;  %992 = vmatpush1.msra.mxu1 %v8290_v56  ;;  %v8299_v47 = vld [vmem:[#allocation82_spill] sm:$0xff] }
 0x131   :  { %922 = vmatprep.subr.mxu0 %v8291_v3  ;;  %993 = vmatprep.subr.mxu1 %v4979_v59  ;;  %v8300_v56 = vld [vmem:[#allocation70_spill] sm:$0xff]  ;;  %v3732_v59 = vpop.eup %3731 }
 0x132   :  { %923 = vmatpush1.msra.mxu0 %v8292_v55  ;;  %994 = vmatpush1.msra.mxu1 %v8293_v11  ;;  %v8301_v55 = vld [vmem:[#allocation72_spill] sm:$0xff]  ;;  %v8302_v11 = vld [vmem:[#allocation74_spill] sm:$0xff] }
 0x133   :  { %924 = vmatprep.subr.mxu0 %v8294_v13  ;;  %995 = vmatprep.subr.mxu1 %v8295_v7 }
 0x134   :  { %925 = vmatpush1.msra.mxu0 %v8296_v61  ;;  %996 = vmatpush1.msra.mxu1 %v8297_v6  ;;  %v8303_v61 = vld [vmem:[#allocation76_spill] sm:$0xff] }
 0x135   :  { %926 = vmatprep.subr.mxu0 %v8298_v58  ;;  %997 = vmatprep.subr.mxu1 %v8299_v47  ;;  %v8304_v47 = vld [vmem:[#allocation78_spill] sm:$0xff] }
 0x136   :  { %927 = vmatpush1.msra.mxu0 %v8300_v56  ;;  %998 = vmatpush1.msra.mxu1 %v5023_v60 }
 0x137   :  { %928 = vmatprep.subr.mxu0 %v8301_v55  ;;  %999 = vmatprep.subr.mxu1 %v5030_v53 }
 0x138   :  { %v3734_v13 = vpop.eup %3733  ;;  %929 = vmatpush1.msra.mxu0 %v8302_v11  ;;  %1000 = vmatpush1.msra.mxu1 %v5037_v62 }
 0x139   :  { %930 = vmatprep.subr.mxu0 %v8303_v61  ;;  %1001 = vmatprep.subr.mxu1 %v5044_v63  ;;  %v699_v58 = vmul.f32 %v3734_v13, %v3732_v59  ;;  %v5261_v63 = vld [vmem:[%s7783_s3 + $0x1e8] sm:$0xff]  ;;  %v5268_v59 = vld [vmem:[%s7783_s3 + $0x1e0] sm:$0xff] }
 0x13a   :  { %931 = vmatpush1.msra.mxu0 %v8304_v47  ;;  %964 = vmatprep.mubr.f32.mxu0 %v8173_v57 }
 0x13b   :  { %1002 = vmatpush1.msra.mxu1 %v5054_v4  ;;  %1035 = vmatprep.mubr.f32.mxu1 %v8173_v57  ;;  %v5254_v53 = vsel %vm706_vm9, %v699_v58, 0.0 }
 0x13c   :  { %3592 = vmatmul.mubr.msk.f32.vlgmr.msra.gmra.mxu0 %vm706_vm9, %v699_v58  ;;  %3593 = vmatmul.mubr.msk.f32.vlgmr.msra.gmra.mxu1 %vm706_vm9, %v699_v58 }
 0x13d   :  { %1086 = vmatprep.subr.mxu0 %v5261_v63  ;;  %1157 = vmatprep.subr.mxu1 %v4319_v10  ;;  %v5282_v10 = vld [vmem:[%s7783_s3 + $0x1c0] sm:$0xff] }
 0x13e   :  { %1087 = vmatpush1.msra.mxu0 %v5268_v59  ;;  %1158 = vmatpush1.msra.mxu1 %v4331_v12  ;;  %v5289_v12 = vld [vmem:[%s7783_s3 + $0x1a8] sm:$0xff] }
 0x13f   :  { %1088 = vmatprep.subr.mxu0 %v5275_v1  ;;  %1159 = vmatprep.subr.mxu1 %v4343_v14  ;;  %v5296_v14 = vld [vmem:[%s7783_s3 + $0x1a0] sm:$0xff] }
 0x140   :  { %1089 = vmatpush1.msra.mxu0 %v5282_v10  ;;  %1160 = vmatpush1.msra.mxu1 %v4348_v15  ;;  %v5303_v15 = vld [vmem:[%s7783_s3 + $0x188] sm:$0xff] }
 0x141   :  { %1090 = vmatprep.subr.mxu0 %v5289_v12  ;;  %1161 = vmatprep.subr.mxu1 %v4360_v17  ;;  %v5310_v17 = vld [vmem:[%s7783_s3 + $0x180] sm:$0xff] }
 0x142   :  { %1091 = vmatpush1.msra.mxu0 %v5296_v14  ;;  %1162 = vmatpush1.msra.mxu1 %v4372_v19  ;;  %v5317_v19 = vld [vmem:[%s7783_s3 + $0x168] sm:$0xff] }
 0x143   :  { %1092 = vmatprep.subr.mxu0 %v5303_v15  ;;  %1163 = vmatprep.subr.mxu1 %v4377_v20  ;;  %v5324_v20 = vld [vmem:[%s7783_s3 + $0x160] sm:$0xff] }
 0x144   :  { %1093 = vmatpush1.msra.mxu0 %v5310_v17  ;;  %1164 = vmatpush1.msra.mxu1 %v4389_v22  ;;  %v8308_v22 = vld [vmem:[#allocation16_spill] sm:$0xff] }
 0x145   :  { %1094 = vmatprep.subr.mxu0 %v5317_v19  ;;  %1165 = vmatprep.subr.mxu1 %v4401_v24  ;;  %v8310_v24 = vld [vmem:[#allocation18_spill] sm:$0xff] }
 0x146   :  { %1095 = vmatpush1.msra.mxu0 %v5324_v20  ;;  %1166 = vmatpush1.msra.mxu1 %v4413_v26  ;;  %v8312_v26 = vld [vmem:[#allocation21_spill] sm:$0xff] }
 0x147   :  { %1096 = vmatprep.subr.mxu0 %v4354_v16  ;;  %1167 = vmatprep.subr.mxu1 %v4425_v28  ;;  %v8305_v16 = vld [vmem:[#allocation8_spill] sm:$0xff]  ;;  %v8314_v28 = vld [vmem:[#allocation23_spill] sm:$0xff] }
 0x148   :  { %1097 = vmatpush1.msra.mxu0 %v4366_v18  ;;  %1168 = vmatpush1.msra.mxu1 %v4437_v30  ;;  %v8306_v18 = vld [vmem:[#allocation14_spill] sm:$0xff]  ;;  %v8316_v30 = vld [vmem:[#allocation25_spill] sm:$0xff] }
 0x149   :  { %1098 = vmatprep.subr.mxu0 %v4383_v21  ;;  %1169 = vmatprep.subr.mxu1 %v4449_v32  ;;  %v8307_v21 = vld [vmem:[#allocation9_spill] sm:$0xff]  ;;  %v8318_v32 = vld [vmem:[#allocation27_spill] sm:$0xff] }
 0x14a   :  { %1099 = vmatpush1.msra.mxu0 %v4395_v23  ;;  %1170 = vmatpush1.msra.mxu1 %v4461_v34  ;;  %v8309_v23 = vld [vmem:[#allocation10_spill] sm:$0xff]  ;;  %v8320_v34 = vld [vmem:[#allocation29_spill] sm:$0xff] }
 0x14b   :  { %1100 = vmatprep.subr.mxu0 %v4407_v25  ;;  %1171 = vmatprep.subr.mxu1 %v4473_v36  ;;  %v8311_v25 = vld [vmem:[#allocation11_spill] sm:$0xff] }
 0x14c   :  { %1101 = vmatpush1.msra.mxu0 %v4419_v27  ;;  %1172 = vmatpush1.msra.mxu1 %v4485_v38  ;;  %v8313_v27 = vld [vmem:[#allocation12_spill] sm:$0xff]  ;;  %v8322_v36 = vld [vmem:[#allocation31_spill] sm:$0xff] }
 0x14d   :  { %1102 = vmatprep.subr.mxu0 %v4431_v29  ;;  %1173 = vmatprep.subr.mxu1 %v4497_v40  ;;  %v8315_v29 = vld [vmem:[#allocation13_spill] sm:$0xff] }
 0x14e   :  { %1103 = vmatpush1.msra.mxu0 %v4443_v31  ;;  %1174 = vmatpush1.msra.mxu1 %v4509_v42  ;;  %v8317_v31 = vld [vmem:[#allocation15_spill] sm:$0xff] }
 0x14f   :  { %1104 = vmatprep.subr.mxu0 %v4455_v33  ;;  %1175 = vmatprep.subr.mxu1 %v4521_v44  ;;  %v8319_v33 = vld [vmem:[#allocation17_spill] sm:$0xff] }
 0x150   :  { %1105 = vmatpush1.msra.mxu0 %v4467_v35  ;;  %1176 = vmatpush1.msra.mxu1 %v4533_v46  ;;  %v8321_v35 = vld [vmem:[#allocation19_spill] sm:$0xff] }
 0x151   :  { %1106 = vmatprep.subr.mxu0 %v4479_v37  ;;  %1177 = vmatprep.subr.mxu1 %v4545_v48  ;;  %v35_v37 = vld [vmem:[%s7780_s0 + $0x40] sm:$0xff]  ;;  %v41_v48 = vld [vmem:[%s7780_s0 + $0x58] sm:$0xff] }
 0x152   :  { %1107 = vmatpush1.msra.mxu0 %v4491_v39  ;;  %1178 = vmatpush1.msra.mxu1 %v4557_v50  ;;  %v37_v39 = vld [vmem:[%s7780_s0 + $0x48] sm:$0xff] }
 0x153   :  { %1108 = vmatprep.subr.mxu0 %v4503_v41  ;;  %1179 = vmatprep.subr.mxu1 %v4569_v52 }
 0x154   :  { %1109 = vmatpush1.msra.mxu0 %v4515_v43  ;;  %1180 = vmatpush1.msra.mxu1 %v4581_v54  ;;  %v39_v54 = vld [vmem:[%s7780_s0 + $0x50] sm:$0xff] }
 0x155   :  { %1110 = vmatprep.subr.mxu0 %v8305_v16  ;;  %1181 = vmatprep.subr.mxu1 %v8306_v18 }
 0x156   :  { %1111 = vmatpush1.msra.mxu0 %v8307_v21  ;;  %1182 = vmatpush1.msra.mxu1 %v8308_v22 }
 0x157   :  { %1112 = vmatprep.subr.mxu0 %v8309_v23  ;;  %1183 = vmatprep.subr.mxu1 %v8310_v24  ;;  %v3532_v23 = vld [vmem:[%s7781_s1 + $0x1a0] sm:$0xff] }
 0x158   :  { %1113 = vmatpush1.msra.mxu0 %v8311_v25  ;;  %1184 = vmatpush1.msra.mxu1 %v8312_v26  ;;  %v3533_v26 = vld [vmem:[%s7781_s1 + $0x1a8] sm:$0xff] }
 0x159   :  { %1114 = vmatprep.subr.mxu0 %v8313_v27  ;;  %1185 = vmatprep.subr.mxu1 %v8314_v28 }
 0x15a   :  { %1115 = vmatpush1.msra.mxu0 %v8315_v29  ;;  %1186 = vmatpush1.msra.mxu1 %v8316_v30 }
 0x15b   :  { %1116 = vmatprep.subr.mxu0 %v8317_v31  ;;  %1187 = vmatprep.subr.mxu1 %v8318_v32 }
 0x15c   :  { %1117 = vmatpush1.msra.mxu0 %v8319_v33  ;;  %1150 = vmatprep.mubr.f32.mxu0 %v8173_v57 }
 0x15d   :  { %1188 = vmatpush1.msra.mxu1 %v8320_v34  ;;  %1221 = vmatprep.mubr.f32.mxu1 %v8173_v57 }
 0x15e   :  { %1270 = vmatprep.subr.mxu0 %v8321_v35  ;;  %1341 = vmatprep.subr.mxu1 %v8322_v36  ;;  %v891_v35 = vpop.permute.xlu1 %890 }
 0x15f   :  { %vm892_vm10 = vcmp.eq.s32.totalorder %v891_v35, 1 }
 0x1db   :  { %v782_v38 = vpop.f32.mrf.mxu0  ;;  %v853_v44 = vpop.f32.mrf.mxu1 }
 0x1dc   :  { %v858_v40 = vadd.f32 %v782_v38, %v35_v37  ;;  %v860_v16 = vadd.f32 %v853_v44, %v39_v54 }
 0x1dd   :  { %v784_v41 = vpop.f32.mrf.mxu0  ;;  %v855_v50 = vpop.f32.mrf.mxu1 }
 0x1de   :  { %v3546_v42 = vmul.f32 -1.442695, %v858_v40  ;;  %v859_v43 = vadd.f32 %v784_v41, %v37_v39  ;;  %v861_v52 = vadd.f32 %v855_v50, %v41_v48 }
 0x1e0   :  { %3735 = vpow2.f32 %v3546_v42  ;;  %v3547_v46 = vmul.f32 -1.442695, %v859_v43  ;;  %v3548_v13 = vmul.f32 -1.442695, %v861_v52  ;;  %v3535_v42 = vld [vmem:[%s7781_s1 + $0x1b8] sm:$0xff] }
 0x1e2   :  { %3737 = vpow2.f32 %v3547_v46  ;;  %v3534_v46 = vld [vmem:[%s7781_s1 + $0x1b0] sm:$0xff] }
 0x1e3   :  { %3739 = vpow2.f32 %v3548_v13 }
 0x1ed   :  { %v3736_v58 = vpop.eup %3735 }
 0x1ee   :  { %v865_v18 = vadd.f32 1.0, %v3736_v58 }
 0x1ef   :  { %v3738_v21 = vpop.eup %3737 }
 0x1f0   :  { %3741 = vrcp.f32 %v865_v18  ;;  %v871_v22 = vadd.f32 1.0, %v3738_v21  ;;  %v3740_v24 = vpop.eup %3739 }
 0x1f1   :  { %3743 = vtanh.f32 %v860_v16  ;;  %v878_v30 = vadd.f32 1.0, %v3740_v24  ;;  %v5421_v24 = vld [vmem:[%s7784_s4 + $0x1c8] sm:$0xff] }
 0x1f2   :  { %3745 = vrcp.f32 %v871_v22  ;;  %v5414_v22 = vld [vmem:[%s7784_s4 + $0x1e0] sm:$0xff] }
 0x1fc   :  { %v966_v25 = vpop.f32.mrf.mxu0  ;;  %v1037_v38 = vpop.f32.mrf.mxu1 }
 0x1fd   :  { %v3742_v27 = vpop.eup %3741  ;;  %v1042_v28 = vadd.f32 %v3532_v23, %v966_v25  ;;  %v1044_v52 = vadd.f32 %v3534_v46, %v1037_v38  ;;  %v8323_v23 = vld [vmem:[#allocation34_spill] sm:$0xff]  ;;  %v5428_v25 = vld [vmem:[%s7784_s4 + $0x1c0] sm:$0xff] }
 0x1fe   :  { %v3744_v29 = vpop.eup %3743  ;;  %v968_v31 = vpop.f32.mrf.mxu0 }
 0x1ff   :  { %v3746_v32 = vpop.eup %3745  ;;  %v3549_v33 = vmul.f32 -1.442695, %v1042_v28  ;;  %v1043_v34 = vadd.f32 %v3533_v26, %v968_v31  ;;  %v882_v37 = vmul.f32 %v3744_v29, %v3742_v27  ;;  %v1039_v43 = vpop.f32.mrf.mxu1  ;;  %v8325_v26 = vld [vmem:[#allocation38_spill] sm:$0xff]  ;;  %v5435_v27 = vld [vmem:[%s7784_s4 + $0x1a8] sm:$0xff]  ;;  %v8326_v28 = vld [vmem:[#allocation40_spill] sm:$0xff] }
 0x200   :  { %v881_v36 = vmul.f32 %v3746_v32, %v5173_v49  ;;  %v1045_v44 = vadd.f32 %v3535_v42, %v1039_v43  ;;  %v5442_v29 = vld [vmem:[%s7784_s4 + $0x1a0] sm:$0xff]  ;;  %v5449_v31 = vld [vmem:[%s7784_s4 + $0x188] sm:$0xff] }
 0x201   :  { %3747 = vpow2.f32 %v3549_v33  ;;  %v3550_v39 = vmul.f32 -1.442695, %v1043_v34  ;;  %v8328_v32 = vld [vmem:[#allocation44_spill] sm:$0xff]  ;;  %v8329_v34 = vld [vmem:[#allocation46_spill] sm:$0xff]  ;;  %v5477_v43 = vld [vmem:[%s7784_s4 + $0x148] sm:$0xff] }
 0x202   :  { %3749 = vrcp.f32 %v878_v30  ;;  %v883_v40 = vadd.f32 %v882_v37, %v881_v36  ;;  %v3551_v48 = vmul.f32 -1.442695, %v1045_v44  ;;  %v8327_v30 = vld [vmem:[#allocation42_spill] sm:$0xff]  ;;  %v5456_v33 = vld [vmem:[%s7784_s4 + $0x180] sm:$0xff]  ;;  %v5463_v36 = vld [vmem:[%s7784_s4 + $0x168] sm:$0xff] }
 0x203   :  { %3751 = vpow2.f32 %v3550_v39  ;;  %v8330_v37 = vld [vmem:[#allocation48_spill] sm:$0xff] }
 0x204   :  { %3753 = vtanh.f32 %v883_v40  ;;  %v5397_v41 = vsel %vm892_vm10, %v883_v40, %v5173_v49  ;;  %v5470_v39 = vld [vmem:[%s7784_s4 + $0x160] sm:$0xff]  ;;  %v8331_v40 = vld [vmem:[#allocation50_spill] sm:$0xff] }
 0x205   :  { %3755 = vpow2.f32 %v3551_v48  ;;  %v8332_v44 = vld [vmem:[#allocation52_spill] sm:$0xff] }
 0x20e   :  { %v3748_v50 = vpop.eup %3747 }
 0x20f   :  { %v3750_v54 = vpop.eup %3749  ;;  %v1049_v13 = vadd.f32 1.0, %v3748_v50  ;;  %v5484_v50 = vld [vmem:[%s7784_s4 + $0x140] sm:$0xff] }
 0x210   :  { %v3752_v58 = vpop.eup %3751 }
 0x211   :  { %v3754_v16 = vpop.eup %3753  ;;  %3757 = vrcp.f32 %v1049_v13  ;;  %v1055_v49 = vadd.f32 1.0, %v3752_v58  ;;  %v5492_v13 = vld [vmem:[%s7784_s4 + $0x128] sm:$0xff]  ;;  %v5499_v58 = vld [vmem:[%s7784_s4 + $0x120] sm:$0xff] }
 0x212   :  { %v885_v18 = vmul.f32 %v3754_v16, %v3750_v54  ;;  %3759 = vtanh.f32 %v1044_v52  ;;  %v3756_v35 = vpop.eup %3755 }
 0x213   :  { %3761 = vrcp.f32 %v1055_v49  ;;  %v1062_v48 = vadd.f32 1.0, %v3756_v35  ;;  %v5506_v49 = vld [vmem:[%s7784_s4 + $0x108] sm:$0xff]  ;;  %v8343_v35 = vld [vmem:[#allocation75_spill] sm:$0xff] }
 0x214   :  { %v5407_v21 = vsel %vm892_vm10, %v885_v18, %v5182_v9  ;;  %v8324_v9 = vld [vmem:[#allocation36_spill] sm:$0xff]  ;;  %v5520_v18 = vld [vmem:[%s7784_s4 + $0xe8] sm:$0xff] }
 0x215   :  { %1151 = vmatmul.mubr.f32.vlgmr.msra.gmra.mxu0 %v5407_v21  ;;  %1222 = vmatmul.mubr.f32.vlgmr.msra.gmra.mxu1 %v5407_v21  ;;  %3763 = vrcp.f32 %v1062_v48  ;;  %v8350_v48 = vld [vmem:[#allocation82_spill] sm:$0xff] }
 0x216   :  { %1271 = vmatpush1.msra.mxu0 %v5414_v22  ;;  %1342 = vmatpush1.msra.mxu1 %v8323_v23  ;;  %v8334_v23 = vld [vmem:[#allocation65_spill] sm:$0xff] }
 0x217   :  { %1272 = vmatprep.subr.mxu0 %v5421_v24  ;;  %1343 = vmatprep.subr.mxu1 %v8324_v9  ;;  %v5531_v9 = vld [vmem:[%s7784_s4 + $0xe0] sm:$0xff] }
 0x218   :  { %1273 = vmatpush1.msra.mxu0 %v5428_v25  ;;  %1344 = vmatpush1.msra.mxu1 %v8325_v26  ;;  %8335 = vst [vmem:[#allocation20_spill] sm:$0xff] %v5531_v9  ;;  %v5538_v26 = vld [vmem:[%s7784_s4 + $0xc8] sm:$0xff] }
 0x219   :  { %1274 = vmatprep.subr.mxu0 %v5435_v27  ;;  %1345 = vmatprep.subr.mxu1 %v8326_v28  ;;  %8336 = vst [vmem:[#allocation22_spill] sm:$0xff] %v5538_v26  ;;  %v8337_v28 = vld [vmem:[#allocation69_spill] sm:$0xff] }
 0x21a   :  { %1275 = vmatpush1.msra.mxu0 %v5442_v29  ;;  %1346 = vmatpush1.msra.mxu1 %v8327_v30  ;;  %v8339_v30 = vld [vmem:[#allocation71_spill] sm:$0xff] }
 0x21b   :  { %1276 = vmatprep.subr.mxu0 %v5449_v31  ;;  %1347 = vmatprep.subr.mxu1 %v8328_v32  ;;  %v8341_v32 = vld [vmem:[#allocation73_spill] sm:$0xff] }
 0x21c   :  { %1277 = vmatpush1.msra.mxu0 %v5456_v33  ;;  %1348 = vmatpush1.msra.mxu1 %v8329_v34  ;;  %v8342_v34 = vld [vmem:[#allocation59_spill] sm:$0xff] }
 0x21d   :  { %1278 = vmatprep.subr.mxu0 %v5463_v36  ;;  %1349 = vmatprep.subr.mxu1 %v8330_v37  ;;  %v8344_v37 = vld [vmem:[#allocation77_spill] sm:$0xff] }
 0x21e   :  { %v3758_v38 = vpop.eup %3757  ;;  %1279 = vmatpush1.msra.mxu0 %v5470_v39  ;;  %1350 = vmatpush1.msra.mxu1 %v8331_v40  ;;  %v8346_v40 = vld [vmem:[#allocation79_spill] sm:$0xff] }
 0x21f   :  { %v3760_v42 = vpop.eup %3759  ;;  %1280 = vmatprep.subr.mxu0 %v5477_v43  ;;  %1351 = vmatprep.subr.mxu1 %v8332_v44  ;;  %v8348_v44 = vld [vmem:[#allocation66_spill] sm:$0xff] }
 0x220   :  { %v3762_v46 = vpop.eup %3761  ;;  %1281 = vmatpush1.msra.mxu0 %v5484_v50  ;;  %1352 = vmatpush1.msra.mxu1 %v8270_v45  ;;  %v1066_v52 = vmul.f32 %v3760_v42, %v3758_v38  ;;  %v1075_v45 = vpop.permute.xlu1 %1074  ;;  %v8345_v38 = vld [vmem:[#allocation62_spill] sm:$0xff]  ;;  %v8347_v42 = vld [vmem:[#allocation64_spill] sm:$0xff] }
 0x221   :  { %v1065_v54 = vmul.f32 %v3762_v46, %v5217_v51  ;;  %1282 = vmatprep.subr.mxu0 %v5492_v13  ;;  %1353 = vmatprep.subr.mxu1 %v8272_v8  ;;  %vm1076_vm11 = vcmp.eq.s32.totalorder %v1075_v45, 1  ;;  %v5513_v8 = vld [vmem:[%s7784_s4 + $0x100] sm:$0xff]  ;;  %v5646_v45 = vld [vmem:[%s7783_s3 + $0x178] sm:$0xff] }
 0x222   :  { %1283 = vmatpush1.msra.mxu0 %v5499_v58  ;;  %1354 = vmatpush1.msra.mxu1 %v8274_v5  ;;  %v8333_v5 = vld [vmem:[#allocation63_spill] sm:$0xff]  ;;  %v8349_v46 = vld [vmem:[#allocation68_spill] sm:$0xff]  ;;  %8355 = vst [vmem:[#allocation32_spill] sm:$0xff] %v5646_v45 }
 0x223   :  { %v1067_v16 = vadd.f32 %v1066_v52, %v1065_v54  ;;  %1284 = vmatprep.subr.mxu0 %v5506_v49  ;;  %1355 = vmatprep.subr.mxu1 %v8276_v0  ;;  %v8351_v52 = vld [vmem:[#allocation83_spill] sm:$0xff] }
 0x224   :  { %1285 = vmatpush1.msra.mxu0 %v5513_v8  ;;  %1356 = vmatpush1.msra.mxu1 %v8333_v5  ;;  %v5659_v5 = vld [vmem:[%s7783_s3 + $0x148] sm:$0xff] }
 0x225   :  { %1286 = vmatprep.subr.mxu0 %v5520_v18  ;;  %1357 = vmatprep.subr.mxu1 %v8334_v23  ;;  %3765 = vtanh.f32 %v1067_v16  ;;  %v5526_v0 = vsel %vm1076_vm11, %v1067_v16, %v5217_v51  ;;  %v5545_v51 = vld [vmem:[%s7784_s4 + $0xc0] sm:$0xff]  ;;  %v5653_v16 = vld [vmem:[%s7783_s3 + $0x170] sm:$0xff]  ;;  %8357 = vst [vmem:[#allocation35_spill] sm:$0xff] %v5659_v5  ;;  %v5665_v23 = vld [vmem:[%s7783_s3 + $0x158] sm:$0xff] }
 0x226   :  { %1287 = vmatpush1.msra.mxu0 %v5531_v9  ;;  %1358 = vmatpush1.msra.mxu1 %v8282_v2  ;;  %8338 = vst [vmem:[#allocation24_spill] sm:$0xff] %v5545_v51  ;;  %v5552_v2 = vld [vmem:[%s7784_s4 + $0xa8] sm:$0xff]  ;;  %8356 = vst [vmem:[#allocation33_spill] sm:$0xff] %v5653_v16 }
 0x227   :  { %1288 = vmatprep.subr.mxu0 %v5538_v26  ;;  %1359 = vmatprep.subr.mxu1 %v8337_v28  ;;  %8340 = vst [vmem:[#allocation26_spill] sm:$0xff] %v5552_v2  ;;  %8358 = vst [vmem:[#allocation37_spill] sm:$0xff] %v5665_v23  ;;  %v5671_v28 = vld [vmem:[%s7783_s3 + $0x140] sm:$0xff] }
 0x228   :  { %1289 = vmatpush1.msra.mxu0 %v5545_v51  ;;  %1360 = vmatpush1.msra.mxu1 %v8339_v30  ;;  %8359 = vst [vmem:[#allocation39_spill] sm:$0xff] %v5671_v28  ;;  %v5677_v30 = vld [vmem:[%s7783_s3 + $0x150] sm:$0xff] }
 0x229   :  { %1290 = vmatprep.subr.mxu0 %v5552_v2  ;;  %1361 = vmatprep.subr.mxu1 %v8341_v32  ;;  %8360 = vst [vmem:[#allocation54_spill] sm:$0xff] %v5677_v30  ;;  %v5683_v32 = vld [vmem:[%s7783_s3 + $0x128] sm:$0xff] }
 0x22a   :  { %1291 = vmatpush1.msra.mxu0 %v8342_v34  ;;  %1362 = vmatpush1.msra.mxu1 %v8343_v35  ;;  %8361 = vst [vmem:[#allocation41_spill] sm:$0xff] %v5683_v32  ;;  %v5689_v34 = vld [vmem:[%s7783_s3 + $0x138] sm:$0xff]  ;;  %v5695_v35 = vld [vmem:[%s7783_s3 + $0x120] sm:$0xff] }
 0x22b   :  { %1292 = vmatprep.subr.mxu0 %v8291_v3  ;;  %1363 = vmatprep.subr.mxu1 %v8344_v37  ;;  %v3764_v3 = vpop.eup %3763  ;;  %8362 = vst [vmem:[#allocation56_spill] sm:$0xff] %v5689_v34  ;;  %8363 = vst [vmem:[#allocation43_spill] sm:$0xff] %v5695_v35  ;;  %v5701_v37 = vld [vmem:[%s7783_s3 + $0x130] sm:$0xff] }
 0x22c   :  { %1293 = vmatpush1.msra.mxu0 %v8345_v38  ;;  %1364 = vmatpush1.msra.mxu1 %v8346_v40  ;;  %8364 = vst [vmem:[#allocation58_spill] sm:$0xff] %v5701_v37  ;;  %v5707_v38 = vld [vmem:[%s7783_s3 + $0x108] sm:$0xff]  ;;  %v5713_v40 = vld [vmem:[%s7783_s3 + $0x118] sm:$0xff] }
 0x22d   :  { %1294 = vmatprep.subr.mxu0 %v8347_v42  ;;  %1365 = vmatprep.subr.mxu1 %v8295_v7  ;;  %v8352_v7 = vld [vmem:[#allocation84_spill] sm:$0xff]  ;;  %8365 = vst [vmem:[#allocation45_spill] sm:$0xff] %v5707_v38  ;;  %8366 = vst [vmem:[#allocation60_spill] sm:$0xff] %v5713_v40 }
 0x22e   :  { %1295 = vmatpush1.msra.mxu0 %v8348_v44  ;;  %1366 = vmatpush1.msra.mxu1 %v8297_v6  ;;  %v5719_v42 = vld [vmem:[%s7783_s3 + $0x100] sm:$0xff]  ;;  %v5725_v44 = vld [vmem:[%s7783_s3 + $0x110] sm:$0xff] }
 0x22f   :  { %1296 = vmatprep.subr.mxu0 %v8349_v46  ;;  %1367 = vmatprep.subr.mxu1 %v8350_v48  ;;  %8367 = vst [vmem:[#allocation47_spill] sm:$0xff] %v5719_v42  ;;  %8368 = vst [vmem:[#allocation49_spill] sm:$0xff] %v5725_v44  ;;  %v5731_v46 = vld [vmem:[%s7783_s3 + $0xe8] sm:$0xff]  ;;  %v5737_v48 = vld [vmem:[%s7783_s3 + $0xf8] sm:$0xff] }
 0x230   :  { %1297 = vmatpush1.msra.mxu0 %v8300_v56  ;;  %1368 = vmatpush1.msra.mxu1 %v5023_v60  ;;  %v5625_v56 = vld [vmem:[%s7783_s3 + $0x1b0] sm:$0xff]  ;;  %8369 = vst [vmem:[#allocation51_spill] sm:$0xff] %v5731_v46  ;;  %8370 = vst [vmem:[#allocation67_spill] sm:$0xff] %v5737_v48 }
 0x231   :  { %1298 = vmatprep.subr.mxu0 %v8301_v55  ;;  %1369 = vmatprep.subr.mxu1 %v8351_v52  ;;  %v5632_v55 = vld [vmem:[%s7783_s3 + $0x198] sm:$0xff]  ;;  %v5749_v52 = vld [vmem:[%s7783_s3 + $0xf0] sm:$0xff] }
 0x232   :  { %v3766_v54 = vpop.eup %3765  ;;  %1299 = vmatpush1.msra.mxu0 %v8302_v11  ;;  %1370 = vmatpush1.msra.mxu1 %v5037_v62  ;;  %v5590_v62 = vld [vmem:[%s7783_s3 + $0x1f8] sm:$0xff]  ;;  %8353 = vst [vmem:[#allocation28_spill] sm:$0xff] %v5632_v55  ;;  %v5639_v11 = vld [vmem:[%s7783_s3 + $0x190] sm:$0xff]  ;;  %8372 = vst [vmem:[#allocation55_spill] sm:$0xff] %v5749_v52 }
 0x233   :  { %1300 = vmatprep.subr.mxu0 %v8303_v61  ;;  %1371 = vmatprep.subr.mxu1 %v8352_v7  ;;  %v1069_v6 = vmul.f32 %v3766_v54, %v3764_v3  ;;  %v5618_v61 = vld [vmem:[%s7783_s3 + $0x1b8] sm:$0xff]  ;;  %8354 = vst [vmem:[#allocation30_spill] sm:$0xff] %v5639_v11  ;;  %v5743_v3 = vld [vmem:[%s7783_s3 + $0xe0] sm:$0xff]  ;;  %v5755_v54 = vld [vmem:[%s7783_s3 + $0xc8] sm:$0xff] }
 0x234   :  { %1301 = vmatpush1.msra.mxu0 %v8304_v47  ;;  %1334 = vmatprep.mubr.f32.mxu0 %v8173_v57  ;;  %v5611_v47 = vld [vmem:[%s7783_s3 + $0x1d0] sm:$0xff]  ;;  %8371 = vst [vmem:[#allocation53_spill] sm:$0xff] %v5743_v3  ;;  %8373 = vst [vmem:[#allocation57_spill] sm:$0xff] %v5755_v54  ;;  %v5761_v7 = vld [vmem:[%s7783_s3 + $0xd8] sm:$0xff] }
 0x235   :  { %1372 = vmatpush1.msra.mxu1 %v5054_v4  ;;  %1405 = vmatprep.mubr.f32.mxu1 %v8173_v57  ;;  %v5582_v60 = vsel %vm1076_vm11, %v1069_v6, %v5254_v53  ;;  %v5597_v4 = vld [vmem:[%s7783_s3 + $0x1f0] sm:$0xff]  ;;  %v5604_v53 = vld [vmem:[%s7783_s3 + $0x1d8] sm:$0xff]  ;;  %8374 = vst [vmem:[#allocation61_spill] sm:$0xff] %v5761_v7  ;;  %v5767_v6 = vld [vmem:[%s7783_s3 + $0xc0] sm:$0xff] }
 0x236   :  { %1335 = vmatmul.mubr.f32.vlgmr.msra.gmra.mxu0 %v5582_v60  ;;  %1406 = vmatmul.mubr.f32.vlgmr.msra.gmra.mxu1 %v5582_v60  ;;  %8375 = vst [vmem:[#allocation80_spill] sm:$0xff] %v5767_v6 }
 0x237   :  { %1456 = vmatprep.subr.mxu0 %v5261_v63  ;;  %1527 = vmatprep.subr.mxu1 %v5590_v62 }
 0x238   :  { %1457 = vmatpush1.msra.mxu0 %v5268_v59  ;;  %1528 = vmatpush1.msra.mxu1 %v5597_v4 }
 0x239   :  { %1458 = vmatprep.subr.mxu0 %v5275_v1  ;;  %1529 = vmatprep.subr.mxu1 %v5604_v53 }
 0x23a   :  { %1459 = vmatpush1.msra.mxu0 %v5282_v10  ;;  %1530 = vmatpush1.msra.mxu1 %v5611_v47 }
 0x23b   :  { %1460 = vmatprep.subr.mxu0 %v5289_v12  ;;  %1531 = vmatprep.subr.mxu1 %v5618_v61 }
 0x23c   :  { %1461 = vmatpush1.msra.mxu0 %v5296_v14  ;;  %1532 = vmatpush1.msra.mxu1 %v5625_v56 }
 0x23d   :  { %1462 = vmatprep.subr.mxu0 %v5303_v15  ;;  %1533 = vmatprep.subr.mxu1 %v5632_v55 }
 0x23e   :  { %1463 = vmatpush1.msra.mxu0 %v5310_v17  ;;  %1534 = vmatpush1.msra.mxu1 %v5639_v11 }
 0x23f   :  { %1464 = vmatprep.subr.mxu0 %v5317_v19  ;;  %1535 = vmatprep.subr.mxu1 %v5646_v45 }
 0x240   :  { %1465 = vmatpush1.msra.mxu0 %v5324_v20  ;;  %1536 = vmatpush1.msra.mxu1 %v5653_v16 }
 0x241   :  { %1466 = vmatprep.subr.mxu0 %v5659_v5  ;;  %1537 = vmatprep.subr.mxu1 %v5665_v23 }
 0x242   :  { %1467 = vmatpush1.msra.mxu0 %v5671_v28  ;;  %1538 = vmatpush1.msra.mxu1 %v5677_v30  ;;  %v1261_v28 = vpop.permute.xlu0 %1260 }
 0x243   :  { %1468 = vmatprep.subr.mxu0 %v5683_v32  ;;  %1539 = vmatprep.subr.mxu1 %v5689_v34  ;;  %vm1262_vm12 = vcmp.eq.s32.totalorder %v1261_v28, 1  ;;  %v5987_v28 = vld [vmem:[%s7784_s4 + $0x1d0] sm:$0xff] }
 0x244   :  { %1469 = vmatpush1.msra.mxu0 %v5695_v35  ;;  %1540 = vmatpush1.msra.mxu1 %v5701_v37  ;;  %v47_v35 = vld [vmem:[%s7780_s0 + $0x90] sm:$0xff] }
 0x245   :  { %1470 = vmatprep.subr.mxu0 %v5707_v38  ;;  %1541 = vmatprep.subr.mxu1 %v5713_v40 }
 0x246   :  { %1471 = vmatpush1.msra.mxu0 %v5719_v42  ;;  %1542 = vmatpush1.msra.mxu1 %v5725_v44 }
 0x247   :  { %1472 = vmatprep.subr.mxu0 %v5731_v46  ;;  %1543 = vmatprep.subr.mxu1 %v5737_v48 }
 0x248   :  { %1473 = vmatpush1.msra.mxu0 %v5743_v3  ;;  %1544 = vmatpush1.msra.mxu1 %v5749_v52  ;;  %v5773_v52 = vld [vmem:[%s7783_s3 + $0xd0] sm:$0xff]  ;;  %v45_v3 = vld [vmem:[%s7780_s0 + $0x88] sm:$0xff] }
 0x249   :  { %1474 = vmatprep.subr.mxu0 %v5755_v54  ;;  %1545 = vmatprep.subr.mxu1 %v5761_v7  ;;  %8376 = vst [vmem:[#allocation81_spill] sm:$0xff] %v5773_v52  ;;  %v5779_v54 = vld [vmem:[%s7783_s3 + $0xa8] sm:$0xff]  ;;  %v5785_v7 = vld [vmem:[%s7783_s3 + $0xb8] sm:$0xff] }
 0x24a   :  { %1475 = vmatpush1.msra.mxu0 %v5767_v6  ;;  %1546 = vmatpush1.msra.mxu1 %v5773_v52  ;;  %8377 = vst [vmem:[#allocation70_spill] sm:$0xff] %v5779_v54  ;;  %8378 = vst [vmem:[#allocation72_spill] sm:$0xff] %v5785_v7  ;;  %v5791_v6 = vld [vmem:[%s7783_s3 + $0xa0] sm:$0xff]  ;;  %v5797_v52 = vld [vmem:[%s7783_s3 + $0xb0] sm:$0xff] }
 0x24b   :  { %1476 = vmatprep.subr.mxu0 %v5779_v54  ;;  %1547 = vmatprep.subr.mxu1 %v5785_v7  ;;  %8379 = vst [vmem:[#allocation74_spill] sm:$0xff] %v5791_v6  ;;  %8380 = vst [vmem:[#allocation76_spill] sm:$0xff] %v5797_v52  ;;  %v5803_v54 = vld [vmem:[%s7783_s3 + $0x88] sm:$0xff]  ;;  %v5809_v7 = vld [vmem:[%s7783_s3 + $0x98] sm:$0xff] }
 0x24c   :  { %1477 = vmatpush1.msra.mxu0 %v5791_v6  ;;  %1548 = vmatpush1.msra.mxu1 %v5797_v52  ;;  %8381 = vst [vmem:[#allocation78_spill] sm:$0xff] %v5803_v54  ;;  %8382 = vst [vmem:[#allocation8_spill] sm:$0xff] %v5809_v7  ;;  %v5815_v6 = vld [vmem:[%s7783_s3 + $0x80] sm:$0xff]  ;;  %v5821_v52 = vld [vmem:[%s7783_s3 + $0x90] sm:$0xff] }
 0x24d   :  { %1478 = vmatprep.subr.mxu0 %v5803_v54  ;;  %1549 = vmatprep.subr.mxu1 %v5809_v7  ;;  %8383 = vst [vmem:[#allocation14_spill] sm:$0xff] %v5815_v6  ;;  %8384 = vst [vmem:[#allocation9_spill] sm:$0xff] %v5821_v52  ;;  %v5827_v54 = vld [vmem:[%s7783_s3 + $0x68] sm:$0xff]  ;;  %v5833_v7 = vld [vmem:[%s7783_s3 + $0x78] sm:$0xff] }
 0x24e   :  { %1479 = vmatpush1.msra.mxu0 %v5815_v6  ;;  %1550 = vmatpush1.msra.mxu1 %v5821_v52  ;;  %8385 = vst [vmem:[#allocation16_spill] sm:$0xff] %v5827_v54  ;;  %8386 = vst [vmem:[#allocation10_spill] sm:$0xff] %v5833_v7  ;;  %v5839_v6 = vld [vmem:[%s7783_s3 + $0x60] sm:$0xff]  ;;  %v5845_v52 = vld [vmem:[%s7783_s3 + $0x70] sm:$0xff] }
 0x24f   :  { %1480 = vmatprep.subr.mxu0 %v5827_v54  ;;  %1551 = vmatprep.subr.mxu1 %v5833_v7  ;;  %8387 = vst [vmem:[#allocation18_spill] sm:$0xff] %v5839_v6  ;;  %8388 = vst [vmem:[#allocation11_spill] sm:$0xff] %v5845_v52  ;;  %v5851_v54 = vld [vmem:[%s7783_s3 + $0x48] sm:$0xff]  ;;  %v5857_v7 = vld [vmem:[%s7783_s3 + $0x58] sm:$0xff] }
 0x250   :  { %1481 = vmatpush1.msra.mxu0 %v5839_v6  ;;  %1552 = vmatpush1.msra.mxu1 %v5845_v52  ;;  %8389 = vst [vmem:[#allocation21_spill] sm:$0xff] %v5851_v54  ;;  %8390 = vst [vmem:[#allocation12_spill] sm:$0xff] %v5857_v7  ;;  %v5863_v6 = vld [vmem:[%s7783_s3 + $0x40] sm:$0xff]  ;;  %v5869_v52 = vld [vmem:[%s7783_s3 + $0x50] sm:$0xff] }
 0x251   :  { %1482 = vmatprep.subr.mxu0 %v5851_v54  ;;  %1553 = vmatprep.subr.mxu1 %v5857_v7  ;;  %8391 = vst [vmem:[#allocation23_spill] sm:$0xff] %v5863_v6  ;;  %8392 = vst [vmem:[#allocation13_spill] sm:$0xff] %v5869_v52  ;;  %v5875_v54 = vld [vmem:[%s7783_s3 + $0x28] sm:$0xff]  ;;  %v5881_v7 = vld [vmem:[%s7783_s3 + $0x38] sm:$0xff] }
 0x252   :  { %1483 = vmatpush1.msra.mxu0 %v5863_v6  ;;  %1554 = vmatpush1.msra.mxu1 %v5869_v52  ;;  %8393 = vst [vmem:[#allocation25_spill] sm:$0xff] %v5875_v54  ;;  %8394 = vst [vmem:[#allocation15_spill] sm:$0xff] %v5881_v7  ;;  %v5887_v6 = vld [vmem:[%s7783_s3 + $0x20] sm:$0xff]  ;;  %v5893_v52 = vld [vmem:[%s7783_s3 + $0x30] sm:$0xff] }
 0x253   :  { %1484 = vmatprep.subr.mxu0 %v5875_v54  ;;  %1555 = vmatprep.subr.mxu1 %v5881_v7  ;;  %8395 = vst [vmem:[#allocation27_spill] sm:$0xff] %v5887_v6  ;;  %8396 = vst [vmem:[#allocation17_spill] sm:$0xff] %v5893_v52  ;;  %v5899_v54 = vld [vmem:[%s7783_s3 + $0x8] sm:$0xff]  ;;  %v5905_v7 = vld [vmem:[%s7783_s3 + $0x18] sm:$0xff] }
 0x254   :  { %1485 = vmatpush1.msra.mxu0 %v5887_v6  ;;  %1556 = vmatpush1.msra.mxu1 %v5893_v52  ;;  %8397 = vst [vmem:[#allocation29_spill] sm:$0xff] %v5899_v54  ;;  %8398 = vst [vmem:[#allocation19_spill] sm:$0xff] %v5905_v7  ;;  %v5911_v6 = vld [vmem:[%s7783_s3] sm:$0xff] }
 0x255   :  { %1486 = vmatprep.subr.mxu0 %v5899_v54  ;;  %1557 = vmatprep.subr.mxu1 %v5905_v7  ;;  %8399 = vst [vmem:[#allocation31_spill] sm:$0xff] %v5911_v6  ;;  %v5918_v54 = vld [vmem:[%s7783_s3 + $0x10] sm:$0xff]  ;;  %v5925_v7 = vld [vmem:[%s7784_s4 + $0x1e8] sm:$0xff] }
 0x256   :  { %1487 = vmatpush1.msra.mxu0 %v5911_v6  ;;  %1520 = vmatprep.mubr.f32.mxu0 %v8173_v57  ;;  %8400 = vst [vmem:[#allocation34_spill] sm:$0xff] %v5918_v54  ;;  %8401 = vst [vmem:[#allocation36_spill] sm:$0xff] %v5925_v7  ;;  %v5931_v6 = vld [vmem:[%s7784_s4 + $0x1f8] sm:$0xff] }
 0x257   :  { %1558 = vmatpush1.msra.mxu1 %v5918_v54  ;;  %1591 = vmatprep.mubr.f32.mxu1 %v8173_v57  ;;  %8402 = vst [vmem:[#allocation38_spill] sm:$0xff] %v5931_v6  ;;  %v43_v54 = vld [vmem:[%s7780_s0 + $0x80] sm:$0xff] }
 0x258   :  { %1640 = vmatprep.subr.mxu0 %v5925_v7  ;;  %1711 = vmatprep.subr.mxu1 %v5931_v6  ;;  %v49_v6 = vld [vmem:[%s7780_s0 + $0x98] sm:$0xff] }
 0x2d5   :  { %v1152_v52 = vpop.f32.mrf.mxu0  ;;  %v1223_v42 = vpop.f32.mrf.mxu1 }
 0x2d6   :  { %v1228_v48 = vadd.f32 %v1152_v52, %v43_v54  ;;  %v1230_v52 = vadd.f32 %v1223_v42, %v47_v35 }
 0x2d7   :  { %v1154_v46 = vpop.f32.mrf.mxu0  ;;  %v1225_v38 = vpop.f32.mrf.mxu1 }
 0x2d8   :  { %v3552_v44 = vmul.f32 -1.442695, %v1228_v48  ;;  %v1229_v7 = vadd.f32 %v1154_v46, %v45_v3  ;;  %v1231_v37 = vadd.f32 %v1225_v38, %v49_v6  ;;  %v3529_v3 = vld [vmem:[%s7781_s1 + $0x168] sm:$0xff] }
 0x2da   :  { %3767 = vpow2.f32 %v3552_v44  ;;  %v3553_v40 = vmul.f32 -1.442695, %v1229_v7  ;;  %v3554_v34 = vmul.f32 -1.442695, %v1231_v37 }
 0x2dc   :  { %3769 = vpow2.f32 %v3553_v40  ;;  %v3528_v40 = vld [vmem:[%s7781_s1 + $0x160] sm:$0xff] }
 0x2dd   :  { %3771 = vpow2.f32 %v3554_v34 }
 0x2e7   :  { %v3768_v32 = vpop.eup %3767 }
 0x2e8   :  { %v1235_v54 = vadd.f32 1.0, %v3768_v32 }
 0x2e9   :  { %v3770_v48 = vpop.eup %3769 }
 0x2ea   :  { %3773 = vrcp.f32 %v1235_v54  ;;  %v1241_v44 = vadd.f32 1.0, %v3770_v48  ;;  %v3772_v46 = vpop.eup %3771 }
 0x2eb   :  { %3775 = vtanh.f32 %v1230_v52  ;;  %v1248_v48 = vadd.f32 1.0, %v3772_v46  ;;  %v3530_v46 = vld [vmem:[%s7781_s1 + $0x170] sm:$0xff] }
 0x2ec   :  { %3777 = vrcp.f32 %v1241_v44 }
 0x2f6   :  { %v1336_v38 = vpop.f32.mrf.mxu0  ;;  %v1407_v44 = vpop.f32.mrf.mxu1 }
 0x2f7   :  { %v3774_v37 = vpop.eup %3773  ;;  %v1412_v7 = vadd.f32 %v3528_v40, %v1336_v38  ;;  %v3531_v38 = vld [vmem:[%s7781_s1 + $0x178] sm:$0xff] }
 0x2f8   :  { %v3776_v35 = vpop.eup %3775  ;;  %v1338_v32 = vpop.f32.mrf.mxu0 }
 0x2f9   :  { %v3778_v42 = vpop.eup %3777  ;;  %v3555_v34 = vmul.f32 -1.442695, %v1412_v7  ;;  %v1413_v6 = vadd.f32 %v3529_v3, %v1338_v32  ;;  %v1252_v54 = vmul.f32 %v3776_v35, %v3774_v37  ;;  %v1409_v3 = vpop.f32.mrf.mxu1  ;;  %v1414_v32 = vadd.f32 %v3530_v46, %v1407_v44  ;;  %v6001_v44 = vld [vmem:[%s7784_s4 + $0x1b0] sm:$0xff] }
 0x2fa   :  { %v1251_v52 = vmul.f32 %v3778_v42, %v5397_v41  ;;  %v1415_v37 = vadd.f32 %v3531_v38, %v1409_v3  ;;  %v6008_v38 = vld [vmem:[%s7784_s4 + $0x198] sm:$0xff] }
 0x2fb   :  { %3779 = vpow2.f32 %v3555_v34  ;;  %v3556_v30 = vmul.f32 -1.442695, %v1413_v6 }
 0x2fc   :  { %v1253_v23 = vadd.f32 %v1252_v54, %v1251_v52  ;;  %v3557_v7 = vmul.f32 -1.442695, %v1415_v37  ;;  %v5973_v52 = vld [vmem:[%s7784_s4 + $0x1f0] sm:$0xff] }
 0x2fd   :  { %3781 = vpow2.f32 %v3556_v30  ;;  %v6015_v37 = vld [vmem:[%s7784_s4 + $0x190] sm:$0xff] }
 0x2fe   :  { %3783 = vrcp.f32 %v1248_v48  ;;  %v5955_v40 = vsel %vm1262_vm12, %v1253_v23, %v5397_v41  ;;  %v5994_v48 = vld [vmem:[%s7784_s4 + $0x1b8] sm:$0xff] }
 0x2ff   :  { %3785 = vtanh.f32 %v1253_v23 }
 0x300   :  { %3787 = vpow2.f32 %v3557_v7  ;;  %v6022_v7 = vld [vmem:[%s7784_s4 + $0x178] sm:$0xff] }
 0x308   :  { %v3780_v35 = vpop.eup %3779 }
 0x309   :  { %v1419_v30 = vadd.f32 1.0, %v3780_v35 }
 0x30a   :  { %v3782_v42 = vpop.eup %3781 }
 0x30b   :  { %v3784_v34 = vpop.eup %3783  ;;  %3789 = vrcp.f32 %v1419_v30  ;;  %v1425_v41 = vadd.f32 1.0, %v3782_v42 }
 0x30c   :  { %v3786_v6 = vpop.eup %3785  ;;  %3791 = vtanh.f32 %v1414_v32  ;;  %v6029_v32 = vld [vmem:[%s7784_s4 + $0x170] sm:$0xff] }
 0x30d   :  { %3793 = vrcp.f32 %v1425_v41  ;;  %v1255_v54 = vmul.f32 %v3786_v6, %v3784_v34  ;;  %v3788_v3 = vpop.eup %3787  ;;  %v6036_v34 = vld [vmem:[%s7784_s4 + $0x158] sm:$0xff] }
 0x30e   :  { %v1432_v42 = vadd.f32 1.0, %v3788_v3  ;;  %v6051_v3 = vld [vmem:[%s7784_s4 + $0x138] sm:$0xff] }
 0x30f   :  { %v5965_v23 = vsel %vm1262_vm12, %v1255_v54, %v5407_v21  ;;  %v5980_v21 = vld [vmem:[%s7784_s4 + $0x1d8] sm:$0xff]  ;;  %v6044_v54 = vld [vmem:[%s7784_s4 + $0x150] sm:$0xff]  ;;  %8403 = vst [vmem:[#allocation40_spill] sm:$0xff] %v6051_v3 }
 0x310   :  { %1521 = vmatmul.mubr.f32.vlgmr.msra.gmra.mxu0 %v5965_v23  ;;  %1592 = vmatmul.mubr.f32.vlgmr.msra.gmra.mxu1 %v5965_v23  ;;  %3795 = vrcp.f32 %v1432_v42 }
 0x311   :  { %1641 = vmatpush1.msra.mxu0 %v5414_v22  ;;  %1712 = vmatpush1.msra.mxu1 %v5973_v52 }
 0x312   :  { %1642 = vmatprep.subr.mxu0 %v5421_v24  ;;  %1713 = vmatprep.subr.mxu1 %v5980_v21 }
 0x313   :  { %1643 = vmatpush1.msra.mxu0 %v5428_v25  ;;  %1714 = vmatpush1.msra.mxu1 %v5987_v28 }
 0x314   :  { %1644 = vmatprep.subr.mxu0 %v5435_v27  ;;  %1715 = vmatprep.subr.mxu1 %v5994_v48 }
 0x315   :  { %1645 = vmatpush1.msra.mxu0 %v5442_v29  ;;  %1716 = vmatpush1.msra.mxu1 %v6001_v44 }
 0x316   :  { %1646 = vmatprep.subr.mxu0 %v5449_v31  ;;  %1717 = vmatprep.subr.mxu1 %v6008_v38 }
 0x317   :  { %1647 = vmatpush1.msra.mxu0 %v5456_v33  ;;  %1718 = vmatpush1.msra.mxu1 %v6015_v37 }
 0x318   :  { %v3790_v46 = vpop.eup %3789  ;;  %1648 = vmatprep.subr.mxu0 %v5463_v36  ;;  %1719 = vmatprep.subr.mxu1 %v6022_v7 }
 0x319   :  { %v3792_v35 = vpop.eup %3791  ;;  %1649 = vmatpush1.msra.mxu0 %v5470_v39  ;;  %1720 = vmatpush1.msra.mxu1 %v6029_v32 }
 0x31a   :  { %v3794_v30 = vpop.eup %3793  ;;  %1650 = vmatprep.subr.mxu0 %v5477_v43  ;;  %1721 = vmatprep.subr.mxu1 %v6036_v34  ;;  %v1436_v41 = vmul.f32 %v3792_v35, %v3790_v46  ;;  %v6054_v46 = vpop.permute.xlu1 %1444 }
 0x31b   :  { %v1435_v6 = vmul.f32 %v3794_v30, %v5526_v0  ;;  %1651 = vmatpush1.msra.mxu0 %v5484_v50  ;;  %1722 = vmatpush1.msra.mxu1 %v6044_v54  ;;  %v6060_v30 = vld [vmem:[%s7784_s4 + $0x130] sm:$0xff]  ;;  %vm1446_vm13 = vcmp.eq.s32.totalorder %v6054_v46, 1  ;;  %v8439_v46 = vld [vmem:[#allocation67_spill] sm:$0xff] }
 0x31c   :  { %1652 = vmatprep.subr.mxu0 %v5492_v13  ;;  %1723 = vmatprep.subr.mxu1 %v6051_v3  ;;  %v6068_v3 = vld [vmem:[%s7784_s4 + $0x118] sm:$0xff] }
 0x31d   :  { %v1437_v35 = vadd.f32 %v1436_v41, %v1435_v6  ;;  %1653 = vmatpush1.msra.mxu0 %v5499_v58  ;;  %1724 = vmatpush1.msra.mxu1 %v6060_v30  ;;  %v6075_v41 = vld [vmem:[%s7784_s4 + $0x110] sm:$0xff]  ;;  %v6087_v6 = vld [vmem:[%s7784_s4 + $0xf8] sm:$0xff] }
 0x31e   :  { %1654 = vmatprep.subr.mxu0 %v5506_v49  ;;  %1725 = vmatprep.subr.mxu1 %v6068_v3  ;;  %8404 = vst [vmem:[#allocation42_spill] sm:$0xff] %v6075_v41 }
 0x31f   :  { %1655 = vmatpush1.msra.mxu0 %v5513_v8  ;;  %1726 = vmatpush1.msra.mxu1 %v6075_v41  ;;  %3797 = vtanh.f32 %v1437_v35  ;;  %v6081_v42 = vsel %vm1446_vm13, %v1437_v35, %v5526_v0  ;;  %v6094_v41 = vld [vmem:[%s7784_s4 + $0xf0] sm:$0xff]  ;;  %v6101_v0 = vld [vmem:[%s7784_s4 + $0xd8] sm:$0xff] }
 0x320   :  { %1656 = vmatprep.subr.mxu0 %v5520_v18  ;;  %1727 = vmatprep.subr.mxu1 %v6087_v6  ;;  %8405 = vst [vmem:[#allocation44_spill] sm:$0xff] %v6094_v41  ;;  %8406 = vst [vmem:[#allocation46_spill] sm:$0xff] %v6101_v0  ;;  %v6108_v35 = vld [vmem:[%s7784_s4 + $0xd0] sm:$0xff] }
 0x321   :  { %1657 = vmatpush1.msra.mxu0 %v5531_v9  ;;  %1728 = vmatpush1.msra.mxu1 %v6094_v41  ;;  %8407 = vst [vmem:[#allocation48_spill] sm:$0xff] %v6108_v35  ;;  %v6211_v41 = vld [vmem:[%s7784_s4 + $0x38] sm:$0xff]  ;;  %v6229_v9 = vld [vmem:[%s7784_s4 + $0x8] sm:$0xff] }
 0x322   :  { %1658 = vmatprep.subr.mxu0 %v5538_v26  ;;  %1729 = vmatprep.subr.mxu1 %v6101_v0  ;;  %v6115_v26 = vld [vmem:[%s7784_s4 + $0xb8] sm:$0xff]  ;;  %v6193_v0 = vld [vmem:[%s7784_s4 + $0x40] sm:$0xff]  ;;  %8424 = vst [vmem:[#allocation83_spill] sm:$0xff] %v6211_v41 }
 0x323   :  { %1659 = vmatpush1.msra.mxu0 %v5545_v51  ;;  %1730 = vmatpush1.msra.mxu1 %v6108_v35  ;;  %8408 = vst [vmem:[#allocation50_spill] sm:$0xff] %v6115_v26  ;;  %v6121_v51 = vld [vmem:[%s7784_s4 + $0xa0] sm:$0xff]  ;;  %v6127_v35 = vld [vmem:[%s7784_s4 + $0xb0] sm:$0xff]  ;;  %8421 = vst [vmem:[#allocation66_spill] sm:$0xff] %v6193_v0 }
 0x324   :  { %1660 = vmatprep.subr.mxu0 %v5552_v2  ;;  %1731 = vmatprep.subr.mxu1 %v6115_v26  ;;  %8409 = vst [vmem:[#allocation52_spill] sm:$0xff] %v6121_v51  ;;  %8410 = vst [vmem:[#allocation63_spill] sm:$0xff] %v6127_v35  ;;  %v6133_v2 = vld [vmem:[%s7784_s4 + $0x88] sm:$0xff]  ;;  %v6139_v26 = vld [vmem:[%s7784_s4 + $0x98] sm:$0xff] }
 0x325   :  { %1661 = vmatpush1.msra.mxu0 %v6121_v51  ;;  %1732 = vmatpush1.msra.mxu1 %v6127_v35  ;;  %8411 = vst [vmem:[#allocation65_spill] sm:$0xff] %v6133_v2  ;;  %8412 = vst [vmem:[#allocation69_spill] sm:$0xff] %v6139_v26  ;;  %v6145_v51 = vld [vmem:[%s7784_s4 + $0x80] sm:$0xff]  ;;  %v6151_v35 = vld [vmem:[%s7784_s4 + $0x90] sm:$0xff] }
 0x326   :  { %1662 = vmatprep.subr.mxu0 %v6133_v2  ;;  %1733 = vmatprep.subr.mxu1 %v6139_v26  ;;  %8413 = vst [vmem:[#allocation71_spill] sm:$0xff] %v6145_v51  ;;  %8414 = vst [vmem:[#allocation73_spill] sm:$0xff] %v6151_v35  ;;  %v6157_v2 = vld [vmem:[%s7784_s4 + $0x68] sm:$0xff]  ;;  %v6163_v26 = vld [vmem:[%s7784_s4 + $0x78] sm:$0xff] }
 0x327   :  { %1663 = vmatpush1.msra.mxu0 %v6145_v51  ;;  %1734 = vmatpush1.msra.mxu1 %v6151_v35  ;;  %8415 = vst [vmem:[#allocation59_spill] sm:$0xff] %v6157_v2  ;;  %8416 = vst [vmem:[#allocation75_spill] sm:$0xff] %v6163_v26  ;;  %v6169_v51 = vld [vmem:[%s7784_s4 + $0x60] sm:$0xff]  ;;  %v6175_v35 = vld [vmem:[%s7784_s4 + $0x70] sm:$0xff] }
 0x328   :  { %1664 = vmatprep.subr.mxu0 %v6157_v2  ;;  %1735 = vmatprep.subr.mxu1 %v6163_v26  ;;  %8417 = vst [vmem:[#allocation77_spill] sm:$0xff] %v6169_v51  ;;  %8418 = vst [vmem:[#allocation62_spill] sm:$0xff] %v6175_v35  ;;  %v6181_v2 = vld [vmem:[%s7784_s4 + $0x48] sm:$0xff]  ;;  %v6187_v26 = vld [vmem:[%s7784_s4 + $0x58] sm:$0xff] }
 0x329   :  { %1665 = vmatpush1.msra.mxu0 %v6169_v51  ;;  %1736 = vmatpush1.msra.mxu1 %v6175_v35  ;;  %8419 = vst [vmem:[#allocation79_spill] sm:$0xff] %v6181_v2  ;;  %8420 = vst [vmem:[#allocation64_spill] sm:$0xff] %v6187_v26  ;;  %v3796_v51 = vpop.eup %3795  ;;  %v6199_v35 = vld [vmem:[%s7784_s4 + $0x50] sm:$0xff] }
 0x32a   :  { %1666 = vmatprep.subr.mxu0 %v6181_v2  ;;  %1737 = vmatprep.subr.mxu1 %v6187_v26  ;;  %8422 = vst [vmem:[#allocation68_spill] sm:$0xff] %v6199_v35  ;;  %v6205_v26 = vld [vmem:[%s7784_s4 + $0x28] sm:$0xff] }
 0x32b   :  { %1667 = vmatpush1.msra.mxu0 %v6193_v0  ;;  %1738 = vmatpush1.msra.mxu1 %v6199_v35  ;;  %8423 = vst [vmem:[#allocation82_spill] sm:$0xff] %v6205_v26  ;;  %v6217_v0 = vld [vmem:[%s7784_s4 + $0x20] sm:$0xff]  ;;  %v6223_v35 = vld [vmem:[%s7784_s4 + $0x30] sm:$0xff] }
 0x32c   :  { %v3798_v2 = vpop.eup %3797  ;;  %1668 = vmatprep.subr.mxu0 %v6205_v26  ;;  %1739 = vmatprep.subr.mxu1 %v6211_v41  ;;  %8425 = vst [vmem:[#allocation84_spill] sm:$0xff] %v6217_v0  ;;  %v6235_v41 = vld [vmem:[%s7784_s4 + $0x18] sm:$0xff] }
 0x32d   :  { %1669 = vmatpush1.msra.mxu0 %v6217_v0  ;;  %1740 = vmatpush1.msra.mxu1 %v6223_v35  ;;  %v1439_v26 = vmul.f32 %v3798_v2, %v3796_v51  ;;  %v6241_v0 = vld [vmem:[%s7784_s4] sm:$0xff]  ;;  %v6253_v2 = vld [vmem:[%s7784_s4 + $0x10] sm:$0xff] }
 0x32e   :  { %1670 = vmatprep.subr.mxu0 %v6229_v9  ;;  %1741 = vmatprep.subr.mxu1 %v6235_v41  ;;  %8426 = vst [vmem:[#allocation85_spill] sm:$0xff] %v6253_v2 }
 0x32f   :  { %1671 = vmatpush1.msra.mxu0 %v6241_v0  ;;  %1704 = vmatprep.mubr.f32.mxu0 %v8173_v57  ;;  %v6248_v51 = vsel %vm1446_vm13, %v1439_v26, %v5582_v60  ;;  %v8437_v26 = vld [vmem:[#allocation49_spill] sm:$0xff]  ;;  %v8438_v60 = vld [vmem:[#allocation51_spill] sm:$0xff] }
 0x330   :  { %1742 = vmatpush1.msra.mxu1 %v6253_v2  ;;  %1775 = vmatprep.mubr.f32.mxu1 %v8173_v57 }
 0x331   :  { %1705 = vmatmul.mubr.f32.vlgmr.msra.gmra.mxu0 %v6248_v51  ;;  %1776 = vmatmul.mubr.f32.vlgmr.msra.gmra.mxu1 %v6248_v51 }
 0x332   :  { %1826 = vmatprep.subr.mxu0 %v5261_v63  ;;  %1897 = vmatprep.subr.mxu1 %v5590_v62  ;;  %v8427_v63 = vld [vmem:[#allocation37_spill] sm:$0xff] }
 0x333   :  { %1827 = vmatpush1.msra.mxu0 %v5268_v59  ;;  %1898 = vmatpush1.msra.mxu1 %v5597_v4  ;;  %v8428_v59 = vld [vmem:[#allocation39_spill] sm:$0xff] }
 0x334   :  { %1828 = vmatprep.subr.mxu0 %v5275_v1  ;;  %1899 = vmatprep.subr.mxu1 %v5604_v53  ;;  %v8429_v1 = vld [vmem:[#allocation54_spill] sm:$0xff] }
 0x335   :  { %1829 = vmatpush1.msra.mxu0 %v5282_v10  ;;  %1900 = vmatpush1.msra.mxu1 %v5611_v47  ;;  %v8430_v10 = vld [vmem:[#allocation41_spill] sm:$0xff] }
 0x336   :  { %1830 = vmatprep.subr.mxu0 %v5289_v12  ;;  %1901 = vmatprep.subr.mxu1 %v5618_v61  ;;  %v8431_v12 = vld [vmem:[#allocation56_spill] sm:$0xff] }
 0x337   :  { %1831 = vmatpush1.msra.mxu0 %v5296_v14  ;;  %1902 = vmatpush1.msra.mxu1 %v5625_v56  ;;  %v8432_v14 = vld [vmem:[#allocation43_spill] sm:$0xff] }
 0x338   :  { %1832 = vmatprep.subr.mxu0 %v5303_v15  ;;  %1903 = vmatprep.subr.mxu1 %v5632_v55  ;;  %v8433_v15 = vld [vmem:[#allocation58_spill] sm:$0xff] }
 0x339   :  { %1833 = vmatpush1.msra.mxu0 %v5310_v17  ;;  %1904 = vmatpush1.msra.mxu1 %v5639_v11  ;;  %v8434_v17 = vld [vmem:[#allocation45_spill] sm:$0xff]  ;;  %v1631_v11 = vpop.permute.xlu0 %1630 }
 0x33a   :  { %1834 = vmatprep.subr.mxu0 %v5317_v19  ;;  %1905 = vmatprep.subr.mxu1 %v5646_v45  ;;  %v8435_v19 = vld [vmem:[#allocation60_spill] sm:$0xff]  ;;  %vm1632_vm14 = vcmp.eq.s32.totalorder %v1631_v11, 1 }
 0x33b   :  { %1835 = vmatpush1.msra.mxu0 %v5324_v20  ;;  %1906 = vmatpush1.msra.mxu1 %v5653_v16  ;;  %v8436_v20 = vld [vmem:[#allocation47_spill] sm:$0xff] }
 0x33c   :  { %1836 = vmatprep.subr.mxu0 %v5659_v5  ;;  %1907 = vmatprep.subr.mxu1 %v8427_v63  ;;  %v55_v63 = vld [vmem:[%s7780_s0 + $0xd0] sm:$0xff] }
 0x33d   :  { %1837 = vmatpush1.msra.mxu0 %v8428_v59  ;;  %1908 = vmatpush1.msra.mxu1 %v8429_v1  ;;  %v8440_v1 = vld [vmem:[#allocation53_spill] sm:$0xff] }
 0x33e   :  { %1838 = vmatprep.subr.mxu0 %v8430_v10  ;;  %1909 = vmatprep.subr.mxu1 %v8431_v12  ;;  %v8441_v10 = vld [vmem:[#allocation55_spill] sm:$0xff]  ;;  %v8442_v12 = vld [vmem:[#allocation57_spill] sm:$0xff] }
 0x33f   :  { %1839 = vmatpush1.msra.mxu0 %v8432_v14  ;;  %1910 = vmatpush1.msra.mxu1 %v8433_v15  ;;  %v8443_v14 = vld [vmem:[#allocation61_spill] sm:$0xff]  ;;  %v8444_v15 = vld [vmem:[#allocation80_spill] sm:$0xff] }
 0x340   :  { %1840 = vmatprep.subr.mxu0 %v8434_v17  ;;  %1911 = vmatprep.subr.mxu1 %v8435_v19  ;;  %v8445_v17 = vld [vmem:[#allocation81_spill] sm:$0xff]  ;;  %v8446_v19 = vld [vmem:[#allocation70_spill] sm:$0xff] }
 0x341   :  { %1841 = vmatpush1.msra.mxu0 %v8436_v20  ;;  %1912 = vmatpush1.msra.mxu1 %v8437_v26  ;;  %v8447_v20 = vld [vmem:[#allocation72_spill] sm:$0xff]  ;;  %v8448_v26 = vld [vmem:[#allocation74_spill] sm:$0xff] }
 0x342   :  { %1842 = vmatprep.subr.mxu0 %v8438_v60  ;;  %1913 = vmatprep.subr.mxu1 %v8439_v46  ;;  %v8449_v60 = vld [vmem:[#allocation76_spill] sm:$0xff]  ;;  %v8450_v46 = vld [vmem:[#allocation78_spill] sm:$0xff] }
 0x343   :  { %1843 = vmatpush1.msra.mxu0 %v8440_v1  ;;  %1914 = vmatpush1.msra.mxu1 %v8441_v10  ;;  %v8451_v1 = vld [vmem:[#allocation8_spill] sm:$0xff]  ;;  %v8452_v10 = vld [vmem:[#allocation14_spill] sm:$0xff] }
 0x344   :  { %1844 = vmatprep.subr.mxu0 %v8442_v12  ;;  %1915 = vmatprep.subr.mxu1 %v8443_v14  ;;  %v8453_v12 = vld [vmem:[#allocation9_spill] sm:$0xff]  ;;  %v8454_v14 = vld [vmem:[#allocation16_spill] sm:$0xff] }
 0x345   :  { %1845 = vmatpush1.msra.mxu0 %v8444_v15  ;;  %1916 = vmatpush1.msra.mxu1 %v8445_v17  ;;  %v8455_v15 = vld [vmem:[#allocation10_spill] sm:$0xff] }
 0x346   :  { %1846 = vmatprep.subr.mxu0 %v8446_v19  ;;  %1917 = vmatprep.subr.mxu1 %v8447_v20  ;;  %v8456_v17 = vld [vmem:[#allocation18_spill] sm:$0xff]  ;;  %v8457_v19 = vld [vmem:[#allocation11_spill] sm:$0xff]  ;;  %v8458_v20 = vld [vmem:[#allocation21_spill] sm:$0xff] }
 0x347   :  { %1847 = vmatpush1.msra.mxu0 %v8448_v26  ;;  %1918 = vmatpush1.msra.mxu1 %v8449_v60  ;;  %v8459_v26 = vld [vmem:[#allocation12_spill] sm:$0xff]  ;;  %v8460_v60 = vld [vmem:[#allocation23_spill] sm:$0xff] }
 0x348   :  { %1848 = vmatprep.subr.mxu0 %v8450_v46  ;;  %1919 = vmatprep.subr.mxu1 %v8451_v1  ;;  %v8461_v46 = vld [vmem:[#allocation13_spill] sm:$0xff] }
 0x349   :  { %1849 = vmatpush1.msra.mxu0 %v8452_v10  ;;  %1920 = vmatpush1.msra.mxu1 %v8453_v12  ;;  %v8462_v1 = vld [vmem:[#allocation25_spill] sm:$0xff]  ;;  %v8463_v10 = vld [vmem:[#allocation15_spill] sm:$0xff] }
 0x34a   :  { %1850 = vmatprep.subr.mxu0 %v8454_v14  ;;  %1921 = vmatprep.subr.mxu1 %v8455_v15  ;;  %v8464_v12 = vld [vmem:[#allocation27_spill] sm:$0xff]  ;;  %v8465_v14 = vld [vmem:[#allocation17_spill] sm:$0xff] }
 0x34b   :  { %1851 = vmatpush1.msra.mxu0 %v8456_v17  ;;  %1922 = vmatpush1.msra.mxu1 %v8457_v19  ;;  %v8466_v15 = vld [vmem:[#allocation29_spill] sm:$0xff]  ;;  %v8467_v17 = vld [vmem:[#allocation19_spill] sm:$0xff] }
 0x34c   :  { %1852 = vmatprep.subr.mxu0 %v8458_v20  ;;  %1923 = vmatprep.subr.mxu1 %v8459_v26  ;;  %v8468_v19 = vld [vmem:[#allocation31_spill] sm:$0xff]  ;;  %v8469_v26 = vld [vmem:[#allocation34_spill] sm:$0xff] }
 0x34d   :  { %1853 = vmatpush1.msra.mxu0 %v8460_v60  ;;  %1924 = vmatpush1.msra.mxu1 %v8461_v46  ;;  %v8470_v46 = vld [vmem:[#allocation36_spill] sm:$0xff] }
 0x34e   :  { %1854 = vmatprep.subr.mxu0 %v8462_v1  ;;  %1925 = vmatprep.subr.mxu1 %v8463_v10  ;;  %v8471_v1 = vld [vmem:[#allocation38_spill] sm:$0xff] }
 0x34f   :  { %1855 = vmatpush1.msra.mxu0 %v8464_v12  ;;  %1926 = vmatpush1.msra.mxu1 %v8465_v14  ;;  %v51_v14 = vld [vmem:[%s7780_s0 + $0xc0] sm:$0xff] }
 0x350   :  { %1856 = vmatprep.subr.mxu0 %v8466_v15  ;;  %1927 = vmatprep.subr.mxu1 %v8467_v17  ;;  %v53_v17 = vld [vmem:[%s7780_s0 + $0xc8] sm:$0xff] }
 0x351   :  { %1857 = vmatpush1.msra.mxu0 %v8468_v19  ;;  %1890 = vmatprep.mubr.f32.mxu0 %v8173_v57 }
 0x352   :  { %1928 = vmatpush1.msra.mxu1 %v8469_v26  ;;  %1961 = vmatprep.mubr.f32.mxu1 %v8173_v57 }
 0x353   :  { %2010 = vmatprep.subr.mxu0 %v8470_v46  ;;  %2081 = vmatprep.subr.mxu1 %v8471_v1  ;;  %v57_v1 = vld [vmem:[%s7780_s0 + $0xd8] sm:$0xff] }
 0x3d0   :  { %v1522_v12 = vpop.f32.mrf.mxu0  ;;  %v1593_v26 = vpop.f32.mrf.mxu1 }
 0x3d1   :  { %v1598_v19 = vadd.f32 %v1522_v12, %v51_v14  ;;  %v1600_v12 = vadd.f32 %v1593_v26, %v55_v63 }
 0x3d2   :  { %v1524_v15 = vpop.f32.mrf.mxu0  ;;  %v1595_v46 = vpop.f32.mrf.mxu1 }
 0x3d3   :  { %v3558_v10 = vmul.f32 -1.442695, %v1598_v19  ;;  %v1599_v60 = vadd.f32 %v1524_v15, %v53_v17  ;;  %v1601_v59 = vadd.f32 %v1595_v46, %v57_v1  ;;  %v3524_v15 = vld [vmem:[%s7781_s1 + $0x120] sm:$0xff] }
 0x3d5   :  { %3799 = vpow2.f32 %v3558_v10  ;;  %v3559_v20 = vmul.f32 -1.442695, %v1599_v60  ;;  %v3560_v5 = vmul.f32 -1.442695, %v1601_v59 }
 0x3d7   :  { %3801 = vpow2.f32 %v3559_v20  ;;  %v3525_v20 = vld [vmem:[%s7781_s1 + $0x128] sm:$0xff] }
 0x3d8   :  { %3803 = vpow2.f32 %v3560_v5 }
 0x3e2   :  { %v3800_v16 = vpop.eup %3799 }
 0x3e3   :  { %v1605_v14 = vadd.f32 1.0, %v3800_v16 }
 0x3e4   :  { %v3802_v19 = vpop.eup %3801 }
 0x3e5   :  { %3805 = vrcp.f32 %v1605_v14  ;;  %v1611_v10 = vadd.f32 1.0, %v3802_v19  ;;  %v3804_v17 = vpop.eup %3803 }
 0x3e6   :  { %3807 = vtanh.f32 %v1600_v12  ;;  %v1618_v19 = vadd.f32 1.0, %v3804_v17  ;;  %v3526_v17 = vld [vmem:[%s7781_s1 + $0x130] sm:$0xff] }
 0x3e7   :  { %3809 = vrcp.f32 %v1611_v10 }
 0x3f1   :  { %v1706_v1 = vpop.f32.mrf.mxu0  ;;  %v1777_v10 = vpop.f32.mrf.mxu1 }
 0x3f2   :  { %v3806_v59 = vpop.eup %3805  ;;  %v1782_v60 = vadd.f32 %v3524_v15, %v1706_v1  ;;  %v3527_v1 = vld [vmem:[%s7781_s1 + $0x138] sm:$0xff] }
 0x3f3   :  { %v3808_v63 = vpop.eup %3807  ;;  %v1708_v16 = vpop.f32.mrf.mxu0 }
 0x3f4   :  { %v3810_v26 = vpop.eup %3809  ;;  %v3561_v5 = vmul.f32 -1.442695, %v1782_v60  ;;  %v1783_v46 = vadd.f32 %v3525_v20, %v1708_v16  ;;  %v1622_v14 = vmul.f32 %v3808_v63, %v3806_v59  ;;  %v1779_v20 = vpop.f32.mrf.mxu1  ;;  %v1784_v16 = vadd.f32 %v3526_v17, %v1777_v10  ;;  %v8482_v10 = vld [vmem:[#allocation52_spill] sm:$0xff]  ;;  %v8487_v17 = vld [vmem:[#allocation73_spill] sm:$0xff] }
 0x3f5   :  { %v1621_v12 = vmul.f32 %v3810_v26, %v5955_v40  ;;  %v1785_v59 = vadd.f32 %v3527_v1, %v1779_v20  ;;  %v8484_v1 = vld [vmem:[#allocation65_spill] sm:$0xff] }
 0x3f6   :  { %3811 = vpow2.f32 %v3561_v5  ;;  %v3562_v45 = vmul.f32 -1.442695, %v1783_v46  ;;  %v8485_v20 = vld [vmem:[#allocation69_spill] sm:$0xff] }
 0x3f7   :  { %v1623_v55 = vadd.f32 %v1622_v14, %v1621_v12  ;;  %v3563_v60 = vmul.f32 -1.442695, %v1785_v59  ;;  %v8479_v12 = vld [vmem:[#allocation48_spill] sm:$0xff]  ;;  %v8486_v59 = vld [vmem:[#allocation71_spill] sm:$0xff] }
 0x3f8   :  { %3813 = vpow2.f32 %v3562_v45 }
 0x3f9   :  { %3815 = vrcp.f32 %v1618_v19  ;;  %v6348_v15 = vsel %vm1632_vm14, %v1623_v55, %v5955_v40  ;;  %v8480_v19 = vld [vmem:[#allocation26_spill] sm:$0xff] }
 0x3fa   :  { %3817 = vtanh.f32 %v1623_v55 }
 0x3fb   :  { %3819 = vpow2.f32 %v3563_v60  ;;  %v8488_v60 = vld [vmem:[#allocation59_spill] sm:$0xff] }
 0x403   :  { %v3812_v63 = vpop.eup %3811 }
 0x404   :  { %v1789_v45 = vadd.f32 1.0, %v3812_v63  ;;  %v8489_v63 = vld [vmem:[#allocation75_spill] sm:$0xff] }
 0x405   :  { %v3814_v26 = vpop.eup %3813 }
 0x406   :  { %v3816_v5 = vpop.eup %3815  ;;  %3821 = vrcp.f32 %v1789_v45  ;;  %v1795_v40 = vadd.f32 1.0, %v3814_v26  ;;  %v8491_v45 = vld [vmem:[#allocation62_spill] sm:$0xff]  ;;  %v8492_v26 = vld [vmem:[#allocation79_spill] sm:$0xff] }
 0x407   :  { %v3818_v46 = vpop.eup %3817  ;;  %3823 = vtanh.f32 %v1784_v16  ;;  %v8490_v16 = vld [vmem:[#allocation77_spill] sm:$0xff] }
 0x408   :  { %3825 = vrcp.f32 %v1795_v40  ;;  %v1625_v14 = vmul.f32 %v3818_v46, %v3816_v5  ;;  %v8493_v5 = vld [vmem:[#allocation64_spill] sm:$0xff]  ;;  %v8494_v46 = vld [vmem:[#allocation66_spill] sm:$0xff] }
 0x40a   :  { %v6358_v55 = vsel %vm1632_vm14, %v1625_v14, %v5965_v23  ;;  %v8477_v23 = vld [vmem:[#allocation46_spill] sm:$0xff]  ;;  %v8495_v14 = vld [vmem:[#allocation68_spill] sm:$0xff] }
 0x40b   :  { %1891 = vmatmul.mubr.f32.vlgmr.msra.gmra.mxu0 %v6358_v55  ;;  %1962 = vmatmul.mubr.f32.vlgmr.msra.gmra.mxu1 %v6358_v55 }
 0x40c   :  { %2011 = vmatpush1.msra.mxu0 %v5414_v22  ;;  %2082 = vmatpush1.msra.mxu1 %v5973_v52  ;;  %v3820_v22 = vpop.eup %3819 }
 0x40d   :  { %2012 = vmatprep.subr.mxu0 %v5421_v24  ;;  %2083 = vmatprep.subr.mxu1 %v5980_v21 }
 0x40e   :  { %2013 = vmatpush1.msra.mxu0 %v5428_v25  ;;  %2084 = vmatpush1.msra.mxu1 %v5987_v28 }
 0x40f   :  { %2014 = vmatprep.subr.mxu0 %v5435_v27  ;;  %2085 = vmatprep.subr.mxu1 %v5994_v48 }
 0x410   :  { %2015 = vmatpush1.msra.mxu0 %v5442_v29  ;;  %2086 = vmatpush1.msra.mxu1 %v6001_v44  ;;  %v1802_v29 = vadd.f32 1.0, %v3820_v22 }
 0x411   :  { %2016 = vmatprep.subr.mxu0 %v5449_v31  ;;  %2087 = vmatprep.subr.mxu1 %v6008_v38 }
 0x412   :  { %2017 = vmatpush1.msra.mxu0 %v5456_v33  ;;  %2088 = vmatpush1.msra.mxu1 %v6015_v37  ;;  %3827 = vrcp.f32 %v1802_v29 }
 0x413   :  { %v3822_v24 = vpop.eup %3821  ;;  %2018 = vmatprep.subr.mxu0 %v5463_v36  ;;  %2089 = vmatprep.subr.mxu1 %v6022_v7  ;;  %v8472_v36 = vld [vmem:[#allocation40_spill] sm:$0xff] }
 0x414   :  { %v3824_v25 = vpop.eup %3823  ;;  %2019 = vmatpush1.msra.mxu0 %v5470_v39  ;;  %2090 = vmatpush1.msra.mxu1 %v6029_v32  ;;  %v1815_v39 = vpop.permute.xlu1 %1814 }
 0x415   :  { %v3826_v27 = vpop.eup %3825  ;;  %2020 = vmatprep.subr.mxu0 %v5477_v43  ;;  %2091 = vmatprep.subr.mxu1 %v6036_v34  ;;  %v1806_v31 = vmul.f32 %v3824_v25, %v3822_v24  ;;  %vm1816_vm15 = vcmp.eq.s32.totalorder %v1815_v39, 1  ;;  %v8473_v43 = vld [vmem:[#allocation42_spill] sm:$0xff]  ;;  %v8497_v25 = vld [vmem:[#allocation83_spill] sm:$0xff]  ;;  %v6454_v39 = vld [vmem:[%s7783_s3 + $0x1c8] sm:$0xff] }
 0x416   :  { %v1805_v33 = vmul.f32 %v3826_v27, %v6081_v42  ;;  %2021 = vmatpush1.msra.mxu0 %v5484_v50  ;;  %2092 = vmatpush1.msra.mxu1 %v6044_v54  ;;  %v8496_v24 = vld [vmem:[#allocation82_spill] sm:$0xff]  ;;  %v8498_v27 = vld [vmem:[#allocation84_spill] sm:$0xff] }
 0x417   :  { %2022 = vmatprep.subr.mxu0 %v5492_v13  ;;  %2093 = vmatprep.subr.mxu1 %v8472_v36  ;;  %v8474_v13 = vld [vmem:[#allocation20_spill] sm:$0xff] }
 0x418   :  { %v1807_v11 = vadd.f32 %v1806_v31, %v1805_v33  ;;  %2023 = vmatpush1.msra.mxu0 %v5499_v58  ;;  %2094 = vmatpush1.msra.mxu1 %v6060_v30  ;;  %v8475_v58 = vld [vmem:[#allocation44_spill] sm:$0xff]  ;;  %v6440_v33 = vld [vmem:[%s7783_s3 + $0x1e8] sm:$0xff]  ;;  %8501 = vst [vmem:[#allocation20_spill] sm:$0xff] %v6454_v39 }
 0x419   :  { %2024 = vmatprep.subr.mxu0 %v5506_v49  ;;  %2095 = vmatprep.subr.mxu1 %v6068_v3  ;;  %v8476_v49 = vld [vmem:[#allocation22_spill] sm:$0xff]  ;;  %8499 = vst [vmem:[#allocation40_spill] sm:$0xff] %v6440_v33 }
 0x41a   :  { %2025 = vmatpush1.msra.mxu0 %v5513_v8  ;;  %2096 = vmatpush1.msra.mxu1 %v8473_v43  ;;  %3829 = vtanh.f32 %v1807_v11  ;;  %v6395_v50 = vsel %vm1816_vm15, %v1807_v11, %v6081_v42  ;;  %v8478_v8 = vld [vmem:[#allocation24_spill] sm:$0xff]  ;;  %v8481_v42 = vld [vmem:[#allocation50_spill] sm:$0xff] }
 0x41b   :  { %2026 = vmatprep.subr.mxu0 %v5520_v18  ;;  %2097 = vmatprep.subr.mxu1 %v6087_v6  ;;  %v8483_v18 = vld [vmem:[#allocation63_spill] sm:$0xff]  ;;  %v8506_v11 = vld [vmem:[#allocation28_spill] sm:$0xff] }
 0x41c   :  { %2027 = vmatpush1.msra.mxu0 %v8474_v13  ;;  %2098 = vmatpush1.msra.mxu1 %v8475_v58  ;;  %v8508_v13 = vld [vmem:[#allocation30_spill] sm:$0xff] }
 0x41d   :  { %2028 = vmatprep.subr.mxu0 %v8476_v49  ;;  %2099 = vmatprep.subr.mxu1 %v8477_v23  ;;  %v8510_v49 = vld [vmem:[#allocation32_spill] sm:$0xff] }
 0x41e   :  { %2029 = vmatpush1.msra.mxu0 %v8478_v8  ;;  %2100 = vmatpush1.msra.mxu1 %v8479_v12  ;;  %v6503_v8 = vld [vmem:[%s7783_s3 + $0x160] sm:$0xff] }
 0x41f   :  { %2030 = vmatprep.subr.mxu0 %v8480_v19  ;;  %2101 = vmatprep.subr.mxu1 %v8481_v42  ;;  %v3828_v40 = vpop.eup %3827  ;;  %8511 = vst [vmem:[#allocation50_spill] sm:$0xff] %v6503_v8  ;;  %v8512_v19 = vld [vmem:[#allocation33_spill] sm:$0xff] }
 0x420   :  { %2031 = vmatpush1.msra.mxu0 %v8482_v10  ;;  %2102 = vmatpush1.msra.mxu1 %v8483_v18 }
 0x421   :  { %2032 = vmatprep.subr.mxu0 %v8484_v1  ;;  %2103 = vmatprep.subr.mxu1 %v8485_v20 }
 0x422   :  { %2033 = vmatpush1.msra.mxu0 %v8486_v59  ;;  %2104 = vmatpush1.msra.mxu1 %v8487_v17 }
 0x423   :  { %2034 = vmatprep.subr.mxu0 %v8488_v60  ;;  %2105 = vmatprep.subr.mxu1 %v8489_v63 }
 0x424   :  { %2035 = vmatpush1.msra.mxu0 %v8490_v16  ;;  %2106 = vmatpush1.msra.mxu1 %v8491_v45 }
 0x425   :  { %2036 = vmatprep.subr.mxu0 %v8492_v26  ;;  %2107 = vmatprep.subr.mxu1 %v8493_v5 }
 0x426   :  { %2037 = vmatpush1.msra.mxu0 %v8494_v46  ;;  %2108 = vmatpush1.msra.mxu1 %v8495_v14 }
 0x427   :  { %v3830_v22 = vpop.eup %3829  ;;  %2038 = vmatprep.subr.mxu0 %v8496_v24  ;;  %2109 = vmatprep.subr.mxu1 %v8497_v25 }
 0x428   :  { %2039 = vmatpush1.msra.mxu0 %v8498_v27  ;;  %2110 = vmatpush1.msra.mxu1 %v6223_v35  ;;  %v1809_v29 = vmul.f32 %v3830_v22, %v3828_v40  ;;  %v8513_v40 = vld [vmem:[#allocation35_spill] sm:$0xff]  ;;  %v8514_v22 = vld [vmem:[#allocation37_spill] sm:$0xff] }
 0x429   :  { %2040 = vmatprep.subr.mxu0 %v6229_v9  ;;  %2111 = vmatprep.subr.mxu1 %v6235_v41 }
 0x42a   :  { %2041 = vmatpush1.msra.mxu0 %v6241_v0  ;;  %2074 = vmatprep.mubr.f32.mxu0 %v8173_v57  ;;  %v6431_v31 = vsel %vm1816_vm15, %v1809_v29, %v6248_v51  ;;  %v6447_v51 = vld [vmem:[%s7783_s3 + $0x1e0] sm:$0xff]  ;;  %v8515_v29 = vld [vmem:[#allocation39_spill] sm:$0xff] }
 0x42b   :  { %2112 = vmatpush1.msra.mxu1 %v6253_v2  ;;  %2145 = vmatprep.mubr.f32.mxu1 %v8173_v57  ;;  %8500 = vst [vmem:[#allocation42_spill] sm:$0xff] %v6447_v51 }
 0x42c   :  { %2075 = vmatmul.mubr.f32.vlgmr.msra.gmra.mxu0 %v6431_v31  ;;  %2146 = vmatmul.mubr.f32.vlgmr.msra.gmra.mxu1 %v6431_v31 }
 0x42d   :  { %2196 = vmatprep.subr.mxu0 %v6440_v33  ;;  %2267 = vmatprep.subr.mxu1 %v5590_v62  ;;  %v6461_v62 = vld [vmem:[%s7783_s3 + $0x1c0] sm:$0xff]  ;;  %v2001_v33 = vpop.permute.xlu0 %2000 }
 0x42e   :  { %2197 = vmatpush1.msra.mxu0 %v6447_v51  ;;  %2268 = vmatpush1.msra.mxu1 %v5597_v4  ;;  %8502 = vst [vmem:[#allocation44_spill] sm:$0xff] %v6461_v62  ;;  %v6468_v4 = vld [vmem:[%s7783_s3 + $0x1a8] sm:$0xff]  ;;  %vm2002_vm0 = vcmp.eq.s32.totalorder %v2001_v33, 1 }
 0x42f   :  { %2198 = vmatprep.subr.mxu0 %v6454_v39  ;;  %2269 = vmatprep.subr.mxu1 %v5604_v53  ;;  %8503 = vst [vmem:[#allocation22_spill] sm:$0xff] %v6468_v4  ;;  %v6475_v53 = vld [vmem:[%s7783_s3 + $0x1a0] sm:$0xff] }
 0x430   :  { %2199 = vmatpush1.msra.mxu0 %v6461_v62  ;;  %2270 = vmatpush1.msra.mxu1 %v5611_v47  ;;  %8504 = vst [vmem:[#allocation46_spill] sm:$0xff] %v6475_v53  ;;  %v6482_v47 = vld [vmem:[%s7783_s3 + $0x188] sm:$0xff] }
 0x431   :  { %2200 = vmatprep.subr.mxu0 %v6468_v4  ;;  %2271 = vmatprep.subr.mxu1 %v5618_v61  ;;  %8505 = vst [vmem:[#allocation24_spill] sm:$0xff] %v6482_v47  ;;  %v6489_v61 = vld [vmem:[%s7783_s3 + $0x180] sm:$0xff]  ;;  %v63_v4 = vld [vmem:[%s7780_s0 + $0x110] sm:$0xff] }
 0x432   :  { %2201 = vmatpush1.msra.mxu0 %v6475_v53  ;;  %2272 = vmatpush1.msra.mxu1 %v5625_v56  ;;  %8507 = vst [vmem:[#allocation48_spill] sm:$0xff] %v6489_v61  ;;  %v6496_v56 = vld [vmem:[%s7783_s3 + $0x168] sm:$0xff] }
 0x433   :  { %2202 = vmatprep.subr.mxu0 %v6482_v47  ;;  %2273 = vmatprep.subr.mxu1 %v8506_v11  ;;  %8509 = vst [vmem:[#allocation26_spill] sm:$0xff] %v6496_v56  ;;  %v8516_v11 = vld [vmem:[#allocation54_spill] sm:$0xff]  ;;  %v8521_v47 = vld [vmem:[#allocation45_spill] sm:$0xff] }
 0x434   :  { %2203 = vmatpush1.msra.mxu0 %v6489_v61  ;;  %2274 = vmatpush1.msra.mxu1 %v8508_v13  ;;  %v8517_v13 = vld [vmem:[#allocation41_spill] sm:$0xff]  ;;  %v8520_v61 = vld [vmem:[#allocation58_spill] sm:$0xff] }
 0x435   :  { %2204 = vmatprep.subr.mxu0 %v6496_v56  ;;  %2275 = vmatprep.subr.mxu1 %v8510_v49  ;;  %v8518_v49 = vld [vmem:[#allocation56_spill] sm:$0xff]  ;;  %v8519_v56 = vld [vmem:[#allocation43_spill] sm:$0xff] }
 0x436   :  { %2205 = vmatpush1.msra.mxu0 %v6503_v8  ;;  %2276 = vmatpush1.msra.mxu1 %v8512_v19  ;;  %v8522_v8 = vld [vmem:[#allocation60_spill] sm:$0xff]  ;;  %v8523_v19 = vld [vmem:[#allocation47_spill] sm:$0xff] }
 0x437   :  { %2206 = vmatprep.subr.mxu0 %v8513_v40  ;;  %2277 = vmatprep.subr.mxu1 %v8514_v22  ;;  %v8524_v40 = vld [vmem:[#allocation49_spill] sm:$0xff]  ;;  %v8525_v22 = vld [vmem:[#allocation51_spill] sm:$0xff] }
 0x438   :  { %2207 = vmatpush1.msra.mxu0 %v8515_v29  ;;  %2278 = vmatpush1.msra.mxu1 %v8516_v11  ;;  %v8526_v29 = vld [vmem:[#allocation67_spill] sm:$0xff]  ;;  %v8527_v11 = vld [vmem:[#allocation53_spill] sm:$0xff] }
 0x439   :  { %2208 = vmatprep.subr.mxu0 %v8517_v13  ;;  %2279 = vmatprep.subr.mxu1 %v8518_v49  ;;  %v8528_v13 = vld [vmem:[#allocation55_spill] sm:$0xff]  ;;  %v8529_v49 = vld [vmem:[#allocation57_spill] sm:$0xff] }
 0x43a   :  { %2209 = vmatpush1.msra.mxu0 %v8519_v56  ;;  %2280 = vmatpush1.msra.mxu1 %v8520_v61  ;;  %v8530_v56 = vld [vmem:[#allocation61_spill] sm:$0xff]  ;;  %v8531_v61 = vld [vmem:[#allocation80_spill] sm:$0xff] }
 0x43b   :  { %2210 = vmatprep.subr.mxu0 %v8521_v47  ;;  %2281 = vmatprep.subr.mxu1 %v8522_v8  ;;  %v8532_v47 = vld [vmem:[#allocation81_spill] sm:$0xff]  ;;  %v8533_v8 = vld [vmem:[#allocation70_spill] sm:$0xff] }
 0x43c   :  { %2211 = vmatpush1.msra.mxu0 %v8523_v19  ;;  %2282 = vmatpush1.msra.mxu1 %v8524_v40  ;;  %v8534_v19 = vld [vmem:[#allocation72_spill] sm:$0xff]  ;;  %v8535_v40 = vld [vmem:[#allocation74_spill] sm:$0xff] }
 0x43d   :  { %2212 = vmatprep.subr.mxu0 %v8525_v22  ;;  %2283 = vmatprep.subr.mxu1 %v8526_v29  ;;  %v8536_v22 = vld [vmem:[#allocation76_spill] sm:$0xff]  ;;  %v8537_v29 = vld [vmem:[#allocation78_spill] sm:$0xff] }
 0x43e   :  { %2213 = vmatpush1.msra.mxu0 %v8527_v11  ;;  %2284 = vmatpush1.msra.mxu1 %v8528_v13  ;;  %v8538_v11 = vld [vmem:[#allocation8_spill] sm:$0xff]  ;;  %v8539_v13 = vld [vmem:[#allocation14_spill] sm:$0xff] }
 0x43f   :  { %2214 = vmatprep.subr.mxu0 %v8529_v49  ;;  %2285 = vmatprep.subr.mxu1 %v8530_v56  ;;  %v8540_v49 = vld [vmem:[#allocation9_spill] sm:$0xff]  ;;  %v8541_v56 = vld [vmem:[#allocation16_spill] sm:$0xff] }
 0x440   :  { %2215 = vmatpush1.msra.mxu0 %v8531_v61  ;;  %2286 = vmatpush1.msra.mxu1 %v8532_v47  ;;  %v8542_v61 = vld [vmem:[#allocation10_spill] sm:$0xff] }
 0x441   :  { %2216 = vmatprep.subr.mxu0 %v8533_v8  ;;  %2287 = vmatprep.subr.mxu1 %v8534_v19  ;;  %v8543_v47 = vld [vmem:[#allocation18_spill] sm:$0xff]  ;;  %v8544_v8 = vld [vmem:[#allocation11_spill] sm:$0xff]  ;;  %v8545_v19 = vld [vmem:[#allocation21_spill] sm:$0xff] }
 0x442   :  { %2217 = vmatpush1.msra.mxu0 %v8535_v40  ;;  %2288 = vmatpush1.msra.mxu1 %v8536_v22  ;;  %v8546_v40 = vld [vmem:[#allocation12_spill] sm:$0xff]  ;;  %v8547_v22 = vld [vmem:[#allocation23_spill] sm:$0xff] }
 0x443   :  { %2218 = vmatprep.subr.mxu0 %v8537_v29  ;;  %2289 = vmatprep.subr.mxu1 %v8538_v11  ;;  %v8548_v29 = vld [vmem:[#allocation13_spill] sm:$0xff] }
 0x444   :  { %2219 = vmatpush1.msra.mxu0 %v8539_v13  ;;  %2290 = vmatpush1.msra.mxu1 %v8540_v49  ;;  %v8549_v11 = vld [vmem:[#allocation25_spill] sm:$0xff]  ;;  %v8550_v13 = vld [vmem:[#allocation15_spill] sm:$0xff] }
 0x445   :  { %2220 = vmatprep.subr.mxu0 %v8541_v56  ;;  %2291 = vmatprep.subr.mxu1 %v8542_v61  ;;  %v8551_v49 = vld [vmem:[#allocation27_spill] sm:$0xff]  ;;  %v8552_v56 = vld [vmem:[#allocation17_spill] sm:$0xff] }
 0x446   :  { %2221 = vmatpush1.msra.mxu0 %v8543_v47  ;;  %2292 = vmatpush1.msra.mxu1 %v8544_v8  ;;  %v8553_v61 = vld [vmem:[#allocation29_spill] sm:$0xff]  ;;  %v8554_v47 = vld [vmem:[#allocation19_spill] sm:$0xff] }
 0x447   :  { %2222 = vmatprep.subr.mxu0 %v8545_v19  ;;  %2293 = vmatprep.subr.mxu1 %v8546_v40  ;;  %v8555_v8 = vld [vmem:[#allocation31_spill] sm:$0xff]  ;;  %v8556_v19 = vld [vmem:[#allocation34_spill] sm:$0xff]  ;;  %v8557_v40 = vld [vmem:[#allocation36_spill] sm:$0xff] }
 0x448   :  { %2223 = vmatpush1.msra.mxu0 %v8547_v22  ;;  %2294 = vmatpush1.msra.mxu1 %v8548_v29  ;;  %v8558_v22 = vld [vmem:[#allocation38_spill] sm:$0xff]  ;;  %v59_v29 = vld [vmem:[%s7780_s0 + $0x100] sm:$0xff] }
 0x449   :  { %2224 = vmatprep.subr.mxu0 %v8549_v11  ;;  %2295 = vmatprep.subr.mxu1 %v8550_v13  ;;  %v61_v13 = vld [vmem:[%s7780_s0 + $0x108] sm:$0xff] }
 0x44a   :  { %2225 = vmatpush1.msra.mxu0 %v8551_v49  ;;  %2296 = vmatpush1.msra.mxu1 %v8552_v56 }
 0x44b   :  { %2226 = vmatprep.subr.mxu0 %v8553_v61  ;;  %2297 = vmatprep.subr.mxu1 %v8554_v47 }
 0x44c   :  { %2227 = vmatpush1.msra.mxu0 %v8555_v8  ;;  %2260 = vmatprep.mubr.f32.mxu0 %v8173_v57 }
 0x44d   :  { %2298 = vmatpush1.msra.mxu1 %v8556_v19  ;;  %2331 = vmatprep.mubr.f32.mxu1 %v8173_v57 }
 0x44e   :  { %2380 = vmatprep.subr.mxu0 %v8557_v40  ;;  %2451 = vmatprep.subr.mxu1 %v8558_v22  ;;  %v65_v40 = vld [vmem:[%s7780_s0 + $0x118] sm:$0xff] }
 0x4cb   :  { %v1892_v11 = vpop.f32.mrf.mxu0  ;;  %v1963_v8 = vpop.f32.mrf.mxu1 }
 0x4cc   :  { %v1968_v49 = vadd.f32 %v1892_v11, %v59_v29  ;;  %v1970_v29 = vadd.f32 %v1963_v8, %v63_v4 }
 0x4cd   :  { %v1894_v56 = vpop.f32.mrf.mxu0  ;;  %v1965_v22 = vpop.f32.mrf.mxu1 }
 0x4ce   :  { %v3564_v61 = vmul.f32 -1.442695, %v1968_v49  ;;  %v1969_v47 = vadd.f32 %v1894_v56, %v61_v13  ;;  %v1971_v53 = vadd.f32 %v1965_v22, %v65_v40  ;;  %v3520_v56 = vld [vmem:[%s7781_s1 + $0xe0] sm:$0xff] }
 0x4d0   :  { %3831 = vpow2.f32 %v3564_v61  ;;  %v3565_v19 = vmul.f32 -1.442695, %v1969_v47  ;;  %v3566_v62 = vmul.f32 -1.442695, %v1971_v53 }
 0x4d2   :  { %3833 = vpow2.f32 %v3565_v19  ;;  %v3521_v19 = vld [vmem:[%s7781_s1 + $0xe8] sm:$0xff] }
 0x4d3   :  { %3835 = vpow2.f32 %v3566_v62 }
 0x4dd   :  { %v3832_v39 = vpop.eup %3831 }
 0x4de   :  { %v1975_v11 = vadd.f32 1.0, %v3832_v39 }
 0x4df   :  { %v3834_v49 = vpop.eup %3833 }
 0x4e0   :  { %3837 = vrcp.f32 %v1975_v11  ;;  %v1981_v13 = vadd.f32 1.0, %v3834_v49  ;;  %v3836_v61 = vpop.eup %3835 }
 0x4e1   :  { %3839 = vtanh.f32 %v1970_v29  ;;  %v1988_v49 = vadd.f32 1.0, %v3836_v61  ;;  %v3522_v61 = vld [vmem:[%s7781_s1 + $0xf0] sm:$0xff] }
 0x4e2   :  { %3841 = vrcp.f32 %v1981_v13 }
 0x4ec   :  { %v2076_v47 = vpop.f32.mrf.mxu0  ;;  %v2147_v13 = vpop.f32.mrf.mxu1 }
 0x4ed   :  { %v3838_v53 = vpop.eup %3837  ;;  %v2152_v40 = vadd.f32 %v3520_v56, %v2076_v47  ;;  %v3523_v47 = vld [vmem:[%s7781_s1 + $0xf8] sm:$0xff] }
 0x4ee   :  { %v3840_v4 = vpop.eup %3839  ;;  %v2078_v39 = vpop.f32.mrf.mxu0 }
 0x4ef   :  { %v3842_v8 = vpop.eup %3841  ;;  %v3567_v62 = vmul.f32 -1.442695, %v2152_v40  ;;  %v2153_v22 = vadd.f32 %v3521_v19, %v2078_v39  ;;  %v1992_v11 = vmul.f32 %v3840_v4, %v3838_v53  ;;  %v2149_v19 = vpop.f32.mrf.mxu1  ;;  %v2154_v39 = vadd.f32 %v3522_v61, %v2147_v13  ;;  %v6642_v13 = vld [vmem:[%s7784_s4 + $0x168] sm:$0xff] }
 0x4f0   :  { %v1991_v29 = vmul.f32 %v3842_v8, %v6348_v15  ;;  %v2155_v53 = vadd.f32 %v3523_v47, %v2149_v19  ;;  %v6649_v47 = vld [vmem:[%s7784_s4 + $0x160] sm:$0xff] }
 0x4f1   :  { %3843 = vpow2.f32 %v3567_v62  ;;  %v3568_v51 = vmul.f32 -1.442695, %v2153_v22 }
 0x4f2   :  { %v1993_v2 = vadd.f32 %v1992_v11, %v1991_v29  ;;  %v3569_v40 = vmul.f32 -1.442695, %v2155_v53  ;;  %v6593_v29 = vld [vmem:[%s7784_s4 + $0x1e0] sm:$0xff]  ;;  %v6656_v53 = vld [vmem:[%s7784_s4 + $0x148] sm:$0xff] }
 0x4f3   :  { %3845 = vpow2.f32 %v3568_v51 }
 0x4f4   :  { %3847 = vrcp.f32 %v1988_v49  ;;  %v6576_v56 = vsel %vm2002_vm0, %v1993_v2, %v6348_v15  ;;  %v6600_v49 = vld [vmem:[%s7784_s4 + $0x1c8] sm:$0xff] }
 0x4f5   :  { %3849 = vtanh.f32 %v1993_v2 }
 0x4f6   :  { %3851 = vpow2.f32 %v3569_v40  ;;  %v6664_v40 = vld [vmem:[%s7784_s4 + $0x140] sm:$0xff] }
 0x4fe   :  { %v3844_v4 = vpop.eup %3843 }
 0x4ff   :  { %v2159_v51 = vadd.f32 1.0, %v3844_v4 }
 0x500   :  { %v3846_v8 = vpop.eup %3845 }
 0x501   :  { %v3848_v62 = vpop.eup %3847  ;;  %3853 = vrcp.f32 %v2159_v51  ;;  %v2165_v15 = vadd.f32 1.0, %v3846_v8  ;;  %v6703_v51 = vld [vmem:[%s7784_s4 + $0xe8] sm:$0xff]  ;;  %v6844_v8 = vld [vmem:[%s7783_s3 + $0x158] sm:$0xff] }
 0x502   :  { %v3850_v22 = vpop.eup %3849  ;;  %3855 = vtanh.f32 %v2154_v39  ;;  %v6678_v39 = vld [vmem:[%s7784_s4 + $0x120] sm:$0xff]  ;;  %8574 = vst [vmem:[#allocation71_spill] sm:$0xff] %v6844_v8 }
 0x503   :  { %3857 = vrcp.f32 %v2165_v15  ;;  %v1995_v11 = vmul.f32 %v3850_v22, %v3848_v62  ;;  %v3852_v33 = vpop.eup %3851  ;;  %v6850_v62 = vld [vmem:[%s7783_s3 + $0x140] sm:$0xff]  ;;  %v6856_v15 = vld [vmem:[%s7783_s3 + $0x150] sm:$0xff]  ;;  %v6862_v22 = vld [vmem:[%s7783_s3 + $0x128] sm:$0xff] }
 0x504   :  { %v2172_v19 = vadd.f32 1.0, %v3852_v33  ;;  %8575 = vst [vmem:[#allocation73_spill] sm:$0xff] %v6850_v62  ;;  %8576 = vst [vmem:[#allocation59_spill] sm:$0xff] %v6856_v15  ;;  %v6874_v33 = vld [vmem:[%s7783_s3 + $0x120] sm:$0xff] }
 0x505   :  { %v6586_v2 = vsel %vm2002_vm0, %v1995_v11, %v6358_v55  ;;  %v6607_v55 = vld [vmem:[%s7784_s4 + $0x1c0] sm:$0xff]  ;;  %8577 = vst [vmem:[#allocation75_spill] sm:$0xff] %v6862_v22  ;;  %v6868_v11 = vld [vmem:[%s7783_s3 + $0x138] sm:$0xff]  ;;  %8579 = vst [vmem:[#allocation62_spill] sm:$0xff] %v6874_v33 }
 0x506   :  { %2261 = vmatmul.mubr.f32.vlgmr.msra.gmra.mxu0 %v6586_v2  ;;  %2332 = vmatmul.mubr.f32.vlgmr.msra.gmra.mxu1 %v6586_v2  ;;  %3859 = vrcp.f32 %v2172_v19  ;;  %8578 = vst [vmem:[#allocation77_spill] sm:$0xff] %v6868_v11  ;;  %v6898_v19 = vld [vmem:[%s7783_s3 + $0x100] sm:$0xff] }
 0x507   :  { %2381 = vmatpush1.msra.mxu0 %v6593_v29  ;;  %2452 = vmatpush1.msra.mxu1 %v5973_v52  ;;  %v6614_v52 = vld [vmem:[%s7784_s4 + $0x1a8] sm:$0xff]  ;;  %8583 = vst [vmem:[#allocation68_spill] sm:$0xff] %v6898_v19 }
 0x508   :  { %2382 = vmatprep.subr.mxu0 %v6600_v49  ;;  %2453 = vmatprep.subr.mxu1 %v5980_v21  ;;  %v6621_v21 = vld [vmem:[%s7784_s4 + $0x1a0] sm:$0xff] }
 0x509   :  { %2383 = vmatpush1.msra.mxu0 %v6607_v55  ;;  %2454 = vmatpush1.msra.mxu1 %v5987_v28  ;;  %v6628_v28 = vld [vmem:[%s7784_s4 + $0x188] sm:$0xff] }
 0x50a   :  { %2384 = vmatprep.subr.mxu0 %v6614_v52  ;;  %2455 = vmatprep.subr.mxu1 %v5994_v48  ;;  %v6635_v48 = vld [vmem:[%s7784_s4 + $0x180] sm:$0xff] }
 0x50b   :  { %2385 = vmatpush1.msra.mxu0 %v6621_v21  ;;  %2456 = vmatpush1.msra.mxu1 %v6001_v44 }
 0x50c   :  { %2386 = vmatprep.subr.mxu0 %v6628_v28  ;;  %2457 = vmatprep.subr.mxu1 %v6008_v38 }
 0x50d   :  { %2387 = vmatpush1.msra.mxu0 %v6635_v48  ;;  %2458 = vmatpush1.msra.mxu1 %v6015_v37 }
 0x50e   :  { %v3854_v44 = vpop.eup %3853  ;;  %2388 = vmatprep.subr.mxu0 %v6642_v13  ;;  %2459 = vmatprep.subr.mxu1 %v6022_v7 }
 0x50f   :  { %v3856_v38 = vpop.eup %3855  ;;  %2389 = vmatpush1.msra.mxu0 %v6649_v47  ;;  %2460 = vmatpush1.msra.mxu1 %v6029_v32  ;;  %v6671_v32 = vld [vmem:[%s7784_s4 + $0x128] sm:$0xff] }
 0x510   :  { %v3858_v37 = vpop.eup %3857  ;;  %2390 = vmatprep.subr.mxu0 %v6656_v53  ;;  %2461 = vmatprep.subr.mxu1 %v6036_v34  ;;  %v2176_v7 = vmul.f32 %v3856_v38, %v3854_v44  ;;  %v2185_v34 = vpop.permute.xlu1 %2184  ;;  %v6880_v44 = vld [vmem:[%s7783_s3 + $0x130] sm:$0xff]  ;;  %v6886_v38 = vld [vmem:[%s7783_s3 + $0x108] sm:$0xff] }
 0x511   :  { %v2175_v61 = vmul.f32 %v3858_v37, %v6395_v50  ;;  %2391 = vmatpush1.msra.mxu0 %v6664_v40  ;;  %2462 = vmatpush1.msra.mxu1 %v6044_v54  ;;  %vm2186_vm1 = vcmp.eq.s32.totalorder %v2185_v34, 1  ;;  %v6685_v54 = vld [vmem:[%s7784_s4 + $0x108] sm:$0xff]  ;;  %8580 = vst [vmem:[#allocation79_spill] sm:$0xff] %v6880_v44  ;;  %8581 = vst [vmem:[#allocation64_spill] sm:$0xff] %v6886_v38  ;;  %v6892_v37 = vld [vmem:[%s7783_s3 + $0x118] sm:$0xff] }
 0x512   :  { %2392 = vmatprep.subr.mxu0 %v6671_v32  ;;  %2463 = vmatprep.subr.mxu1 %v8472_v36  ;;  %v6692_v36 = vld [vmem:[%s7784_s4 + $0x100] sm:$0xff]  ;;  %8582 = vst [vmem:[#allocation66_spill] sm:$0xff] %v6892_v37  ;;  %v6916_v34 = vld [vmem:[%s7783_s3 + $0xf8] sm:$0xff] }
 0x513   :  { %v2177_v4 = vadd.f32 %v2176_v7, %v2175_v61  ;;  %2393 = vmatpush1.msra.mxu0 %v6678_v39  ;;  %2464 = vmatpush1.msra.mxu1 %v6060_v30  ;;  %v6904_v7 = vld [vmem:[%s7783_s3 + $0x110] sm:$0xff]  ;;  %v6910_v61 = vld [vmem:[%s7783_s3 + $0xe8] sm:$0xff]  ;;  %8586 = vst [vmem:[#allocation84_spill] sm:$0xff] %v6916_v34 }
 0x514   :  { %2394 = vmatprep.subr.mxu0 %v6685_v54  ;;  %2465 = vmatprep.subr.mxu1 %v6068_v3  ;;  %v6710_v3 = vld [vmem:[%s7784_s4 + $0xe0] sm:$0xff]  ;;  %8584 = vst [vmem:[#allocation82_spill] sm:$0xff] %v6904_v7  ;;  %8585 = vst [vmem:[#allocation83_spill] sm:$0xff] %v6910_v61 }
 0x515   :  { %2395 = vmatpush1.msra.mxu0 %v6692_v36  ;;  %2466 = vmatpush1.msra.mxu1 %v8473_v43  ;;  %3861 = vtanh.f32 %v2177_v4  ;;  %v6698_v30 = vsel %vm2186_vm1, %v2177_v4, %v6395_v50  ;;  %8559 = vst [vmem:[#allocation52_spill] sm:$0xff] %v6710_v3  ;;  %v6717_v43 = vld [vmem:[%s7784_s4 + $0xc8] sm:$0xff]  ;;  %v6922_v4 = vld [vmem:[%s7783_s3 + $0xe0] sm:$0xff] }
 0x516   :  { %2396 = vmatprep.subr.mxu0 %v6703_v51  ;;  %2467 = vmatprep.subr.mxu1 %v6087_v6  ;;  %8560 = vst [vmem:[#allocation63_spill] sm:$0xff] %v6717_v43  ;;  %v6724_v6 = vld [vmem:[%s7784_s4 + $0xc0] sm:$0xff]  ;;  %v6731_v50 = vld [vmem:[%s7784_s4 + $0xa8] sm:$0xff]  ;;  %8587 = vst [vmem:[#allocation28_spill] sm:$0xff] %v6922_v4 }
 0x517   :  { %2397 = vmatpush1.msra.mxu0 %v6710_v3  ;;  %2468 = vmatpush1.msra.mxu1 %v8475_v58  ;;  %8561 = vst [vmem:[#allocation65_spill] sm:$0xff] %v6724_v6  ;;  %8562 = vst [vmem:[#allocation69_spill] sm:$0xff] %v6731_v50  ;;  %v3860_v58 = vpop.eup %3859 }
 0x518   :  { %2398 = vmatprep.subr.mxu0 %v6717_v43  ;;  %2469 = vmatprep.subr.mxu1 %v8477_v23 }
 0x519   :  { %2399 = vmatpush1.msra.mxu0 %v6724_v6  ;;  %2470 = vmatpush1.msra.mxu1 %v8479_v12 }
 0x51a   :  { %2400 = vmatprep.subr.mxu0 %v6731_v50  ;;  %2471 = vmatprep.subr.mxu1 %v8481_v42 }
 0x51b   :  { %2401 = vmatpush1.msra.mxu0 %v8482_v10  ;;  %2472 = vmatpush1.msra.mxu1 %v8483_v18  ;;  %v8563_v10 = vld [vmem:[#allocation85_spill] sm:$0xff]  ;;  %v8566_v18 = vld [vmem:[#allocation20_spill] sm:$0xff] }
 0x51c   :  { %2402 = vmatprep.subr.mxu0 %v8484_v1  ;;  %2473 = vmatprep.subr.mxu1 %v8485_v20  ;;  %v6783_v1 = vld [vmem:[%s7783_s3 + $0x1d8] sm:$0xff]  ;;  %v8567_v20 = vld [vmem:[#allocation44_spill] sm:$0xff] }
 0x51d   :  { %2403 = vmatpush1.msra.mxu0 %v8486_v59  ;;  %2474 = vmatpush1.msra.mxu1 %v8487_v17  ;;  %v6790_v59 = vld [vmem:[%s7783_s3 + $0x1d0] sm:$0xff] }
 0x51e   :  { %2404 = vmatprep.subr.mxu0 %v8488_v60  ;;  %2475 = vmatprep.subr.mxu1 %v8489_v63  ;;  %v8568_v17 = vld [vmem:[#allocation22_spill] sm:$0xff]  ;;  %v6797_v60 = vld [vmem:[%s7783_s3 + $0x1b8] sm:$0xff] }
 0x51f   :  { %2405 = vmatpush1.msra.mxu0 %v8490_v16  ;;  %2476 = vmatpush1.msra.mxu1 %v8491_v45  ;;  %v8569_v63 = vld [vmem:[#allocation46_spill] sm:$0xff]  ;;  %v8570_v45 = vld [vmem:[#allocation24_spill] sm:$0xff] }
 0x520   :  { %2406 = vmatprep.subr.mxu0 %v8492_v26  ;;  %2477 = vmatprep.subr.mxu1 %v8493_v5  ;;  %v6804_v16 = vld [vmem:[%s7783_s3 + $0x1b0] sm:$0xff]  ;;  %v6811_v26 = vld [vmem:[%s7783_s3 + $0x198] sm:$0xff]  ;;  %v8571_v5 = vld [vmem:[#allocation48_spill] sm:$0xff] }
 0x521   :  { %2407 = vmatpush1.msra.mxu0 %v8494_v46  ;;  %2478 = vmatpush1.msra.mxu1 %v8495_v14  ;;  %v6818_v46 = vld [vmem:[%s7783_s3 + $0x190] sm:$0xff] }
 0x522   :  { %v3862_v23 = vpop.eup %3861  ;;  %2408 = vmatprep.subr.mxu0 %v8496_v24  ;;  %2479 = vmatprep.subr.mxu1 %v8497_v25  ;;  %v8572_v14 = vld [vmem:[#allocation26_spill] sm:$0xff]  ;;  %v6825_v24 = vld [vmem:[%s7783_s3 + $0x178] sm:$0xff] }
 0x523   :  { %2409 = vmatpush1.msra.mxu0 %v8498_v27  ;;  %2480 = vmatpush1.msra.mxu1 %v6223_v35  ;;  %v2179_v12 = vmul.f32 %v3862_v23, %v3860_v58  ;;  %v8564_v35 = vld [vmem:[#allocation40_spill] sm:$0xff]  ;;  %v8573_v25 = vld [vmem:[#allocation50_spill] sm:$0xff]  ;;  %v6934_v23 = vld [vmem:[%s7783_s3 + $0xc8] sm:$0xff] }
 0x524   :  { %2410 = vmatprep.subr.mxu0 %v6229_v9  ;;  %2481 = vmatprep.subr.mxu1 %v6235_v41  ;;  %v6769_v9 = vld [vmem:[%s7783_s3 + $0x1f8] sm:$0xff]  ;;  %v8565_v41 = vld [vmem:[#allocation42_spill] sm:$0xff]  ;;  %8589 = vst [vmem:[#allocation32_spill] sm:$0xff] %v6934_v23 }
 0x525   :  { %2411 = vmatpush1.msra.mxu0 %v6241_v0  ;;  %2444 = vmatprep.mubr.f32.mxu0 %v8173_v57  ;;  %v6759_v42 = vsel %vm2186_vm1, %v2179_v12, %v6431_v31  ;;  %v6776_v0 = vld [vmem:[%s7783_s3 + $0x1f0] sm:$0xff]  ;;  %v6838_v31 = vld [vmem:[%s7783_s3 + $0x148] sm:$0xff]  ;;  %v6940_v12 = vld [vmem:[%s7783_s3 + $0xd8] sm:$0xff] }
 0x526   :  { %2482 = vmatpush1.msra.mxu1 %v8563_v10  ;;  %2515 = vmatprep.mubr.f32.mxu1 %v8173_v57  ;;  %v6832_v27 = vld [vmem:[%s7783_s3 + $0x170] sm:$0xff]  ;;  %8590 = vst [vmem:[#allocation33_spill] sm:$0xff] %v6940_v12  ;;  %v6946_v10 = vld [vmem:[%s7783_s3 + $0xc0] sm:$0xff] }
 0x527   :  { %2445 = vmatmul.mubr.f32.vlgmr.msra.gmra.mxu0 %v6759_v42  ;;  %2516 = vmatmul.mubr.f32.vlgmr.msra.gmra.mxu1 %v6759_v42  ;;  %v6928_v58 = vld [vmem:[%s7783_s3 + $0xf0] sm:$0xff]  ;;  %8591 = vst [vmem:[#allocation35_spill] sm:$0xff] %v6946_v10 }
 0x528   :  { %2566 = vmatprep.subr.mxu0 %v8564_v35  ;;  %2637 = vmatprep.subr.mxu1 %v6769_v9  ;;  %8588 = vst [vmem:[#allocation30_spill] sm:$0xff] %v6928_v58 }
 0x529   :  { %2567 = vmatpush1.msra.mxu0 %v8565_v41  ;;  %2638 = vmatpush1.msra.mxu1 %v6776_v0 }
 0x52a   :  { %2568 = vmatprep.subr.mxu0 %v8566_v18  ;;  %2639 = vmatprep.subr.mxu1 %v6783_v1 }
 0x52b   :  { %2569 = vmatpush1.msra.mxu0 %v8567_v20  ;;  %2640 = vmatpush1.msra.mxu1 %v6790_v59 }
 0x52c   :  { %2570 = vmatprep.subr.mxu0 %v8568_v17  ;;  %2641 = vmatprep.subr.mxu1 %v6797_v60 }
 0x52d   :  { %2571 = vmatpush1.msra.mxu0 %v8569_v63  ;;  %2642 = vmatpush1.msra.mxu1 %v6804_v16 }
 0x52e   :  { %2572 = vmatprep.subr.mxu0 %v8570_v45  ;;  %2643 = vmatprep.subr.mxu1 %v6811_v26 }
 0x52f   :  { %2573 = vmatpush1.msra.mxu0 %v8571_v5  ;;  %2644 = vmatpush1.msra.mxu1 %v6818_v46 }
 0x530   :  { %2574 = vmatprep.subr.mxu0 %v8572_v14  ;;  %2645 = vmatprep.subr.mxu1 %v6825_v24 }
 0x531   :  { %2575 = vmatpush1.msra.mxu0 %v8573_v25  ;;  %2646 = vmatpush1.msra.mxu1 %v6832_v27 }
 0x532   :  { %2576 = vmatprep.subr.mxu0 %v6838_v31  ;;  %2647 = vmatprep.subr.mxu1 %v6844_v8 }
 0x533   :  { %2577 = vmatpush1.msra.mxu0 %v6850_v62  ;;  %2648 = vmatpush1.msra.mxu1 %v6856_v15  ;;  %v2371_v62 = vpop.permute.xlu0 %2370 }
 0x534   :  { %2578 = vmatprep.subr.mxu0 %v6862_v22  ;;  %2649 = vmatprep.subr.mxu1 %v6868_v11  ;;  %vm2372_vm2 = vcmp.eq.s32.totalorder %v2371_v62, 1  ;;  %v7166_v62 = vld [vmem:[%s7784_s4 + $0x1d0] sm:$0xff] }
 0x535   :  { %2579 = vmatpush1.msra.mxu0 %v6874_v33  ;;  %2650 = vmatpush1.msra.mxu1 %v6880_v44  ;;  %v71_v33 = vld [vmem:[%s7780_s0 + $0x150] sm:$0xff] }
 0x536   :  { %2580 = vmatprep.subr.mxu0 %v6886_v38  ;;  %2651 = vmatprep.subr.mxu1 %v6892_v37 }
 0x537   :  { %2581 = vmatpush1.msra.mxu0 %v6898_v19  ;;  %2652 = vmatpush1.msra.mxu1 %v6904_v7 }
 0x538   :  { %2582 = vmatprep.subr.mxu0 %v6910_v61  ;;  %2653 = vmatprep.subr.mxu1 %v6916_v34 }
 0x539   :  { %2583 = vmatpush1.msra.mxu0 %v6922_v4  ;;  %2654 = vmatpush1.msra.mxu1 %v6928_v58  ;;  %v6952_v58 = vld [vmem:[%s7783_s3 + $0xd0] sm:$0xff]  ;;  %v69_v4 = vld [vmem:[%s7780_s0 + $0x148] sm:$0xff] }
 0x53a   :  { %2584 = vmatprep.subr.mxu0 %v6934_v23  ;;  %2655 = vmatprep.subr.mxu1 %v6940_v12  ;;  %8592 = vst [vmem:[#allocation37_spill] sm:$0xff] %v6952_v58  ;;  %v6958_v23 = vld [vmem:[%s7783_s3 + $0xa8] sm:$0xff]  ;;  %v6964_v12 = vld [vmem:[%s7783_s3 + $0xb8] sm:$0xff] }
 0x53b   :  { %2585 = vmatpush1.msra.mxu0 %v6946_v10  ;;  %2656 = vmatpush1.msra.mxu1 %v6952_v58  ;;  %8593 = vst [vmem:[#allocation39_spill] sm:$0xff] %v6958_v23  ;;  %8594 = vst [vmem:[#allocation54_spill] sm:$0xff] %v6964_v12  ;;  %v6970_v10 = vld [vmem:[%s7783_s3 + $0xa0] sm:$0xff]  ;;  %v6976_v58 = vld [vmem:[%s7783_s3 + $0xb0] sm:$0xff] }
 0x53c   :  { %2586 = vmatprep.subr.mxu0 %v6958_v23  ;;  %2657 = vmatprep.subr.mxu1 %v6964_v12  ;;  %8595 = vst [vmem:[#allocation41_spill] sm:$0xff] %v6970_v10  ;;  %8596 = vst [vmem:[#allocation56_spill] sm:$0xff] %v6976_v58  ;;  %v6982_v23 = vld [vmem:[%s7783_s3 + $0x88] sm:$0xff]  ;;  %v6988_v12 = vld [vmem:[%s7783_s3 + $0x98] sm:$0xff] }
 0x53d   :  { %2587 = vmatpush1.msra.mxu0 %v6970_v10  ;;  %2658 = vmatpush1.msra.mxu1 %v6976_v58  ;;  %8597 = vst [vmem:[#allocation43_spill] sm:$0xff] %v6982_v23  ;;  %8598 = vst [vmem:[#allocation58_spill] sm:$0xff] %v6988_v12  ;;  %v6994_v10 = vld [vmem:[%s7783_s3 + $0x80] sm:$0xff]  ;;  %v7000_v58 = vld [vmem:[%s7783_s3 + $0x90] sm:$0xff] }
 0x53e   :  { %2588 = vmatprep.subr.mxu0 %v6982_v23  ;;  %2659 = vmatprep.subr.mxu1 %v6988_v12  ;;  %8599 = vst [vmem:[#allocation45_spill] sm:$0xff] %v6994_v10  ;;  %8600 = vst [vmem:[#allocation60_spill] sm:$0xff] %v7000_v58  ;;  %v7006_v23 = vld [vmem:[%s7783_s3 + $0x68] sm:$0xff]  ;;  %v7012_v12 = vld [vmem:[%s7783_s3 + $0x78] sm:$0xff] }
 0x53f   :  { %2589 = vmatpush1.msra.mxu0 %v6994_v10  ;;  %2660 = vmatpush1.msra.mxu1 %v7000_v58  ;;  %8601 = vst [vmem:[#allocation47_spill] sm:$0xff] %v7006_v23  ;;  %8602 = vst [vmem:[#allocation49_spill] sm:$0xff] %v7012_v12  ;;  %v7018_v10 = vld [vmem:[%s7783_s3 + $0x60] sm:$0xff]  ;;  %v7024_v58 = vld [vmem:[%s7783_s3 + $0x70] sm:$0xff] }
 0x540   :  { %2590 = vmatprep.subr.mxu0 %v7006_v23  ;;  %2661 = vmatprep.subr.mxu1 %v7012_v12  ;;  %8603 = vst [vmem:[#allocation51_spill] sm:$0xff] %v7018_v10  ;;  %8604 = vst [vmem:[#allocation67_spill] sm:$0xff] %v7024_v58  ;;  %v7030_v23 = vld [vmem:[%s7783_s3 + $0x48] sm:$0xff]  ;;  %v7036_v12 = vld [vmem:[%s7783_s3 + $0x58] sm:$0xff] }
 0x541   :  { %2591 = vmatpush1.msra.mxu0 %v7018_v10  ;;  %2662 = vmatpush1.msra.mxu1 %v7024_v58  ;;  %8605 = vst [vmem:[#allocation53_spill] sm:$0xff] %v7030_v23  ;;  %8606 = vst [vmem:[#allocation55_spill] sm:$0xff] %v7036_v12  ;;  %v7042_v10 = vld [vmem:[%s7783_s3 + $0x40] sm:$0xff]  ;;  %v7048_v58 = vld [vmem:[%s7783_s3 + $0x50] sm:$0xff] }
 0x542   :  { %2592 = vmatprep.subr.mxu0 %v7030_v23  ;;  %2663 = vmatprep.subr.mxu1 %v7036_v12  ;;  %8607 = vst [vmem:[#allocation57_spill] sm:$0xff] %v7042_v10  ;;  %8608 = vst [vmem:[#allocation61_spill] sm:$0xff] %v7048_v58  ;;  %v7054_v23 = vld [vmem:[%s7783_s3 + $0x28] sm:$0xff]  ;;  %v7060_v12 = vld [vmem:[%s7783_s3 + $0x38] sm:$0xff] }
 0x543   :  { %2593 = vmatpush1.msra.mxu0 %v7042_v10  ;;  %2664 = vmatpush1.msra.mxu1 %v7048_v58  ;;  %8609 = vst [vmem:[#allocation80_spill] sm:$0xff] %v7054_v23  ;;  %8610 = vst [vmem:[#allocation81_spill] sm:$0xff] %v7060_v12  ;;  %v7066_v10 = vld [vmem:[%s7783_s3 + $0x20] sm:$0xff]  ;;  %v7072_v58 = vld [vmem:[%s7783_s3 + $0x30] sm:$0xff] }
 0x544   :  { %2594 = vmatprep.subr.mxu0 %v7054_v23  ;;  %2665 = vmatprep.subr.mxu1 %v7060_v12  ;;  %8611 = vst [vmem:[#allocation70_spill] sm:$0xff] %v7066_v10  ;;  %8612 = vst [vmem:[#allocation72_spill] sm:$0xff] %v7072_v58  ;;  %v7078_v23 = vld [vmem:[%s7783_s3 + $0x8] sm:$0xff]  ;;  %v7084_v12 = vld [vmem:[%s7783_s3 + $0x18] sm:$0xff] }
 0x545   :  { %2595 = vmatpush1.msra.mxu0 %v7066_v10  ;;  %2666 = vmatpush1.msra.mxu1 %v7072_v58  ;;  %8613 = vst [vmem:[#allocation74_spill] sm:$0xff] %v7078_v23  ;;  %8614 = vst [vmem:[#allocation76_spill] sm:$0xff] %v7084_v12  ;;  %v7090_v10 = vld [vmem:[%s7783_s3] sm:$0xff] }
 0x546   :  { %2596 = vmatprep.subr.mxu0 %v7078_v23  ;;  %2667 = vmatprep.subr.mxu1 %v7084_v12  ;;  %8615 = vst [vmem:[#allocation78_spill] sm:$0xff] %v7090_v10  ;;  %v7097_v23 = vld [vmem:[%s7783_s3 + $0x10] sm:$0xff]  ;;  %v7104_v12 = vld [vmem:[%s7784_s4 + $0x1e8] sm:$0xff] }
 0x547   :  { %2597 = vmatpush1.msra.mxu0 %v7090_v10  ;;  %2630 = vmatprep.mubr.f32.mxu0 %v8173_v57  ;;  %8616 = vst [vmem:[#allocation8_spill] sm:$0xff] %v7097_v23  ;;  %8617 = vst [vmem:[#allocation14_spill] sm:$0xff] %v7104_v12  ;;  %v7110_v10 = vld [vmem:[%s7784_s4 + $0x1f8] sm:$0xff] }
 0x548   :  { %2668 = vmatpush1.msra.mxu1 %v7097_v23  ;;  %2701 = vmatprep.mubr.f32.mxu1 %v8173_v57  ;;  %8618 = vst [vmem:[#allocation9_spill] sm:$0xff] %v7110_v10  ;;  %v67_v23 = vld [vmem:[%s7780_s0 + $0x140] sm:$0xff] }
 0x549   :  { %2750 = vmatprep.subr.mxu0 %v7104_v12  ;;  %2821 = vmatprep.subr.mxu1 %v7110_v10  ;;  %v73_v10 = vld [vmem:[%s7780_s0 + $0x158] sm:$0xff] }
 0x5c6   :  { %v2262_v58 = vpop.f32.mrf.mxu0  ;;  %v2333_v19 = vpop.f32.mrf.mxu1 }
 0x5c7   :  { %v2338_v34 = vadd.f32 %v2262_v58, %v67_v23  ;;  %v2340_v58 = vadd.f32 %v2333_v19, %v71_v33 }
 0x5c8   :  { %v2264_v61 = vpop.f32.mrf.mxu0  ;;  %v2335_v38 = vpop.f32.mrf.mxu1 }
 0x5c9   :  { %v3570_v7 = vmul.f32 -1.442695, %v2338_v34  ;;  %v2339_v12 = vadd.f32 %v2264_v61, %v69_v4  ;;  %v2341_v44 = vadd.f32 %v2335_v38, %v73_v10  ;;  %v3517_v4 = vld [vmem:[%s7781_s1 + $0xa8] sm:$0xff] }
 0x5cb   :  { %3863 = vpow2.f32 %v3570_v7  ;;  %v3571_v37 = vmul.f32 -1.442695, %v2339_v12  ;;  %v3572_v11 = vmul.f32 -1.442695, %v2341_v44 }
 0x5cd   :  { %3865 = vpow2.f32 %v3571_v37  ;;  %v3516_v37 = vld [vmem:[%s7781_s1 + $0xa0] sm:$0xff] }
 0x5ce   :  { %3867 = vpow2.f32 %v3572_v11 }
 0x5d8   :  { %v3864_v22 = vpop.eup %3863 }
 0x5d9   :  { %v2345_v23 = vadd.f32 1.0, %v3864_v22 }
 0x5da   :  { %v3866_v34 = vpop.eup %3865 }
 0x5db   :  { %3869 = vrcp.f32 %v2345_v23  ;;  %v2351_v7 = vadd.f32 1.0, %v3866_v34  ;;  %v3868_v61 = vpop.eup %3867 }
 0x5dc   :  { %3871 = vtanh.f32 %v2340_v58  ;;  %v2358_v34 = vadd.f32 1.0, %v3868_v61  ;;  %v3518_v61 = vld [vmem:[%s7781_s1 + $0xb0] sm:$0xff] }
 0x5dd   :  { %3873 = vrcp.f32 %v2351_v7 }
 0x5e7   :  { %v2446_v38 = vpop.f32.mrf.mxu0  ;;  %v2517_v7 = vpop.f32.mrf.mxu1 }
 0x5e8   :  { %v3870_v44 = vpop.eup %3869  ;;  %v2522_v12 = vadd.f32 %v3516_v37, %v2446_v38  ;;  %v3519_v38 = vld [vmem:[%s7781_s1 + $0xb8] sm:$0xff] }
 0x5e9   :  { %v3872_v33 = vpop.eup %3871  ;;  %v2448_v22 = vpop.f32.mrf.mxu0 }
 0x5ea   :  { %v3874_v19 = vpop.eup %3873  ;;  %v3573_v11 = vmul.f32 -1.442695, %v2522_v12  ;;  %v2523_v10 = vadd.f32 %v3517_v4, %v2448_v22  ;;  %v2362_v23 = vmul.f32 %v3872_v33, %v3870_v44  ;;  %v2519_v4 = vpop.f32.mrf.mxu1  ;;  %v2524_v22 = vadd.f32 %v3518_v61, %v2517_v7  ;;  %v7180_v7 = vld [vmem:[%s7784_s4 + $0x1b0] sm:$0xff] }
 0x5eb   :  { %v2361_v58 = vmul.f32 %v3874_v19, %v6576_v56  ;;  %v2525_v44 = vadd.f32 %v3519_v38, %v2519_v4  ;;  %v7187_v38 = vld [vmem:[%s7784_s4 + $0x198] sm:$0xff] }
 0x5ec   :  { %3875 = vpow2.f32 %v3573_v11  ;;  %v3574_v15 = vmul.f32 -1.442695, %v2523_v10 }
 0x5ed   :  { %v2363_v8 = vadd.f32 %v2362_v23, %v2361_v58  ;;  %v3575_v12 = vmul.f32 -1.442695, %v2525_v44  ;;  %v7152_v58 = vld [vmem:[%s7784_s4 + $0x1f0] sm:$0xff] }
 0x5ee   :  { %3877 = vpow2.f32 %v3574_v15  ;;  %v7194_v44 = vld [vmem:[%s7784_s4 + $0x190] sm:$0xff] }
 0x5ef   :  { %3879 = vrcp.f32 %v2358_v34  ;;  %v7134_v37 = vsel %vm2372_vm2, %v2363_v8, %v6576_v56  ;;  %v7173_v34 = vld [vmem:[%s7784_s4 + $0x1b8] sm:$0xff] }
 0x5f0   :  { %3881 = vtanh.f32 %v2363_v8 }
 0x5f1   :  { %3883 = vpow2.f32 %v3575_v12  ;;  %v7201_v12 = vld [vmem:[%s7784_s4 + $0x178] sm:$0xff] }
 0x5f9   :  { %v3876_v33 = vpop.eup %3875 }
 0x5fa   :  { %v2529_v15 = vadd.f32 1.0, %v3876_v33 }
 0x5fb   :  { %v3878_v19 = vpop.eup %3877 }
 0x5fc   :  { %v3880_v11 = vpop.eup %3879  ;;  %3885 = vrcp.f32 %v2529_v15  ;;  %v2535_v56 = vadd.f32 1.0, %v3878_v19 }
 0x5fd   :  { %v3882_v10 = vpop.eup %3881  ;;  %3887 = vtanh.f32 %v2524_v22  ;;  %v7208_v22 = vld [vmem:[%s7784_s4 + $0x170] sm:$0xff] }
 0x5fe   :  { %3889 = vrcp.f32 %v2535_v56  ;;  %v2365_v23 = vmul.f32 %v3882_v10, %v3880_v11  ;;  %v3884_v4 = vpop.eup %3883  ;;  %v7215_v11 = vld [vmem:[%s7784_s4 + $0x158] sm:$0xff] }
 0x5ff   :  { %v2542_v19 = vadd.f32 1.0, %v3884_v4  ;;  %v7230_v4 = vld [vmem:[%s7784_s4 + $0x138] sm:$0xff] }
 0x600   :  { %v7144_v8 = vsel %vm2372_vm2, %v2365_v23, %v6586_v2  ;;  %v7159_v2 = vld [vmem:[%s7784_s4 + $0x1d8] sm:$0xff]  ;;  %v7223_v23 = vld [vmem:[%s7784_s4 + $0x150] sm:$0xff]  ;;  %8619 = vst [vmem:[#allocation16_spill] sm:$0xff] %v7230_v4 }
 0x601   :  { %2631 = vmatmul.mubr.f32.vlgmr.msra.gmra.mxu0 %v7144_v8  ;;  %2702 = vmatmul.mubr.f32.vlgmr.msra.gmra.mxu1 %v7144_v8  ;;  %3891 = vrcp.f32 %v2542_v19 }
 0x602   :  { %2751 = vmatpush1.msra.mxu0 %v6593_v29  ;;  %2822 = vmatpush1.msra.mxu1 %v7152_v58 }
 0x603   :  { %2752 = vmatprep.subr.mxu0 %v6600_v49  ;;  %2823 = vmatprep.subr.mxu1 %v7159_v2 }
 0x604   :  { %2753 = vmatpush1.msra.mxu0 %v6607_v55  ;;  %2824 = vmatpush1.msra.mxu1 %v7166_v62 }
 0x605   :  { %2754 = vmatprep.subr.mxu0 %v6614_v52  ;;  %2825 = vmatprep.subr.mxu1 %v7173_v34 }
 0x606   :  { %2755 = vmatpush1.msra.mxu0 %v6621_v21  ;;  %2826 = vmatpush1.msra.mxu1 %v7180_v7 }
 0x607   :  { %2756 = vmatprep.subr.mxu0 %v6628_v28  ;;  %2827 = vmatprep.subr.mxu1 %v7187_v38 }
 0x608   :  { %2757 = vmatpush1.msra.mxu0 %v6635_v48  ;;  %2828 = vmatpush1.msra.mxu1 %v7194_v44 }
 0x609   :  { %v3886_v61 = vpop.eup %3885  ;;  %2758 = vmatprep.subr.mxu0 %v6642_v13  ;;  %2829 = vmatprep.subr.mxu1 %v7201_v12 }
 0x60a   :  { %v3888_v33 = vpop.eup %3887  ;;  %2759 = vmatpush1.msra.mxu0 %v6649_v47  ;;  %2830 = vmatpush1.msra.mxu1 %v7208_v22 }
 0x60b   :  { %v3890_v15 = vpop.eup %3889  ;;  %2760 = vmatprep.subr.mxu0 %v6656_v53  ;;  %2831 = vmatprep.subr.mxu1 %v7215_v11  ;;  %v2546_v56 = vmul.f32 %v3888_v33, %v3886_v61  ;;  %v7233_v61 = vpop.permute.xlu1 %2554 }
 0x60c   :  { %v2545_v10 = vmul.f32 %v3890_v15, %v6698_v30  ;;  %2761 = vmatpush1.msra.mxu0 %v6664_v40  ;;  %2832 = vmatpush1.msra.mxu1 %v7223_v23  ;;  %v7239_v15 = vld [vmem:[%s7784_s4 + $0x130] sm:$0xff]  ;;  %vm2556_vm3 = vcmp.eq.s32.totalorder %v7233_v61, 1  ;;  %v8665_v61 = vld [vmem:[#allocation43_spill] sm:$0xff] }
 0x60d   :  { %2762 = vmatprep.subr.mxu0 %v6671_v32  ;;  %2833 = vmatprep.subr.mxu1 %v7230_v4  ;;  %v7247_v4 = vld [vmem:[%s7784_s4 + $0x118] sm:$0xff] }
 0x60e   :  { %v2547_v33 = vadd.f32 %v2546_v56, %v2545_v10  ;;  %2763 = vmatpush1.msra.mxu0 %v6678_v39  ;;  %2834 = vmatpush1.msra.mxu1 %v7239_v15  ;;  %v7254_v56 = vld [vmem:[%s7784_s4 + $0x110] sm:$0xff]  ;;  %v7266_v10 = vld [vmem:[%s7784_s4 + $0xf8] sm:$0xff] }
 0x60f   :  { %2764 = vmatprep.subr.mxu0 %v6685_v54  ;;  %2835 = vmatprep.subr.mxu1 %v7247_v4  ;;  %8620 = vst [vmem:[#allocation10_spill] sm:$0xff] %v7254_v56 }
 0x610   :  { %2765 = vmatpush1.msra.mxu0 %v6692_v36  ;;  %2836 = vmatpush1.msra.mxu1 %v7254_v56  ;;  %3893 = vtanh.f32 %v2547_v33  ;;  %v7260_v19 = vsel %vm2556_vm3, %v2547_v33, %v6698_v30  ;;  %v7273_v56 = vld [vmem:[%s7784_s4 + $0xf0] sm:$0xff]  ;;  %v7280_v30 = vld [vmem:[%s7784_s4 + $0xd8] sm:$0xff] }
 0x611   :  { %2766 = vmatprep.subr.mxu0 %v6703_v51  ;;  %2837 = vmatprep.subr.mxu1 %v7266_v10  ;;  %8621 = vst [vmem:[#allocation18_spill] sm:$0xff] %v7273_v56  ;;  %8622 = vst [vmem:[#allocation11_spill] sm:$0xff] %v7280_v30  ;;  %v7287_v33 = vld [vmem:[%s7784_s4 + $0xd0] sm:$0xff] }
 0x612   :  { %2767 = vmatpush1.msra.mxu0 %v6710_v3  ;;  %2838 = vmatpush1.msra.mxu1 %v7273_v56  ;;  %8623 = vst [vmem:[#allocation21_spill] sm:$0xff] %v7287_v33  ;;  %v7390_v56 = vld [vmem:[%s7784_s4 + $0x38] sm:$0xff]  ;;  %v7408_v3 = vld [vmem:[%s7784_s4 + $0x8] sm:$0xff] }
 0x613   :  { %2768 = vmatprep.subr.mxu0 %v6717_v43  ;;  %2839 = vmatprep.subr.mxu1 %v7280_v30  ;;  %v7294_v43 = vld [vmem:[%s7784_s4 + $0xb8] sm:$0xff]  ;;  %v7372_v30 = vld [vmem:[%s7784_s4 + $0x40] sm:$0xff]  ;;  %8640 = vst [vmem:[#allocation20_spill] sm:$0xff] %v7390_v56 }
 0x614   :  { %2769 = vmatpush1.msra.mxu0 %v6724_v6  ;;  %2840 = vmatpush1.msra.mxu1 %v7287_v33  ;;  %8624 = vst [vmem:[#allocation12_spill] sm:$0xff] %v7294_v43  ;;  %v7300_v6 = vld [vmem:[%s7784_s4 + $0xa0] sm:$0xff]  ;;  %v7306_v33 = vld [vmem:[%s7784_s4 + $0xb0] sm:$0xff]  ;;  %8637 = vst [vmem:[#allocation85_spill] sm:$0xff] %v7372_v30 }
 0x615   :  { %2770 = vmatprep.subr.mxu0 %v6731_v50  ;;  %2841 = vmatprep.subr.mxu1 %v7294_v43  ;;  %8625 = vst [vmem:[#allocation23_spill] sm:$0xff] %v7300_v6  ;;  %8626 = vst [vmem:[#allocation13_spill] sm:$0xff] %v7306_v33  ;;  %v7312_v50 = vld [vmem:[%s7784_s4 + $0x88] sm:$0xff]  ;;  %v7318_v43 = vld [vmem:[%s7784_s4 + $0x98] sm:$0xff] }
 0x616   :  { %2771 = vmatpush1.msra.mxu0 %v7300_v6  ;;  %2842 = vmatpush1.msra.mxu1 %v7306_v33  ;;  %8627 = vst [vmem:[#allocation25_spill] sm:$0xff] %v7312_v50  ;;  %8628 = vst [vmem:[#allocation15_spill] sm:$0xff] %v7318_v43  ;;  %v7324_v6 = vld [vmem:[%s7784_s4 + $0x80] sm:$0xff]  ;;  %v7330_v33 = vld [vmem:[%s7784_s4 + $0x90] sm:$0xff] }
 0x617   :  { %2772 = vmatprep.subr.mxu0 %v7312_v50  ;;  %2843 = vmatprep.subr.mxu1 %v7318_v43  ;;  %8629 = vst [vmem:[#allocation27_spill] sm:$0xff] %v7324_v6  ;;  %8630 = vst [vmem:[#allocation17_spill] sm:$0xff] %v7330_v33  ;;  %v7336_v50 = vld [vmem:[%s7784_s4 + $0x68] sm:$0xff]  ;;  %v7342_v43 = vld [vmem:[%s7784_s4 + $0x78] sm:$0xff] }
 0x618   :  { %2773 = vmatpush1.msra.mxu0 %v7324_v6  ;;  %2844 = vmatpush1.msra.mxu1 %v7330_v33  ;;  %8631 = vst [vmem:[#allocation29_spill] sm:$0xff] %v7336_v50  ;;  %8632 = vst [vmem:[#allocation19_spill] sm:$0xff] %v7342_v43  ;;  %v7348_v6 = vld [vmem:[%s7784_s4 + $0x60] sm:$0xff]  ;;  %v7354_v33 = vld [vmem:[%s7784_s4 + $0x70] sm:$0xff] }
 0x619   :  { %2774 = vmatprep.subr.mxu0 %v7336_v50  ;;  %2845 = vmatprep.subr.mxu1 %v7342_v43  ;;  %8633 = vst [vmem:[#allocation31_spill] sm:$0xff] %v7348_v6  ;;  %8634 = vst [vmem:[#allocation34_spill] sm:$0xff] %v7354_v33  ;;  %v7360_v50 = vld [vmem:[%s7784_s4 + $0x48] sm:$0xff]  ;;  %v7366_v43 = vld [vmem:[%s7784_s4 + $0x58] sm:$0xff] }
 0x61a   :  { %2775 = vmatpush1.msra.mxu0 %v7348_v6  ;;  %2846 = vmatpush1.msra.mxu1 %v7354_v33  ;;  %8635 = vst [vmem:[#allocation36_spill] sm:$0xff] %v7360_v50  ;;  %8636 = vst [vmem:[#allocation38_spill] sm:$0xff] %v7366_v43  ;;  %v3892_v6 = vpop.eup %3891  ;;  %v7378_v33 = vld [vmem:[%s7784_s4 + $0x50] sm:$0xff] }
 0x61b   :  { %2776 = vmatprep.subr.mxu0 %v7360_v50  ;;  %2847 = vmatprep.subr.mxu1 %v7366_v43  ;;  %8638 = vst [vmem:[#allocation40_spill] sm:$0xff] %v7378_v33  ;;  %v7384_v43 = vld [vmem:[%s7784_s4 + $0x28] sm:$0xff] }
 0x61c   :  { %2777 = vmatpush1.msra.mxu0 %v7372_v30  ;;  %2848 = vmatpush1.msra.mxu1 %v7378_v33  ;;  %8639 = vst [vmem:[#allocation42_spill] sm:$0xff] %v7384_v43  ;;  %v7396_v30 = vld [vmem:[%s7784_s4 + $0x20] sm:$0xff]  ;;  %v7402_v33 = vld [vmem:[%s7784_s4 + $0x30] sm:$0xff] }
 0x61d   :  { %v3894_v50 = vpop.eup %3893  ;;  %2778 = vmatprep.subr.mxu0 %v7384_v43  ;;  %2849 = vmatprep.subr.mxu1 %v7390_v56  ;;  %8641 = vst [vmem:[#allocation44_spill] sm:$0xff] %v7396_v30  ;;  %v7414_v56 = vld [vmem:[%s7784_s4 + $0x18] sm:$0xff] }
 0x61e   :  { %2779 = vmatpush1.msra.mxu0 %v7396_v30  ;;  %2850 = vmatpush1.msra.mxu1 %v7402_v33  ;;  %v2549_v43 = vmul.f32 %v3894_v50, %v3892_v6  ;;  %v7420_v30 = vld [vmem:[%s7784_s4] sm:$0xff]  ;;  %v7432_v50 = vld [vmem:[%s7784_s4 + $0x10] sm:$0xff] }
 0x61f   :  { %2780 = vmatprep.subr.mxu0 %v7408_v3  ;;  %2851 = vmatprep.subr.mxu1 %v7414_v56 }
 0x620   :  { %2781 = vmatpush1.msra.mxu0 %v7420_v30  ;;  %2814 = vmatprep.mubr.f32.mxu0 %v8173_v57  ;;  %v7427_v6 = vsel %vm2556_vm3, %v2549_v43, %v6759_v42  ;;  %v8642_v43 = vld [vmem:[#allocation71_spill] sm:$0xff]  ;;  %v8643_v42 = vld [vmem:[#allocation73_spill] sm:$0xff] }
 0x621   :  { %2852 = vmatpush1.msra.mxu1 %v7432_v50  ;;  %2885 = vmatprep.mubr.f32.mxu1 %v8173_v57 }
 0x622   :  { %2815 = vmatmul.mubr.f32.vlgmr.msra.gmra.mxu0 %v7427_v6  ;;  %2886 = vmatmul.mubr.f32.vlgmr.msra.gmra.mxu1 %v7427_v6 }
 0x623   :  { %2936 = vmatprep.subr.mxu0 %v8564_v35  ;;  %3007 = vmatprep.subr.mxu1 %v6769_v9  ;;  %v8644_v35 = vld [vmem:[#allocation59_spill] sm:$0xff] }
 0x624   :  { %2937 = vmatpush1.msra.mxu0 %v8565_v41  ;;  %3008 = vmatpush1.msra.mxu1 %v6776_v0  ;;  %v8645_v9 = vld [vmem:[#allocation75_spill] sm:$0xff]  ;;  %v8646_v41 = vld [vmem:[#allocation77_spill] sm:$0xff]  ;;  %v8647_v0 = vld [vmem:[#allocation62_spill] sm:$0xff] }
 0x625   :  { %2938 = vmatprep.subr.mxu0 %v8566_v18  ;;  %3009 = vmatprep.subr.mxu1 %v6783_v1  ;;  %v8648_v18 = vld [vmem:[#allocation79_spill] sm:$0xff]  ;;  %v8649_v1 = vld [vmem:[#allocation64_spill] sm:$0xff] }
 0x626   :  { %2939 = vmatpush1.msra.mxu0 %v8567_v20  ;;  %3010 = vmatpush1.msra.mxu1 %v6790_v59  ;;  %v8650_v20 = vld [vmem:[#allocation66_spill] sm:$0xff]  ;;  %v8651_v59 = vld [vmem:[#allocation68_spill] sm:$0xff] }
 0x627   :  { %2940 = vmatprep.subr.mxu0 %v8568_v17  ;;  %3011 = vmatprep.subr.mxu1 %v6797_v60  ;;  %v8652_v17 = vld [vmem:[#allocation82_spill] sm:$0xff]  ;;  %v8653_v60 = vld [vmem:[#allocation83_spill] sm:$0xff] }
 0x628   :  { %2941 = vmatpush1.msra.mxu0 %v8569_v63  ;;  %3012 = vmatpush1.msra.mxu1 %v6804_v16  ;;  %v8654_v63 = vld [vmem:[#allocation84_spill] sm:$0xff] }
 0x629   :  { %2942 = vmatprep.subr.mxu0 %v8570_v45  ;;  %3013 = vmatprep.subr.mxu1 %v6811_v26  ;;  %v8655_v16 = vld [vmem:[#allocation28_spill] sm:$0xff]  ;;  %v8656_v45 = vld [vmem:[#allocation30_spill] sm:$0xff] }
 0x62a   :  { %2943 = vmatpush1.msra.mxu0 %v8571_v5  ;;  %3014 = vmatpush1.msra.mxu1 %v6818_v46  ;;  %v8657_v26 = vld [vmem:[#allocation32_spill] sm:$0xff]  ;;  %v8658_v5 = vld [vmem:[#allocation33_spill] sm:$0xff]  ;;  %v8659_v46 = vld [vmem:[#allocation35_spill] sm:$0xff] }
 0x62b   :  { %2944 = vmatprep.subr.mxu0 %v8572_v14  ;;  %3015 = vmatprep.subr.mxu1 %v6825_v24  ;;  %v8660_v14 = vld [vmem:[#allocation37_spill] sm:$0xff]  ;;  %v8661_v24 = vld [vmem:[#allocation39_spill] sm:$0xff] }
 0x62c   :  { %2945 = vmatpush1.msra.mxu0 %v8573_v25  ;;  %3016 = vmatpush1.msra.mxu1 %v6832_v27  ;;  %v8662_v25 = vld [vmem:[#allocation54_spill] sm:$0xff]  ;;  %v8663_v27 = vld [vmem:[#allocation41_spill] sm:$0xff] }
 0x62d   :  { %2946 = vmatprep.subr.mxu0 %v6838_v31  ;;  %3017 = vmatprep.subr.mxu1 %v8642_v43  ;;  %v8664_v31 = vld [vmem:[#allocation56_spill] sm:$0xff]  ;;  %v8666_v43 = vld [vmem:[#allocation58_spill] sm:$0xff] }
 0x62e   :  { %2947 = vmatpush1.msra.mxu0 %v8643_v42  ;;  %3018 = vmatpush1.msra.mxu1 %v8644_v35  ;;  %v8667_v42 = vld [vmem:[#allocation45_spill] sm:$0xff]  ;;  %v8668_v35 = vld [vmem:[#allocation60_spill] sm:$0xff] }
 0x62f   :  { %2948 = vmatprep.subr.mxu0 %v8645_v9  ;;  %3019 = vmatprep.subr.mxu1 %v8646_v41  ;;  %v8669_v9 = vld [vmem:[#allocation47_spill] sm:$0xff]  ;;  %v8670_v41 = vld [vmem:[#allocation49_spill] sm:$0xff] }
 0x630   :  { %2949 = vmatpush1.msra.mxu0 %v8647_v0  ;;  %3020 = vmatpush1.msra.mxu1 %v8648_v18  ;;  %v8671_v0 = vld [vmem:[#allocation51_spill] sm:$0xff] }
 0x631   :  { %2950 = vmatprep.subr.mxu0 %v8649_v1  ;;  %3021 = vmatprep.subr.mxu1 %v8650_v20  ;;  %v8672_v18 = vld [vmem:[#allocation67_spill] sm:$0xff]  ;;  %v8673_v1 = vld [vmem:[#allocation53_spill] sm:$0xff] }
 0x632   :  { %2951 = vmatpush1.msra.mxu0 %v8651_v59  ;;  %3022 = vmatpush1.msra.mxu1 %v8652_v17  ;;  %v8674_v20 = vld [vmem:[#allocation55_spill] sm:$0xff]  ;;  %v8675_v59 = vld [vmem:[#allocation57_spill] sm:$0xff] }
 0x633   :  { %2952 = vmatprep.subr.mxu0 %v8653_v60  ;;  %3023 = vmatprep.subr.mxu1 %v8654_v63  ;;  %v8676_v17 = vld [vmem:[#allocation61_spill] sm:$0xff]  ;;  %v8677_v60 = vld [vmem:[#allocation80_spill] sm:$0xff] }
 0x634   :  { %2953 = vmatpush1.msra.mxu0 %v8655_v16  ;;  %3024 = vmatpush1.msra.mxu1 %v8656_v45  ;;  %v8678_v63 = vld [vmem:[#allocation81_spill] sm:$0xff]  ;;  %v8679_v16 = vld [vmem:[#allocation70_spill] sm:$0xff]  ;;  %v8680_v45 = vld [vmem:[#allocation72_spill] sm:$0xff] }
 0x635   :  { %2954 = vmatprep.subr.mxu0 %v8657_v26  ;;  %3025 = vmatprep.subr.mxu1 %v8658_v5  ;;  %v8681_v26 = vld [vmem:[#allocation74_spill] sm:$0xff]  ;;  %v8682_v5 = vld [vmem:[#allocation76_spill] sm:$0xff] }
 0x636   :  { %2955 = vmatpush1.msra.mxu0 %v8659_v46  ;;  %3026 = vmatpush1.msra.mxu1 %v8660_v14  ;;  %v8683_v46 = vld [vmem:[#allocation78_spill] sm:$0xff]  ;;  %v8684_v14 = vld [vmem:[#allocation8_spill] sm:$0xff] }
 0x637   :  { %2956 = vmatprep.subr.mxu0 %v8661_v24  ;;  %3027 = vmatprep.subr.mxu1 %v8662_v25  ;;  %v8685_v24 = vld [vmem:[#allocation14_spill] sm:$0xff]  ;;  %v8686_v25 = vld [vmem:[#allocation9_spill] sm:$0xff] }
 0x638   :  { %2957 = vmatpush1.msra.mxu0 %v8663_v27  ;;  %3028 = vmatpush1.msra.mxu1 %v8664_v31  ;;  %v75_v27 = vld [vmem:[%s7780_s0 + $0x180] sm:$0xff] }
 0x639   :  { %2958 = vmatprep.subr.mxu0 %v8665_v61  ;;  %3029 = vmatprep.subr.mxu1 %v8666_v43  ;;  %v77_v61 = vld [vmem:[%s7780_s0 + $0x188] sm:$0xff] }
 0x63a   :  { %2959 = vmatpush1.msra.mxu0 %v8667_v42  ;;  %3030 = vmatpush1.msra.mxu1 %v8668_v35 }
 0x63b   :  { %2960 = vmatprep.subr.mxu0 %v8669_v9  ;;  %3031 = vmatprep.subr.mxu1 %v8670_v41 }
 0x63c   :  { %2961 = vmatpush1.msra.mxu0 %v8671_v0  ;;  %3032 = vmatpush1.msra.mxu1 %v8672_v18  ;;  %v81_v18 = vld [vmem:[%s7780_s0 + $0x198] sm:$0xff] }
 0x63d   :  { %2962 = vmatprep.subr.mxu0 %v8673_v1  ;;  %3033 = vmatprep.subr.mxu1 %v8674_v20 }
 0x63e   :  { %2963 = vmatpush1.msra.mxu0 %v8675_v59  ;;  %3034 = vmatpush1.msra.mxu1 %v8676_v17  ;;  %v79_v59 = vld [vmem:[%s7780_s0 + $0x190] sm:$0xff] }
 0x63f   :  { %2964 = vmatprep.subr.mxu0 %v8677_v60  ;;  %3035 = vmatprep.subr.mxu1 %v8678_v63 }
 0x640   :  { %2965 = vmatpush1.msra.mxu0 %v8679_v16  ;;  %3036 = vmatpush1.msra.mxu1 %v8680_v45 }
 0x641   :  { %2966 = vmatprep.subr.mxu0 %v8681_v26  ;;  %3037 = vmatprep.subr.mxu1 %v8682_v5  ;;  %v3512_v5 = vld [vmem:[%s7781_s1 + $0x60] sm:$0xff] }
 0x642   :  { %2967 = vmatpush1.msra.mxu0 %v8683_v46  ;;  %3000 = vmatprep.mubr.f32.mxu0 %v8173_v57 }
 0x643   :  { %3038 = vmatpush1.msra.mxu1 %v8684_v14  ;;  %3071 = vmatprep.mubr.f32.mxu1 %v8173_v57 }
 0x644   :  { %3119 = vmatprep.subr.mxu0 %v8685_v24  ;;  %3190 = vmatprep.subr.mxu1 %v8686_v25  ;;  %v3513_v24 = vld [vmem:[%s7781_s1 + $0x68] sm:$0xff] }
 0x6c1   :  { %v2632_v31 = vpop.f32.mrf.mxu0  ;;  %v2703_v41 = vpop.f32.mrf.mxu1 }
 0x6c2   :  { %v2708_v43 = vadd.f32 %v2632_v31, %v75_v27  ;;  %v2710_v63 = vadd.f32 %v2703_v41, %v79_v59 }
 0x6c3   :  { %v2634_v42 = vpop.f32.mrf.mxu0  ;;  %v2705_v1 = vpop.f32.mrf.mxu1 }
 0x6c4   :  { %v3576_v35 = vmul.f32 -1.442695, %v2708_v43  ;;  %v2709_v9 = vadd.f32 %v2634_v42, %v77_v61  ;;  %v2711_v20 = vadd.f32 %v2705_v1, %v81_v18 }
 0x6c6   :  { %3895 = vpow2.f32 %v3576_v35  ;;  %v3577_v0 = vmul.f32 -1.442695, %v2709_v9  ;;  %v3578_v17 = vmul.f32 -1.442695, %v2711_v20  ;;  %v2741_v20 = vpop.permute.xlu0 %2740 }
 0x6c7   :  { %vm2742_vm4 = vcmp.eq.s32.totalorder %v2741_v20, 1 }
 0x6c8   :  { %3897 = vpow2.f32 %v3577_v0 }
 0x6c9   :  { %3899 = vpow2.f32 %v3578_v17 }
 0x6d3   :  { %v3896_v60 = vpop.eup %3895 }
 0x6d4   :  { %v2715_v16 = vadd.f32 1.0, %v3896_v60  ;;  %v3515_v60 = vld [vmem:[%s7781_s1 + $0x78] sm:$0xff] }
 0x6d5   :  { %v3898_v45 = vpop.eup %3897 }
 0x6d6   :  { %3901 = vrcp.f32 %v2715_v16  ;;  %v2721_v26 = vadd.f32 1.0, %v3898_v45  ;;  %v3900_v46 = vpop.eup %3899  ;;  %v3514_v45 = vld [vmem:[%s7781_s1 + $0x70] sm:$0xff] }
 0x6d7   :  { %3903 = vtanh.f32 %v2710_v63  ;;  %v2728_v0 = vadd.f32 1.0, %v3900_v46 }
 0x6d8   :  { %3905 = vrcp.f32 %v2721_v26 }
 0x6e2   :  { %v2816_v14 = vpop.f32.mrf.mxu0  ;;  %v2887_v18 = vpop.f32.mrf.mxu1 }
 0x6e3   :  { %v3902_v25 = vpop.eup %3901  ;;  %v2892_v27 = vadd.f32 %v3512_v5, %v2816_v14  ;;  %v2894_v46 = vadd.f32 %v3514_v45, %v2887_v18  ;;  %v8713_v18 = vld [vmem:[#allocation44_spill] sm:$0xff]  ;;  %v3310_v45 = vld [vmem:[%s7785_s5 + $0x28] sm:$0xff] }
 0x6e4   :  { %v3904_v31 = vpop.eup %3903  ;;  %v2818_v61 = vpop.f32.mrf.mxu0 }
 0x6e5   :  { %v3906_v43 = vpop.eup %3905  ;;  %v3579_v42 = vmul.f32 -1.442695, %v2892_v27  ;;  %v2893_v35 = vadd.f32 %v3513_v24, %v2818_v61  ;;  %v2732_v9 = vmul.f32 %v3904_v31, %v3902_v25  ;;  %v2889_v63 = vpop.f32.mrf.mxu1 }
 0x6e6   :  { %v2731_v41 = vmul.f32 %v3906_v43, %v7134_v37  ;;  %v2895_v16 = vadd.f32 %v3515_v60, %v2889_v63  ;;  %v3313_v60 = vld [vmem:[%s7785_s5 + $0x40] sm:$0xff]  ;;  %v3312_v63 = vld [vmem:[%s7785_s5 + $0x38] sm:$0xff] }
 0x6e7   :  { %3907 = vpow2.f32 %v3579_v42  ;;  %v3580_v1 = vmul.f32 -1.442695, %v2893_v35  ;;  %v8709_v42 = vld [vmem:[#allocation85_spill] sm:$0xff]  ;;  %v8710_v35 = vld [vmem:[#allocation40_spill] sm:$0xff] }
 0x6e8   :  { %v2733_v59 = vadd.f32 %v2732_v9, %v2731_v41  ;;  %v3581_v26 = vmul.f32 -1.442695, %v2895_v16  ;;  %v8711_v41 = vld [vmem:[#allocation42_spill] sm:$0xff] }
 0x6e9   :  { %3909 = vpow2.f32 %v3580_v1  ;;  %v3311_v16 = vld [vmem:[%s7785_s5 + $0x30] sm:$0xff] }
 0x6ea   :  { %3911 = vrcp.f32 %v2728_v0  ;;  %v7527_v17 = vsel %vm2742_vm4, %v2733_v59, %v7134_v37  ;;  %v8712_v0 = vld [vmem:[#allocation20_spill] sm:$0xff] }
 0x6eb   :  { %3913 = vtanh.f32 %v2733_v59  ;;  %v3314_v59 = vld [vmem:[%s7785_s5 + $0x48] sm:$0xff] }
 0x6ec   :  { %3915 = vpow2.f32 %v3581_v26  ;;  %v3309_v26 = vld [vmem:[%s7785_s5 + $0x20] sm:$0xff] }
 0x6f4   :  { %v3908_v5 = vpop.eup %3907 }
 0x6f5   :  { %v2899_v14 = vadd.f32 1.0, %v3908_v5  ;;  %v3308_v5 = vld [vmem:[%s7785_s5 + $0x18] sm:$0xff] }
 0x6f6   :  { %v3910_v24 = vpop.eup %3909 }
 0x6f7   :  { %v3912_v25 = vpop.eup %3911  ;;  %3917 = vrcp.f32 %v2899_v14  ;;  %v2905_v37 = vadd.f32 1.0, %v3910_v24  ;;  %v3306_v14 = vld [vmem:[%s7785_s5 + $0x8] sm:$0xff]  ;;  %v3305_v24 = vld [vmem:[%s7785_s5] sm:$0xff] }
 0x6f8   :  { %v3914_v27 = vpop.eup %3913  ;;  %3919 = vtanh.f32 %v2894_v46  ;;  %v3307_v46 = vld [vmem:[%s7785_s5 + $0x10] sm:$0xff] }
 0x6f9   :  { %3921 = vrcp.f32 %v2905_v37  ;;  %v2735_v31 = vmul.f32 %v3914_v27, %v3912_v25  ;;  %v3336_v25 = vld [vmem:[%s7786_s6 + $0x78] sm:$0xff]  ;;  %v3335_v37 = vld [vmem:[%s7786_s6 + $0x70] sm:$0xff]  ;;  %v3334_v27 = vld [vmem:[%s7786_s6 + $0x68] sm:$0xff] }
 0x6fb   :  { %v7537_v61 = vsel %vm2742_vm4, %v2735_v31, %v7144_v8  ;;  %v3333_v31 = vld [vmem:[%s7786_s6 + $0x60] sm:$0xff] }
 0x6fc   :  { %3001 = vmatmul.mubr.f32.vlgmr.msra.gmra.mxu0 %v7537_v61  ;;  %3072 = vmatmul.mubr.f32.vlgmr.msra.gmra.mxu1 %v7537_v61 }
 0x6fd   :  { %3120 = vmatpush1.msra.mxu0 %v6593_v29  ;;  %3191 = vmatpush1.msra.mxu1 %v7152_v58  ;;  %v3916_v29 = vpop.eup %3915  ;;  %v8692_v58 = vld [vmem:[#allocation11_spill] sm:$0xff] }
 0x6fe   :  { %3121 = vmatprep.subr.mxu0 %v6600_v49  ;;  %3192 = vmatprep.subr.mxu1 %v7159_v2  ;;  %v8694_v2 = vld [vmem:[#allocation21_spill] sm:$0xff] }
 0x6ff   :  { %3122 = vmatpush1.msra.mxu0 %v6607_v55  ;;  %3193 = vmatpush1.msra.mxu1 %v7166_v62  ;;  %v8695_v62 = vld [vmem:[#allocation69_spill] sm:$0xff] }
 0x700   :  { %3123 = vmatprep.subr.mxu0 %v6614_v52  ;;  %3194 = vmatprep.subr.mxu1 %v7173_v34  ;;  %v8696_v34 = vld [vmem:[#allocation12_spill] sm:$0xff] }
 0x701   :  { %3124 = vmatpush1.msra.mxu0 %v6621_v21  ;;  %3195 = vmatpush1.msra.mxu1 %v7180_v7  ;;  %v2912_v21 = vadd.f32 1.0, %v3916_v29  ;;  %v8697_v7 = vld [vmem:[#allocation23_spill] sm:$0xff] }
 0x702   :  { %3125 = vmatprep.subr.mxu0 %v6628_v28  ;;  %3196 = vmatprep.subr.mxu1 %v7187_v38  ;;  %v8699_v38 = vld [vmem:[#allocation25_spill] sm:$0xff]  ;;  %v3332_v29 = vld [vmem:[%s7786_s6 + $0x58] sm:$0xff] }
 0x703   :  { %3126 = vmatpush1.msra.mxu0 %v6635_v48  ;;  %3197 = vmatpush1.msra.mxu1 %v7194_v44  ;;  %3923 = vrcp.f32 %v2912_v21  ;;  %v8700_v44 = vld [vmem:[#allocation15_spill] sm:$0xff] }
 0x704   :  { %v3918_v49 = vpop.eup %3917  ;;  %3127 = vmatprep.subr.mxu0 %v6642_v13  ;;  %3198 = vmatprep.subr.mxu1 %v7201_v12  ;;  %v8687_v13 = vld [vmem:[#allocation16_spill] sm:$0xff]  ;;  %v8701_v12 = vld [vmem:[#allocation27_spill] sm:$0xff] }
 0x705   :  { %v3920_v55 = vpop.eup %3919  ;;  %3128 = vmatpush1.msra.mxu0 %v6649_v47  ;;  %3199 = vmatpush1.msra.mxu1 %v7208_v22  ;;  %v2925_v47 = vpop.permute.xlu1 %2924  ;;  %v8702_v22 = vld [vmem:[#allocation17_spill] sm:$0xff]  ;;  %v3328_v21 = vld [vmem:[%s7786_s6 + $0x38] sm:$0xff] }
 0x706   :  { %v3922_v52 = vpop.eup %3921  ;;  %3129 = vmatprep.subr.mxu0 %v6656_v53  ;;  %3200 = vmatprep.subr.mxu1 %v7215_v11  ;;  %v2916_v28 = vmul.f32 %v3920_v55, %v3918_v49  ;;  %vm2926_vm5 = vcmp.eq.s32.totalorder %v2925_v47, 1  ;;  %v8688_v53 = vld [vmem:[#allocation10_spill] sm:$0xff]  ;;  %v8703_v11 = vld [vmem:[#allocation29_spill] sm:$0xff]  ;;  %v3324_v47 = vld [vmem:[%s7786_s6 + $0x18] sm:$0xff] }
 0x707   :  { %v2915_v48 = vmul.f32 %v3922_v52, %v7260_v19  ;;  %3130 = vmatpush1.msra.mxu0 %v6664_v40  ;;  %3201 = vmatpush1.msra.mxu1 %v7223_v23  ;;  %v8704_v23 = vld [vmem:[#allocation19_spill] sm:$0xff]  ;;  %v3331_v49 = vld [vmem:[%s7786_s6 + $0x50] sm:$0xff]  ;;  %v3330_v55 = vld [vmem:[%s7786_s6 + $0x48] sm:$0xff] }
 0x708   :  { %3131 = vmatprep.subr.mxu0 %v6671_v32  ;;  %3202 = vmatprep.subr.mxu1 %v8687_v13  ;;  %v8689_v32 = vld [vmem:[#allocation52_spill] sm:$0xff] }
 0x709   :  { %v2917_v8 = vadd.f32 %v2916_v28, %v2915_v48  ;;  %3132 = vmatpush1.msra.mxu0 %v6678_v39  ;;  %3203 = vmatpush1.msra.mxu1 %v7239_v15  ;;  %v8690_v39 = vld [vmem:[#allocation18_spill] sm:$0xff]  ;;  %v3329_v52 = vld [vmem:[%s7786_s6 + $0x40] sm:$0xff]  ;;  %v3326_v48 = vld [vmem:[%s7786_s6 + $0x28] sm:$0xff] }
 0x70a   :  { %3133 = vmatprep.subr.mxu0 %v6685_v54  ;;  %3204 = vmatprep.subr.mxu1 %v7247_v4  ;;  %v8691_v54 = vld [vmem:[#allocation63_spill] sm:$0xff]  ;;  %v8706_v15 = vld [vmem:[#allocation34_spill] sm:$0xff]  ;;  %v3325_v13 = vld [vmem:[%s7786_s6 + $0x20] sm:$0xff] }
 0x70b   :  { %3134 = vmatpush1.msra.mxu0 %v6692_v36  ;;  %3205 = vmatpush1.msra.mxu1 %v8688_v53  ;;  %3925 = vtanh.f32 %v2917_v8  ;;  %v7574_v40 = vsel %vm2926_vm5, %v2917_v8, %v7260_v19  ;;  %v8693_v36 = vld [vmem:[#allocation65_spill] sm:$0xff]  ;;  %v8705_v4 = vld [vmem:[#allocation31_spill] sm:$0xff]  ;;  %v8707_v19 = vld [vmem:[#allocation36_spill] sm:$0xff] }
 0x70c   :  { %3135 = vmatprep.subr.mxu0 %v6703_v51  ;;  %3206 = vmatprep.subr.mxu1 %v7266_v10  ;;  %v8698_v51 = vld [vmem:[#allocation13_spill] sm:$0xff]  ;;  %v8708_v10 = vld [vmem:[#allocation38_spill] sm:$0xff] }
 0x70d   :  { %3136 = vmatpush1.msra.mxu0 %v8689_v32  ;;  %3207 = vmatpush1.msra.mxu1 %v8690_v39  ;;  %v3327_v28 = vld [vmem:[%s7786_s6 + $0x30] sm:$0xff]  ;;  %v3322_v53 = vld [vmem:[%s7786_s6 + $0x8] sm:$0xff]  ;;  %v3321_v32 = vld [vmem:[%s7786_s6] sm:$0xff] }
 0x70e   :  { %3137 = vmatprep.subr.mxu0 %v8691_v54  ;;  %3208 = vmatprep.subr.mxu1 %v8692_v58  ;;  %v3323_v8 = vld [vmem:[%s7786_s6 + $0x10] sm:$0xff]  ;;  %v83_v39 = vld [vmem:[%s7780_s0 + $0x1c0] sm:$0xff]  ;;  %v85_v58 = vld [vmem:[%s7780_s0 + $0x1c8] sm:$0xff] }
 0x70f   :  { %3138 = vmatpush1.msra.mxu0 %v8693_v36  ;;  %3209 = vmatpush1.msra.mxu1 %v8694_v2 }
 0x710   :  { %3139 = vmatprep.subr.mxu0 %v8695_v62  ;;  %3210 = vmatprep.subr.mxu1 %v8696_v34  ;;  %v3924_v43 = vpop.eup %3923 }
 0x711   :  { %3140 = vmatpush1.msra.mxu0 %v8697_v7  ;;  %3211 = vmatpush1.msra.mxu1 %v8698_v51 }
 0x712   :  { %3141 = vmatprep.subr.mxu0 %v8699_v38  ;;  %3212 = vmatprep.subr.mxu1 %v8700_v44 }
 0x713   :  { %3142 = vmatpush1.msra.mxu0 %v8701_v12  ;;  %3213 = vmatpush1.msra.mxu1 %v8702_v22  ;;  %v87_v12 = vld [vmem:[%s7780_s0 + $0x1d0] sm:$0xff] }
 0x714   :  { %3143 = vmatprep.subr.mxu0 %v8703_v11  ;;  %3214 = vmatprep.subr.mxu1 %v8704_v23 }
 0x715   :  { %3144 = vmatpush1.msra.mxu0 %v8705_v4  ;;  %3215 = vmatpush1.msra.mxu1 %v8706_v15 }
 0x716   :  { %3145 = vmatprep.subr.mxu0 %v8707_v19  ;;  %3216 = vmatprep.subr.mxu1 %v8708_v10  ;;  %v3508_v10 = vld [vmem:[%s7781_s1 + $0x20] sm:$0xff] }
 0x717   :  { %3146 = vmatpush1.msra.mxu0 %v8709_v42  ;;  %3217 = vmatpush1.msra.mxu1 %v8710_v35  ;;  %v3509_v35 = vld [vmem:[%s7781_s1 + $0x28] sm:$0xff] }
 0x718   :  { %v3926_v9 = vpop.eup %3925  ;;  %3147 = vmatprep.subr.mxu0 %v8711_v41  ;;  %3218 = vmatprep.subr.mxu1 %v8712_v0 }
 0x719   :  { %3148 = vmatpush1.msra.mxu0 %v8713_v18  ;;  %3219 = vmatpush1.msra.mxu1 %v7402_v33  ;;  %v2919_v1 = vmul.f32 %v3926_v9, %v3924_v43  ;;  %v3317_v33 = vld [vmem:[%s7785_s5 + $0x60] sm:$0xff] }
 0x71a   :  { %3149 = vmatprep.subr.mxu0 %v7408_v3  ;;  %3220 = vmatprep.subr.mxu1 %v7414_v56  ;;  %v3320_v3 = vld [vmem:[%s7785_s5 + $0x78] sm:$0xff]  ;;  %v3319_v56 = vld [vmem:[%s7785_s5 + $0x70] sm:$0xff] }
 0x71b   :  { %3150 = vmatpush1.msra.mxu0 %v7420_v30  ;;  %3183 = vmatprep.mubr.f32.mxu0 %v8173_v57  ;;  %v7610_v20 = vsel %vm2926_vm5, %v2919_v1, %v7427_v6  ;;  %v3318_v30 = vld [vmem:[%s7785_s5 + $0x68] sm:$0xff]  ;;  %v3316_v6 = vld [vmem:[%s7785_s5 + $0x58] sm:$0xff] }
 0x71c   :  { %3221 = vmatpush1.msra.mxu1 %v7432_v50  ;;  %3254 = vmatprep.mubr.f32.mxu1 %v8173_v57  ;;  %v3315_v50 = vld [vmem:[%s7785_s5 + $0x50] sm:$0xff] }
 0x71d   :  { %3184 = vmatmul.mubr.f32.vlgmr.msra.gmra.mxu0 %v7610_v20  ;;  %3255 = vmatmul.mubr.f32.vlgmr.msra.gmra.mxu1 %v7610_v20 }
 0x71e   :  { %3663 = vmatprep.subr.mxu1 %v8173_v57  ;;  %3628 = vmatprep.subr.mxu0 %v8173_v57 }
 0x71f   :  { %3664 = vmatpush3.msra.mxu1 %v3320_v3  ;;  %3695 = vmatprep.mubr.msk.f32.mxu1 %vm4221_vm6, %v8173_v57 }
 0x720   :  { %3665 = vmatprep.subr.mxu1 %v8173_v57  ;;  %3660 = vmatprep.mubr.msk.f32.mxu0 %vm4221_vm6, %v8173_v57 }
 0x721   :  { %3666 = vmatpush3.msra.mxu1 %v3319_v56  ;;  %3629 = vmatpush3.msra.mxu0 %v3336_v25 }
 0x722   :  { %3667 = vmatprep.subr.mxu1 %v8173_v57  ;;  %3630 = vmatprep.subr.mxu0 %v8173_v57 }
 0x723   :  { %3668 = vmatpush3.msra.mxu1 %v3318_v30  ;;  %3631 = vmatpush3.msra.mxu0 %v3335_v37  ;;  %v3111_v37 = vpop.permute.xlu0 %3110 }
 0x724   :  { %3669 = vmatprep.subr.mxu1 %v8173_v57  ;;  %3632 = vmatprep.subr.mxu0 %v8173_v57  ;;  %vm3112_vm7 = vcmp.eq.s32.totalorder %v3111_v37, 1 }
 0x725   :  { %3670 = vmatpush3.msra.mxu1 %v3317_v33  ;;  %3633 = vmatpush3.msra.mxu0 %v3334_v27 }
 0x726   :  { %3671 = vmatprep.subr.mxu1 %v8173_v57  ;;  %3634 = vmatprep.subr.mxu0 %v8173_v57 }
 0x727   :  { %3672 = vmatpush3.msra.mxu1 %v3316_v6  ;;  %3635 = vmatpush3.msra.mxu0 %v3333_v31 }
 0x728   :  { %3673 = vmatprep.subr.mxu1 %v8173_v57  ;;  %3636 = vmatprep.subr.mxu0 %v8173_v57 }
 0x729   :  { %3674 = vmatpush3.msra.mxu1 %v3315_v50  ;;  %3637 = vmatpush3.msra.mxu0 %v3332_v29 }
 0x72a   :  { %3675 = vmatprep.subr.mxu1 %v8173_v57  ;;  %3638 = vmatprep.subr.mxu0 %v8173_v57 }
 0x72b   :  { %3676 = vmatpush3.msra.mxu1 %v3314_v59  ;;  %3639 = vmatpush3.msra.mxu0 %v3331_v49 }
 0x72c   :  { %3677 = vmatprep.subr.mxu1 %v8173_v57  ;;  %3640 = vmatprep.subr.mxu0 %v8173_v57 }
 0x72d   :  { %3678 = vmatpush3.msra.mxu1 %v3313_v60  ;;  %3641 = vmatpush3.msra.mxu0 %v3330_v55 }
 0x72e   :  { %3679 = vmatprep.subr.mxu1 %v8173_v57  ;;  %3642 = vmatprep.subr.mxu0 %v8173_v57 }
 0x72f   :  { %3680 = vmatpush3.msra.mxu1 %v3312_v63  ;;  %3643 = vmatpush3.msra.mxu0 %v3329_v52  ;;  %v3511_v63 = vld [vmem:[%s7781_s1 + $0x38] sm:$0xff] }
 0x730   :  { %3681 = vmatprep.subr.mxu1 %v8173_v57  ;;  %3644 = vmatprep.subr.mxu0 %v8173_v57 }
 0x731   :  { %3682 = vmatpush3.msra.mxu1 %v3311_v16  ;;  %3645 = vmatpush3.msra.mxu0 %v3328_v21 }
 0x732   :  { %3683 = vmatprep.subr.mxu1 %v8173_v57  ;;  %3646 = vmatprep.subr.mxu0 %v8173_v57 }
 0x733   :  { %3684 = vmatpush3.msra.mxu1 %v3310_v45  ;;  %3647 = vmatpush3.msra.mxu0 %v3327_v28 }
 0x734   :  { %3685 = vmatprep.subr.mxu1 %v8173_v57  ;;  %3648 = vmatprep.subr.mxu0 %v8173_v57 }
 0x735   :  { %3686 = vmatpush3.msra.mxu1 %v3309_v26  ;;  %3649 = vmatpush3.msra.mxu0 %v3326_v48  ;;  %v3510_v26 = vld [vmem:[%s7781_s1 + $0x30] sm:$0xff] }
 0x736   :  { %3687 = vmatprep.subr.mxu1 %v8173_v57  ;;  %3650 = vmatprep.subr.mxu0 %v8173_v57 }
 0x737   :  { %3688 = vmatpush3.msra.mxu1 %v3308_v5  ;;  %3651 = vmatpush3.msra.mxu0 %v3325_v13 }
 0x738   :  { %3689 = vmatprep.subr.mxu1 %v8173_v57  ;;  %3652 = vmatprep.subr.mxu0 %v8173_v57 }
 0x739   :  { %3690 = vmatpush3.msra.mxu1 %v3307_v46  ;;  %3653 = vmatpush3.msra.mxu0 %v3324_v47 }
 0x73a   :  { %3691 = vmatprep.subr.mxu1 %v8173_v57  ;;  %3654 = vmatprep.subr.mxu0 %v8173_v57 }
 0x73b   :  { %3692 = vmatpush3.msra.mxu1 %v3306_v14  ;;  %3655 = vmatpush3.msra.mxu0 %v3323_v8 }
 0x73c   :  { %3693 = vmatprep.subr.mxu1 %v8173_v57  ;;  %3656 = vmatprep.subr.mxu0 %v8173_v57 }
 0x73d   :  { %3694 = vmatpush3.msra.mxu1 %v3305_v24  ;;  %3657 = vmatpush3.msra.mxu0 %v3322_v53 }
 0x73e   :  { %3658 = vmatprep.subr.mxu0 %v8173_v57  ;;  %v89_v57 = vld [vmem:[%s7780_s0 + $0x1d8] sm:$0xff] }
 0x73f   :  { %3659 = vmatpush3.msra.mxu0 %v3321_v32  ;;  %v3294_v32 = vpop.permute.xlu1 %3293 }
 0x740   :  { %vm3295_vm8 = vcmp.eq.s32.totalorder %v3294_v32, 1 }
 0x7bc   :  { %v3002_v54 = vpop.f32.mrf.mxu0  ;;  %v3073_v7 = vpop.f32.mrf.mxu1 }
 0x7bd   :  { %v3078_v36 = vadd.f32 %v3002_v54, %v83_v39  ;;  %v3080_v23 = vadd.f32 %v3073_v7, %v87_v12 }
 0x7be   :  { %v3004_v2 = vpop.f32.mrf.mxu0  ;;  %v3075_v38 = vpop.f32.mrf.mxu1 }
 0x7bf   :  { %v3582_v62 = vmul.f32 -1.442695, %v3078_v36  ;;  %v3079_v34 = vadd.f32 %v3004_v2, %v85_v58  ;;  %v3081_v44 = vadd.f32 %v3075_v38, %v89_v57 }
 0x7c1   :  { %3927 = vpow2.f32 %v3582_v62  ;;  %v3583_v51 = vmul.f32 -1.442695, %v3079_v34  ;;  %v3584_v22 = vmul.f32 -1.442695, %v3081_v44  ;;  %v3588_v62 = vld [vmem:[%s7787_s7] ss:$0 sm:$0xff] }
 0x7c3   :  { %3929 = vpow2.f32 %v3583_v51 }
 0x7c4   :  { %3931 = vpow2.f32 %v3584_v22 }
 0x7ce   :  { %v3928_v11 = vpop.eup %3927 }
 0x7cf   :  { %v3085_v4 = vadd.f32 1.0, %v3928_v11 }
 0x7d0   :  { %v3930_v15 = vpop.eup %3929 }
 0x7d1   :  { %3933 = vrcp.f32 %v3085_v4  ;;  %v3091_v19 = vadd.f32 1.0, %v3930_v15  ;;  %v3932_v43 = vpop.eup %3931 }
 0x7d2   :  { %3935 = vtanh.f32 %v3080_v23  ;;  %v3098_v6 = vadd.f32 1.0, %v3932_v43 }
 0x7d3   :  { %3937 = vrcp.f32 %v3091_v19 }
 0x7dd   :  { %v3185_v42 = vpop.f32.mrf.mxu0  ;;  %v3256_v50 = vpop.f32.mrf.mxu1 }
 0x7de   :  { %v3934_v9 = vpop.eup %3933  ;;  %v3261_v41 = vadd.f32 %v3508_v10, %v3185_v42  ;;  %v3263_v46 = vadd.f32 %v3510_v26, %v3256_v50 }
 0x7df   :  { %v3936_v0 = vpop.eup %3935  ;;  %v3187_v18 = vpop.f32.mrf.mxu0 }
 0x7e0   :  { %v3938_v1 = vpop.eup %3937  ;;  %v3585_v3 = vmul.f32 -1.442695, %v3261_v41  ;;  %v3262_v56 = vadd.f32 %v3509_v35, %v3187_v18  ;;  %v3102_v30 = vmul.f32 %v3936_v0, %v3934_v9  ;;  %v3258_v16 = vpop.f32.mrf.mxu1 }
 0x7e1   :  { %v3101_v33 = vmul.f32 %v3938_v1, %v7527_v17  ;;  %v3264_v45 = vadd.f32 %v3511_v63, %v3258_v16 }
 0x7e2   :  { %3939 = vpow2.f32 %v3585_v3  ;;  %v3586_v59 = vmul.f32 -1.442695, %v3262_v56 }
 0x7e3   :  { %v3103_v60 = vadd.f32 %v3102_v30, %v3101_v33  ;;  %v3587_v5 = vmul.f32 -1.442695, %v3264_v45 }
 0x7e4   :  { %3941 = vpow2.f32 %v3586_v59 }
 0x7e5   :  { %3943 = vrcp.f32 %v3098_v6 }
 0x7e6   :  { %3945 = vtanh.f32 %v3103_v60 }
 0x7e7   :  { %3947 = vpow2.f32 %v3587_v5 }
 0x7ef   :  { %v3940_v17 = vpop.eup %3939 }
 0x7f0   :  { %v3268_v14 = vadd.f32 1.0, %v3940_v17 }
 0x7f1   :  { %v3942_v24 = vpop.eup %3941 }
 0x7f2   :  { %v3944_v25 = vpop.eup %3943  ;;  %3949 = vrcp.f32 %v3268_v14  ;;  %v3274_v27 = vadd.f32 1.0, %v3942_v24 }
 0x7f3   :  { %v3946_v31 = vpop.eup %3945  ;;  %3951 = vtanh.f32 %v3263_v46 }
 0x7f4   :  { %3953 = vrcp.f32 %v3274_v27  ;;  %v3105_v29 = vmul.f32 %v3946_v31, %v3944_v25  ;;  %v3948_v55 = vpop.eup %3947 }
 0x7f5   :  { %v3281_v48 = vadd.f32 1.0, %v3948_v55 }
 0x7f6   :  { %v3113_v49 = vsel %vm3112_vm7, %v3105_v29, %v7537_v61 }
 0x7f7   :  { %3696 = vmatmul.mubr.f32.vlgmr.msra.gmra.mxu1 %v3113_v49  ;;  %3955 = vrcp.f32 %v3281_v48 }
 0x7ff   :  { %v3950_v52 = vpop.eup %3949 }
 0x800   :  { %v3952_v21 = vpop.eup %3951 }
 0x801   :  { %v3954_v28 = vpop.eup %3953  ;;  %v3285_v13 = vmul.f32 %v3952_v21, %v3950_v52 }
 0x802   :  { %v3284_v47 = vmul.f32 %v3954_v28, %v7574_v40 }
 0x804   :  { %v3286_v8 = vadd.f32 %v3285_v13, %v3284_v47  ;;  %v3956_v53 = vpop.eup %3955 }
 0x806   :  { %3957 = vtanh.f32 %v3286_v8 }
 0x813   :  { %v3958_v39 = vpop.eup %3957 }
 0x814   :  { %v3288_v54 = vmul.f32 %v3958_v39, %v3956_v53 }
 0x816   :  { %v3296_v58 = vsel %vm3295_vm8, %v3288_v54, %v7610_v20 }
 0x817   :  { %3661 = vmatmul.mubr.f32.vlgmr.msra.gmra.mxu0 %v3296_v58 }
 0x8b7   :  { %v3473_v61 = vpop.f32.mrf.mxu1 }
 0x8b9   :  { %v3697_v36 = vpop.f32.mrf.mxu1 }
 0x8d7   :  { %v3403_v2 = vpop.f32.mrf.mxu0 }
 0x8d8   :  { %v3474_v34 = vadd.f32 %v3473_v61, %v3403_v2 }
 0x8d9   :  { %v3662_v40 = vpop.f32.mrf.mxu0 }
 0x8da   :  { %v3484_v7 = vadd.f32 %v3588_v62, %v3474_v34 }
 0x8dc   :  { %v3589_v51 = vmul.f32 -1.442695, %v3484_v7 }
 0x8de   :  { %3959 = vpow2.f32 %v3589_v51 }
 0x8eb   :  { %v3960_v57 = vpop.eup %3959 }
 0x8ec   :  { %v3488_v38 = vadd.f32 1.0, %v3960_v57 }
 0x8ee   :  { %3961 = vrcp.f32 %v3488_v38 }
 0x8fb   :  { %v3962_v44 = vpop.eup %3961 }
 0x8fc   :  { %3491 = vst [vmem:[%s7788_s8] sm:$0xff] %v3962_v44 }

</bundles_post_ra>
